<compile_context>
chip_gen: v7x
topology: tpu7x:2x2x1
jax: 0.10.0
libtpu: 0.0.40
codegen_flags: <defaults>
</compile_context>

<pallas_src>
import math

import jax
import jax.numpy as jnp
from jax.experimental import pallas as pl
from jax.experimental.pallas import tpu as pltpu

Z_DIM = 20        # latent size (module default)
HIDDEN_DIM = 500  # hidden size (module default)
OUT_DIM = 784     # 28 * 28, fixed by the module
TILE_B = 256      # rows per grid step (fills MXU rows on v6e/v7x, 2x v5e MXU)
BATCH = 512       # demo batch (2 grid steps -> exercises pipelining / megacore)


def _decoder_kernel(z_ref, w1_ref, b1_ref, w2_ref, b2_ref, out_ref):
    # z_ref: [TILE_B, Z_DIM] f32; weights are pinned VMEM-resident across steps.
    z = z_ref[...]

    # Linear(z_dim -> hidden) + ReLU.  Small weight (40 KB) kept in f32.
    h = jnp.dot(z, w1_ref[...], preferred_element_type=jnp.float32) + b1_ref[...]
    h = jnp.maximum(h, 0.0)

    # Linear(hidden -> 784): big weight is bf16 (bf16 x bf16 -> f32 MXU accum).
    logits = jnp.dot(h.astype(jnp.bfloat16), w2_ref[...],
                     preferred_element_type=jnp.float32) + b2_ref[...]

    # Sigmoid -> mean, lane-dense [TILE_B, 784] store.
    out_ref[...] = jax.nn.sigmoid(logits)


def decoder_forward(z, params):
    """z: [B, Z_DIM] -> mean: [B, OUT_DIM] (matches Decoder.forward)."""
    z = z.astype(jnp.float32)
    B = z.shape[0]
    n_tiles = pl.cdiv(B, TILE_B)
    B_pad = n_tiles * TILE_B
    if B_pad != B:
        z = jnp.pad(z, ((0, B_pad - B), (0, 0)))

    w1 = params["w1"].astype(jnp.float32)    # [Z_DIM, HIDDEN]  (pre-transposed)
    b1 = params["b1"].astype(jnp.float32)    # [1, HIDDEN]
    w2 = params["w2"].astype(jnp.bfloat16)   # [HIDDEN, OUT]    (bf16: halves weight DMA)
    b2 = params["b2"].astype(jnp.float32)    # [1, OUT]

    out = pl.pallas_call(
        _decoder_kernel,
        out_shape=jax.ShapeDtypeStruct((B_pad, OUT_DIM), jnp.float32),
        grid=(n_tiles,),
        in_specs=[
            pl.BlockSpec((TILE_B, Z_DIM), lambda i: (i, 0)),       # batch-tiled input
            pl.BlockSpec((Z_DIM, HIDDEN_DIM), lambda i: (0, 0)),   # weights: constant block,
            pl.BlockSpec((1, HIDDEN_DIM), lambda i: (0, 0)),       # DMA'd once, VMEM-resident
            pl.BlockSpec((HIDDEN_DIM, OUT_DIM), lambda i: (0, 0)),
            pl.BlockSpec((1, OUT_DIM), lambda i: (0, 0)),
        ],
        out_specs=pl.BlockSpec((TILE_B, OUT_DIM), lambda i: (i, 0)),
        compiler_params=pltpu.CompilerParams(
            dimension_semantics=("parallel",),       # megacore on v7x
            vmem_limit_bytes=32 * 1024 * 1024,       # plenty: ~4 MB peak working set
        ),
    )(z, w1, b1, w2, b2)
    return out[:B]


def _linear_init(key, fan_in, fan_out):
    """PyTorch nn.Linear-style uniform init; weight stored as [fan_in, fan_out]
    (already transposed for x @ W), bias as [1, fan_out]."""
    kw, kb = jax.random.split(key)
    bound = 1.0 / math.sqrt(fan_in)
    w = jax.random.uniform(kw, (fan_in, fan_out), jnp.float32, -bound, bound)
    b = jax.random.uniform(kb, (1, fan_out), jnp.float32, -bound, bound)
    return w, b


def init_decoder_params(key, hidden_dim=HIDDEN_DIM, z_dim=Z_DIM):
    k1, k2 = jax.random.split(key)
    w1, b1 = _linear_init(k1, z_dim, hidden_dim)      # model[0]: Linear(z_dim, hidden)
    w2, b2 = _linear_init(k2, hidden_dim, OUT_DIM)    # model[2]: Linear(hidden, 784)
    return dict(w1=w1, b1=b1, w2=w2, b2=b2)


def _reference_forward(z, params):
    """Pure-JAX f32 reference of Decoder.forward (for tolerance check only)."""
    h = jnp.maximum(z @ params["w1"] + params["b1"], 0.0)
    return jax.nn.sigmoid(h @ params["w2"] + params["b2"])


if __name__ == "__main__":
    root = jax.random.PRNGKey(0)
    k_z, k_params = jax.random.split(root)

    z = jax.random.normal(k_z, (BATCH, Z_DIM), jnp.float32)
    params = init_decoder_params(k_params)

    mean = jax.block_until_ready(decoder_forward(z, params))

    assert mean.shape == (BATCH, OUT_DIM)
    assert bool(jnp.all(jnp.isfinite(mean)))
    assert bool(jnp.all((mean >= 0.0) & (mean <= 1.0)))

    # bf16 second-layer weight -> small numeric drift vs. the pure-f32 reference.
    ref = _reference_forward(z, params)
    assert bool(jnp.allclose(mean, ref, atol=2e-2)), float(jnp.max(jnp.abs(mean - ref)))

    print("KERNEL_OK")
</pallas_src>

<mosaic_0001>
module attributes {stable_mosaic.version = 11 : i64} {
  func.func @_decoder_kernel(%arg0: i32, %arg1: memref<256x20xf32, #tpu.memory_space<vmem>>, %arg2: memref<20x500xf32, #tpu.memory_space<vmem>>, %arg3: memref<1x500xf32, #tpu.memory_space<vmem>>, %arg4: memref<500x784xbf16, #tpu.memory_space<vmem>>, %arg5: memref<1x784xf32, #tpu.memory_space<vmem>>, %arg6: memref<256x784xf32, #tpu.memory_space<vmem>>) attributes {dimension_semantics = [#tpu.dimension_semantics<parallel>], iteration_bounds = array<i64: 2>, scalar_prefetch = 0 : i64, scratch_operands = 0 : i64, tpu.core_type = #tpu.core_type<tc>, window_params = [{transform_indices = @transform_0, window_bounds = array<i64: 256, 20>}, {pipeline_mode = #tpu.pipeline_mode<synchronous>, transform_indices = @transform_1, window_bounds = array<i64: 20, 500>}, {pipeline_mode = #tpu.pipeline_mode<synchronous>, transform_indices = @transform_2, window_bounds = array<i64: 1, 500>}, {pipeline_mode = #tpu.pipeline_mode<synchronous>, transform_indices = @transform_3, window_bounds = array<i64: 500, 784>}, {pipeline_mode = #tpu.pipeline_mode<synchronous>, transform_indices = @transform_4, window_bounds = array<i64: 1, 784>}, {transform_indices = @transform_5, window_bounds = array<i64: 256, 784>}]} {
    %c0 = arith.constant 0 : index
    %c0_0 = arith.constant 0 : index
    %0 = vector.load %arg1[%c0, %c0_0] : memref<256x20xf32, #tpu.memory_space<vmem>>, vector<256x20xf32>
    %c0_1 = arith.constant 0 : index
    %c0_2 = arith.constant 0 : index
    %1 = vector.load %arg2[%c0_1, %c0_2] : memref<20x500xf32, #tpu.memory_space<vmem>>, vector<20x500xf32>
    %cst = arith.constant dense<0.000000e+00> : vector<256x500xf32>
    %2 = tpu.matmul %0, %1, %cst {dimension_numbers = #tpu.dot_dimension_numbers<[1], [0], [0], [1], [0, 0, 1, 1], [], []>} : vector<256x20xf32>, vector<20x500xf32>, vector<256x500xf32> -> vector<256x500xf32>
    %c0_3 = arith.constant 0 : index
    %c0_4 = arith.constant 0 : index
    %3 = vector.load %arg3[%c0_3, %c0_4] : memref<1x500xf32, #tpu.memory_space<vmem>>, vector<1x500xf32>
    %4 = vector.broadcast %3 : vector<1x500xf32> to vector<256x500xf32>
    %5 = arith.addf %2, %4 : vector<256x500xf32>
    %cst_5 = arith.constant 0.000000e+00 : f32
    %6 = vector.broadcast %cst_5 : f32 to vector<256x500xf32>
    %7 = arith.maximumf %5, %6 : vector<256x500xf32>
    %8 = arith.truncf %7 : vector<256x500xf32> to vector<256x500xbf16>
    %c0_6 = arith.constant 0 : index
    %c0_7 = arith.constant 0 : index
    %9 = vector.load %arg4[%c0_6, %c0_7] : memref<500x784xbf16, #tpu.memory_space<vmem>>, vector<500x784xbf16>
    %cst_8 = arith.constant dense<0.000000e+00> : vector<256x784xf32>
    %10 = tpu.matmul %8, %9, %cst_8 {dimension_numbers = #tpu.dot_dimension_numbers<[1], [0], [0], [1], [0, 0, 1, 1], [], []>} : vector<256x500xbf16>, vector<500x784xbf16>, vector<256x784xf32> -> vector<256x784xf32>
    %c0_9 = arith.constant 0 : index
    %c0_10 = arith.constant 0 : index
    %11 = vector.load %arg5[%c0_9, %c0_10] : memref<1x784xf32, #tpu.memory_space<vmem>>, vector<1x784xf32>
    %12 = vector.broadcast %11 : vector<1x784xf32> to vector<256x784xf32>
    %13 = arith.addf %10, %12 : vector<256x784xf32>
    %14 = arith.negf %13 : vector<256x784xf32>
    %15 = math.exp %14 : vector<256x784xf32>
    %cst_11 = arith.constant 1.000000e+00 : f32
    %16 = vector.broadcast %cst_11 : f32 to vector<256x784xf32>
    %17 = arith.addf %16, %15 : vector<256x784xf32>
    %18 = arith.divf %16, %17 : vector<256x784xf32>
    %c0_12 = arith.constant 0 : index
    %c0_13 = arith.constant 0 : index
    %19 = vector.load %arg6[%c0_12, %c0_13] : memref<256x784xf32, #tpu.memory_space<vmem>>, vector<256x784xf32>
    tpu.vector_store %arg6[%c0_12, %c0_13], %18 {strides = array<i32>} : memref<256x784xf32, #tpu.memory_space<vmem>>, vector<256x784xf32>,
    return
  }
  func.func @transform_0(%arg0: i32) -> (i32, i32) {
    %c0_i32 = arith.constant 0 : i32
    %c0_i32_0 = arith.constant 0 : i32
    return %arg0, %c0_i32 : i32, i32
  }
  func.func @transform_1(%arg0: i32) -> (i32, i32) {
    %c0_i32 = arith.constant 0 : i32
    %c0_i32_0 = arith.constant 0 : i32
    %c0_i32_1 = arith.constant 0 : i32
    return %c0_i32, %c0_i32_0 : i32, i32
  }
  func.func @transform_2(%arg0: i32) -> (i32, i32) {
    %c0_i32 = arith.constant 0 : i32
    %c0_i32_0 = arith.constant 0 : i32
    %c0_i32_1 = arith.constant 0 : i32
    return %c0_i32, %c0_i32_0 : i32, i32
  }
  func.func @transform_3(%arg0: i32) -> (i32, i32) {
    %c0_i32 = arith.constant 0 : i32
    %c0_i32_0 = arith.constant 0 : i32
    %c0_i32_1 = arith.constant 0 : i32
    return %c0_i32, %c0_i32_0 : i32, i32
  }
  func.func @transform_4(%arg0: i32) -> (i32, i32) {
    %c0_i32 = arith.constant 0 : i32
    %c0_i32_0 = arith.constant 0 : i32
    %c0_i32_1 = arith.constant 0 : i32
    return %c0_i32, %c0_i32_0 : i32, i32
  }
  func.func @transform_5(%arg0: i32) -> (i32, i32) {
    %c0_i32 = arith.constant 0 : i32
    %c0_i32_0 = arith.constant 0 : i32
    return %arg0, %c0_i32 : i32, i32
  }
}

</mosaic_0001>

<bundles_post_ra>
// kernel: tpu_custom_call.1
= control target key start
LH: loop header
LB: loop body
LE: loop exit
PB: predicated region body
PF: predicated region fallthrough
CT: control target
= control target key end

     0   :  { %s8188_s18 = smov 0   ;;  %s10831_s0 = inlined_call_operand.vmem [shape: f32[512,20], index: 0, kind: input, shape index: {}]   ;;  %s10832_s1 = inlined_call_operand.vmem [shape: f32[20,500], index: 1, kind: input, shape index: {}]   ;;  %s10833_s2 = inlined_call_operand.vmem [shape: f32[1,500], index: 2, kind: input, shape index: {}]   ;;  %s10834_s3 = inlined_call_operand.vmem [shape: bf16[500,784], index: 3, kind: input, shape index: {}]   ;;  %s10835_s4 = inlined_call_operand.vmem [shape: f32[1,784], index: 4, kind: input, shape index: {}]   ;;  %s10836_s5 = inlined_call_operand.vmem [shape: f32[512,784], index: 5, kind: output, shape index: {}]  }
   0x1 LB: > { %s5714_s19 = sadd.s32 4294967295, %s8155_s18   ;;  %p5718_p0 = scmp.ge.s32.totalorder %s8155_s18, 1  ;;  %s8155_s18 = sphi %s8188_s18, %s15_s18  }
   0x2   : > { %p188_p1 = scmp.lt.s32.totalorder %s8155_s18, 3 }
   0x4   : > { %p189_p2 = pnand %p5718_p0, %p188_p1 }
   0x6   : > { %192 = sbr.rel (%p189_p2) target bundleno = 1066 (0x42a), region = 40 }
   0xd   : > { %v264_v0 = vld [vmem:[%s10832_s1 + $0x8] sm:$0xff]  ;;  %v263_v2 = vld [vmem:[%s10832_s1] sm:$0xff]  ;;  %s5719_s26 = sshll.u32 %s5714_s19, 5  ;;  %v8157_v6 = vmov 0.0   ;;  %vm394_vm0 = vcmask 1043456   ;;  %v266_v8 = vld [vmem:[%s10832_s1 + $0x18] sm:$0xff] }
   0xe   : > { %v268_v1 = vld [vmem:[%s10832_s1 + $0x28] sm:$0xff]  ;;  %v267_v4 = vld [vmem:[%s10832_s1 + $0x20] sm:$0xff]  ;;  %471 = vmatprep.mubr.f32.mxu0 %v8157_v6  ;;  %p218_p3 = scmp.lt.s32.totalorder %s5719_s26, 63  ;;  %728 = vmatprep.mubr.f32.mxu1 %v8157_v6  ;;  %v270_v9 = vld [vmem:[%s10832_s1 + $0x38] sm:$0xff]  ;;  %vm297_vm1 = vcmask 162816   ;;  %vm2585_vm2 = vcmask 1041408  }
   0xf   : > { %v6532_v3 = vpack.c.bf16 %v268_v1, %v264_v0  ;;  %v272_v5 = vld [vmem:[%s10832_s1 + $0x48] sm:$0xf]  ;;  %v6534_v7 = vpack.c.bf16 %v267_v4, %v263_v2  ;;  %v265_v10 = vld [vmem:[%s10832_s1 + $0x10] sm:$0xff]  ;;  %v6536_v11 = vpack.c.bf16 %v270_v9, %v266_v8  ;;  %v274_v14 = vld [vmem:[%s10832_s1 + $0x58] sm:$0xf]  ;;  %vm2536_vm3 = vcmask 949248  }
  0x10   : > { %s11016_s26 = smov (!%p218_p3, %s5719_s26), 63  ;;  %v269_v12 = vld [vmem:[%s10832_s1 + $0x30] sm:$0xff]  ;;  %v271_v15 = vld [vmem:[%s10832_s1 + $0x40] sm:$0xf]  ;;  %v6937_v19 = vld [vmem:[%s10834_s3 + $0xc] ss:$28 sps:$4 sm:$0xff]  }
  0x11   : > { %6533 = vmatprep.subr.bf16.mxu0 %v6532_v3  ;;  %v6538_v13 = vpack.c.bf16 %v269_v12, %v265_v10  ;;  %s5720_s19 = sshll.u32 %s11016_s26, 3  ;;  %6537 = vmatprep.subr.bf16.mxu1 %v6536_v11  ;;  %v6940_v16 = vld [vmem:[%s10834_s3 + $0x4] ss:$28 sps:$4 sm:$0xff]   ;;  %v273_v18 = vld [vmem:[%s10832_s1 + $0x50] sm:$0xf]  ;;  %s6925_s15 = smul.u32 56, %s11016_s26 }
  0x12   : > { %6535 = vmatpush1.bf16.msra.mxu0 %v6534_v7  ;;  %s8238_s22 = scalar_lea.vmem %s10831_s0, %s5720_s19  ;;  %v6935_v20 = vld [vmem:[%s10834_s3 + $0x8] ss:$28 sps:$4 sm:$0xff]   ;;  %v6938_v22 = vld [vmem:[%s10834_s3] ss:$28 sps:$4 sm:$0xff]   ;;  %v6944_v27 = vld [vmem:[%s10834_s3 + $0x38] ss:$28 sps:$4 sm:$0xff]  }
  0x13   : > { %5723 = vmatprep.subr.msk.mxu0 %vm394_vm0, %v272_v5  ;;  %6539 = vmatpush1.bf16.msra.mxu1 %v6538_v13  ;;  %v231_v17 = vld [vmem:[%s8238_s22] sm:$0xff]  ;;  %v232_v21 = vld [vmem:[%s8238_s22 + $0x8] sm:$0xff]  ;;  %v233_v23 = vld [vmem:[%s8238_s22 + $0x10] sm:$0xff]  ;;  %s9628_s17 = scalar_lea.vmem %s10836_s5, %s6925_s15  ;;  %vm5437_vm4 = vcmask 130048  }
  0x14   : > { %5757 = vmatprep.subr.msk.mxu1 %vm394_vm0, %v274_v14  ;;  %v6941_v24 = vld [vmem:[%s10834_s3 + $0x40] ss:$28 sps:$4 sm:$0xff]   ;;  %v6947_v30 = vld [vmem:[%s10834_s3 + $0x78] ss:$28 sps:$4 sm:$0xff]   ;;  %v6950_v33 = vld [vmem:[%s10834_s3 + $0x70] ss:$28 sps:$4 sm:$0xff]  }
  0x15   : > { %v6943_v25 = vld [vmem:[%s10834_s3 + $0x44] ss:$28 sps:$4 sm:$0xff]   ;;  %v234_v26 = vld [vmem:[%s8238_s22 + $0x18] sm:$0xff]  ;;  %v6952_v32 = vld [vmem:[%s10834_s3 + $0x74] ss:$28 sps:$4 sm:$0xff]  }
  0x16   : > { %5724 = vmatpush1.msk.msra.mxu0 %vm394_vm0, %v271_v15  ;;  %v6946_v28 = vld [vmem:[%s10834_s3 + $0x3c] ss:$28 sps:$4 sm:$0xff]   ;;  %v235_v31 = vld [vmem:[%s8238_s22 + $0x20] sm:$0xff]  ;;  %v6955_v34 = vld [vmem:[%s10834_s3 + $0xb4] ss:$28 sps:$4 sm:$0xff]  }
  0x17   : > { %5725 = vmatmul.mubr.msk.f32.vlgmr.msra.gmra.mrb[0].mxu0 %vm297_vm1, %v231_v17  ;;  %2607 = vmatprep.subr.bf16.mxu0 %v6940_v16  ;;  %v6949_v29 = vld [vmem:[%s10834_s3 + $0x7c] ss:$28 sps:$4 sm:$0xff]   ;;  %v6953_v35 = vld [vmem:[%s10834_s3 + $0xb0] ss:$28 sps:$4 sm:$0xff]   ;;  %v6956_v38 = vld [vmem:[%s10834_s3 + $0xa8] ss:$28 sps:$4 sm:$0xff]  }
  0x18   : > { %477 = vmatprep.mubr.f32.mxu0 %v8157_v6  ;;  %5758 = vmatpush1.msk.msra.mxu1 %vm394_vm0, %v273_v18  ;;  %v6958_v36 = vld [vmem:[%s10834_s3 + $0xac] ss:$28 sps:$4 sm:$0xff]   ;;  %v6964_v41 = vld [vmem:[%s10834_s3 + $0xe4] ss:$28 sps:$4 sm:$0xff]   ;;  %v237_v42 = vld [vmem:[%s8238_s22 + $0x30] sm:$0xff] }
  0x19   : > { %5759 = vmatmul.mubr.msk.f32.vlgmr.msra.gmra.mrb[0].mxu1 %vm297_vm1, %v231_v17  ;;  %2993 = vmatprep.subr.bf16.mxu1 %v6937_v19  ;;  %v236_v37 = vld [vmem:[%s8238_s22 + $0x28] sm:$0xff]  ;;  %v6962_v43 = vld [vmem:[%s10834_s3 + $0xe0] ss:$28 sps:$4 sm:$0xff]   ;;  %v6968_v48 = vld [vmem:[%s10834_s3 + $0x118] ss:$28 sps:$4 sm:$0xff]  }
  0x1a   : > { %734 = vmatprep.mubr.f32.mxu1 %v8157_v6  ;;  %2994 = vmatpush1.bf16.msra.mxu1 %v6935_v20  ;;  %v6961_v39 = vld [vmem:[%s10834_s3 + $0xec] ss:$28 sps:$4 sm:$0xff]   ;;  %v6967_v44 = vld [vmem:[%s10834_s3 + $0x124] ss:$28 sps:$4 sm:$0xff]   ;;  %v6970_v46 = vld [vmem:[%s10834_s3 + $0x11c] ss:$28 sps:$4 sm:$0xff]  }
  0x1b   : > { %5726 = vmatmul.mubr.msk.f32.gmra.mrb[2].mxu0 %vm297_vm1, %v232_v21  ;;  %2995 = vmatprep.subr.bf16.mxu1 %v6943_v25  ;;  %v6959_v40 = vld [vmem:[%s10834_s3 + $0xe8] ss:$28 sps:$4 sm:$0xff]   ;;  %v6965_v45 = vld [vmem:[%s10834_s3 + $0x120] ss:$28 sps:$4 sm:$0xff]   ;;  %v6971_v50 = vld [vmem:[%s10834_s3 + $0x158] ss:$28 sps:$4 sm:$0xff]  }
  0x1c   : > { %483 = vmatprep.mubr.f32.mxu0 %v8157_v6  ;;  %2608 = vmatpush1.bf16.msra.mxu0 %v6938_v22  ;;  %v238_v47 = vld [vmem:[%s8238_s22 + $0x38] sm:$0xff]  ;;  %v6976_v51 = vld [vmem:[%s10834_s3 + $0x154] ss:$28 sps:$4 sm:$0xff]   ;;  %v239_v52 = vld [vmem:[%s8238_s22 + $0x40] sm:$0xff] }
  0x1d   : > { %5760 = vmatmul.mubr.msk.f32.gmra.mrb[2].mxu1 %vm297_vm1, %v232_v21  ;;  %2609 = vmatprep.subr.bf16.mxu0 %v6946_v28  ;;  %v6973_v49 = vld [vmem:[%s10834_s3 + $0x15c] ss:$28 sps:$4 sm:$0xff]   ;;  %v6974_v53 = vld [vmem:[%s10834_s3 + $0x150] ss:$28 sps:$4 sm:$0xff]   ;;  %v6980_v58 = vld [vmem:[%s10834_s3 + $0x188] ss:$28 sps:$4 sm:$0xff]  }
  0x1e   : > { %740 = vmatprep.mubr.f32.mxu1 %v8157_v6  ;;  %2996 = vmatpush1.bf16.msra.mxu1 %v6941_v24  ;;  %v6979_v54 = vld [vmem:[%s10834_s3 + $0x194] ss:$28 sps:$4 sm:$0xff]   ;;  %v6982_v56 = vld [vmem:[%s10834_s3 + $0x18c] ss:$28 sps:$4 sm:$0xff]   ;;  %v6988_v61 = vld [vmem:[%s10834_s3 + $0x1c4] ss:$28 sps:$4 sm:$0xff]  }
  0x1f   : > { %5727 = vmatmul.mubr.msk.f32.gmra.mrb[4].mxu0 %vm297_vm1, %v233_v23  ;;  %2997 = vmatprep.subr.bf16.mxu1 %v6949_v29  ;;  %v6977_v55 = vld [vmem:[%s10834_s3 + $0x190] ss:$28 sps:$4 sm:$0xff]   ;;  %v6983_v60 = vld [vmem:[%s10834_s3 + $0x1c8] ss:$28 sps:$4 sm:$0xff]   ;;  %v6986_v63 = vld [vmem:[%s10834_s3 + $0x1c0] ss:$28 sps:$4 sm:$0xff]  }
  0x20   : > { %489 = vmatprep.mubr.f32.mxu0 %v8157_v6  ;;  %2610 = vmatpush1.bf16.msra.mxu0 %v6944_v27  ;;  %v240_v57 = vld [vmem:[%s8238_s22 + $0x48] sm:$0xff]  ;;  %v241_v62 = vld [vmem:[%s8238_s22 + $0x50] sm:$0xff]  ;;  %v6991_v0 = vld [vmem:[%s10834_s3 + $0x204] ss:$28 sps:$4 sm:$0xff]  }
  0x21   : > { %5761 = vmatmul.mubr.msk.f32.gmra.mrb[4].mxu1 %vm297_vm1, %v233_v23  ;;  %2611 = vmatprep.subr.bf16.mxu0 %v6952_v32  ;;  %v6985_v59 = vld [vmem:[%s10834_s3 + $0x1cc] ss:$28 sps:$4 sm:$0xff]   ;;  %v6989_v1 = vld [vmem:[%s10834_s3 + $0x200] ss:$28 sps:$4 sm:$0xff]   ;;  %v6992_v4 = vld [vmem:[%s10834_s3 + $0x1f8] ss:$28 sps:$4 sm:$0xff]  }
  0x22   : > { %746 = vmatprep.mubr.f32.mxu1 %v8157_v6  ;;  %2998 = vmatpush1.bf16.msra.mxu1 %v6947_v30  ;;  %v6994_v2 = vld [vmem:[%s10834_s3 + $0x1fc] ss:$28 sps:$4 sm:$0xff]   ;;  %v243_v7 = vld [vmem:[%s8238_s22 + $0x60] sm:$0xff]  ;;  %v7000_v9 = vld [vmem:[%s10834_s3 + $0x234] ss:$28 sps:$4 sm:$0xff]  }
  0x23   : > { %5728 = vmatmul.mubr.msk.f32.gmra.mrb[6].mxu0 %vm297_vm1, %v234_v26  ;;  %2999 = vmatprep.subr.bf16.mxu1 %v6955_v34  ;;  %v242_v3 = vld [vmem:[%s8238_s22 + $0x58] sm:$0xff]  ;;  %v6998_v10 = vld [vmem:[%s10834_s3 + $0x230] ss:$28 sps:$4 sm:$0xff]   ;;  %v7004_v15 = vld [vmem:[%s10834_s3 + $0x268] ss:$28 sps:$4 sm:$0xff]  }
  0x24   : > { %495 = vmatprep.mubr.f32.mxu0 %v8157_v6  ;;  %2612 = vmatpush1.bf16.msra.mxu0 %v6950_v33  ;;  %v6997_v5 = vld [vmem:[%s10834_s3 + $0x23c] ss:$28 sps:$4 sm:$0xff]   ;;  %v7001_v11 = vld [vmem:[%s10834_s3 + $0x270] ss:$28 sps:$4 sm:$0xff]   ;;  %v7007_v17 = vld [vmem:[%s10834_s3 + $0x2a8] ss:$28 sps:$4 sm:$0xff]  }
  0x25   : > { %5762 = vmatmul.mubr.msk.f32.gmra.mrb[6].mxu1 %vm297_vm1, %v234_v26  ;;  %2613 = vmatprep.subr.bf16.mxu0 %v6958_v36  ;;  %v6995_v8 = vld [vmem:[%s10834_s3 + $0x238] ss:$28 sps:$4 sm:$0xff]   ;;  %v7006_v13 = vld [vmem:[%s10834_s3 + $0x26c] ss:$28 sps:$4 sm:$0xff]   ;;  %v7012_v18 = vld [vmem:[%s10834_s3 + $0x2a4] ss:$28 sps:$4 sm:$0xff]  }
  0x26   : > { %752 = vmatprep.mubr.f32.mxu1 %v8157_v6  ;;  %3000 = vmatpush1.bf16.msra.mxu1 %v6953_v35  ;;  %v7003_v12 = vld [vmem:[%s10834_s3 + $0x274] ss:$28 sps:$4 sm:$0xff]   ;;  %v244_v14 = vld [vmem:[%s8238_s22 + $0x68] sm:$0xff]  ;;  %v7010_v20 = vld [vmem:[%s10834_s3 + $0x2a0] ss:$28 sps:$4 sm:$0xff]  }
  0x27   : > { %5729 = vmatmul.mubr.msk.f32.gmra.mrb[8].mxu0 %vm297_vm1, %v235_v31  ;;  %3001 = vmatprep.subr.bf16.mxu1 %v6961_v39  ;;  %v7009_v16 = vld [vmem:[%s10834_s3 + $0x2ac] ss:$28 sps:$4 sm:$0xff]   ;;  %v245_v19 = vld [vmem:[%s8238_s22 + $0x70] sm:$0xff]  ;;  %v7015_v21 = vld [vmem:[%s10834_s3 + $0x2e4] ss:$28 sps:$4 sm:$0xff]  }
  0x28   : > { %501 = vmatprep.mubr.f32.mxu0 %v8157_v6  ;;  %2614 = vmatpush1.bf16.msra.mxu0 %v6956_v38  ;;  %v7013_v22 = vld [vmem:[%s10834_s3 + $0x2e0] ss:$28 sps:$4 sm:$0xff]   ;;  %v7016_v25 = vld [vmem:[%s10834_s3 + $0x2d8] ss:$28 sps:$4 sm:$0xff]   ;;  %v7022_v30 = vld [vmem:[%s10834_s3 + $0x310] ss:$28 sps:$4 sm:$0xff]  }
  0x29   : > { %5763 = vmatmul.mubr.msk.f32.gmra.mrb[8].mxu1 %vm297_vm1, %v235_v31  ;;  %2615 = vmatprep.subr.bf16.mxu0 %v6964_v41  ;;  %v7018_v23 = vld [vmem:[%s10834_s3 + $0x2dc] ss:$28 sps:$4 sm:$0xff]   ;;  %v7024_v28 = vld [vmem:[%s10834_s3 + $0x314] ss:$28 sps:$4 sm:$0xff]   ;;  %v247_v29 = vld [vmem:[%s8238_s22 + $0x80] sm:$0xff] }
  0x2a   : > { %758 = vmatprep.mubr.f32.mxu1 %v8157_v6  ;;  %3002 = vmatpush1.bf16.msra.mxu1 %v6959_v40  ;;  %v246_v24 = vld [vmem:[%s8238_s22 + $0x78] sm:$0xff]  ;;  %v248_v31 = vld [vmem:[%s8238_s22 + $0x88] sm:$0xff]  ;;  %v249_v32 = vld [vmem:[%s8238_s22 + $0x90] sm:$0xff] }
  0x2b   : > { %5730 = vmatmul.mubr.msk.f32.gmra.mrb[10].mxu0 %vm297_vm1, %v236_v37  ;;  %3003 = vmatprep.subr.bf16.mxu1 %v6967_v44  ;;  %v7021_v26 = vld [vmem:[%s10834_s3 + $0x31c] ss:$28 sps:$4 sm:$0xff]   ;;  %v251_v34 = vld [vmem:[%s8238_s22 + $0xa0] sm:$0xff]  ;;  %v252_v35 = vld [vmem:[%s8238_s22 + $0xa8] sm:$0xff] }
  0x2c   : > { %507 = vmatprep.mubr.f32.mxu0 %v8157_v6  ;;  %2616 = vmatpush1.bf16.msra.mxu0 %v6962_v43  ;;  %v7019_v27 = vld [vmem:[%s10834_s3 + $0x318] ss:$28 sps:$4 sm:$0xff]   ;;  %v7030_v39 = vld [vmem:[%s10834_s3 + $0x34c] ss:$28 sps:$4 sm:$0xff]   ;;  %v255_v40 = vld [vmem:[%s8238_s22 + $0xc0] sm:$0xff] }
  0x2d   : > { %5764 = vmatmul.mubr.msk.f32.gmra.mrb[10].mxu1 %vm297_vm1, %v236_v37  ;;  %2617 = vmatprep.subr.bf16.mxu0 %v6970_v46  ;;  %v250_v33 = vld [vmem:[%s8238_s22 + $0x98] sm:$0xff]  ;;  %v253_v36 = vld [vmem:[%s8238_s22 + $0xb0] sm:$0xff]  ;;  %v256_v43 = vld [vmem:[%s8238_s22 + $0xc8] sm:$0xff] }
  0x2e   : > { %764 = vmatprep.mubr.f32.mxu1 %v8157_v6  ;;  %3004 = vmatpush1.bf16.msra.mxu1 %v6965_v45  ;;  %v254_v37 = vld [vmem:[%s8238_s22 + $0xb8] sm:$0xff]  ;;  %v7027_v38 = vld [vmem:[%s10834_s3 + $0x354] ss:$28 sps:$4 sm:$0xff]   ;;  %v7033_v44 = vld [vmem:[%s10834_s3 + $0x38c] ss:$28 sps:$4 sm:$0xff]  }
  0x2f   : > { %5731 = vmatmul.mubr.msk.f32.gmra.mrb[12].mxu0 %vm297_vm1, %v237_v42  ;;  %3005 = vmatprep.subr.bf16.mxu1 %v6973_v49  ;;  %v7025_v41 = vld [vmem:[%s10834_s3 + $0x350] ss:$28 sps:$4 sm:$0xff]   ;;  %v7036_v46 = vld [vmem:[%s10834_s3 + $0x384] ss:$28 sps:$4 sm:$0xff]  }
  0x30   : > { %513 = vmatprep.mubr.f32.mxu0 %v8157_v6  ;;  %2618 = vmatpush1.bf16.msra.mxu0 %v6968_v48  ;;  %v257_v45 = vld [vmem:[%s8238_s22 + $0xd0] sm:$0xff]  ;;  %v259_v48 = vld [vmem:[%s8238_s22 + $0xe0] sm:$0xff]  ;;  %v260_v49 = vld [vmem:[%s8238_s22 + $0xe8] sm:$0xff] }
  0x31   : > { %5765 = vmatmul.mubr.msk.f32.gmra.mrb[12].mxu1 %vm297_vm1, %v237_v42  ;;  %2619 = vmatprep.subr.bf16.mxu0 %v6976_v51  ;;  %v7028_v42 = vld [vmem:[%s10834_s3 + $0x348] ss:$28 sps:$4 sm:$0xff]   ;;  %v262_v51 = vld [vmem:[%s8238_s22 + $0xf8] sm:$0xff] }
  0x32   : > { %770 = vmatprep.mubr.f32.mxu1 %v8157_v6  ;;  %3006 = vmatpush1.bf16.msra.mxu1 %v6971_v50  ;;  %v261_v50 = vld [vmem:[%s8238_s22 + $0xf0] sm:$0xff] }
  0x33   : > { %5732 = vmatmul.mubr.msk.f32.gmra.mrb[14].mxu0 %vm297_vm1, %v238_v47  ;;  %3007 = vmatprep.subr.bf16.mxu1 %v6979_v54 }
  0x34   : > { %519 = vmatprep.mubr.f32.mxu0 %v8157_v6  ;;  %2620 = vmatpush1.bf16.msra.mxu0 %v6974_v53 }
  0x35   : > { %5766 = vmatmul.mubr.msk.f32.gmra.mrb[14].mxu1 %vm297_vm1, %v238_v47  ;;  %2621 = vmatprep.subr.bf16.mxu0 %v6982_v56  ;;  %v258_v47 = vld [vmem:[%s8238_s22 + $0xd8] sm:$0xff]  ;;  %v275_v56 = vld [vmem:[%s10833_s2] sm:$0xf] }
  0x36   : > { %776 = vmatprep.mubr.f32.mxu1 %v8157_v6  ;;  %3008 = vmatpush1.bf16.msra.mxu1 %v6977_v55 }
  0x37   : > { %5733 = vmatmul.mubr.msk.f32.gmra.mrb[16].mxu0 %vm297_vm1, %v239_v52  ;;  %3009 = vmatprep.subr.bf16.mxu1 %v6985_v59 }
  0x38   : > { %525 = vmatprep.mubr.f32.mxu0 %v8157_v6  ;;  %2622 = vmatpush1.bf16.msra.mxu0 %v6980_v58 }
  0x39   : > { %5767 = vmatmul.mubr.msk.f32.gmra.mrb[16].mxu1 %vm297_vm1, %v239_v52  ;;  %2623 = vmatprep.subr.bf16.mxu0 %v6988_v61  ;;  %v277_v52 = vlaneseq }
  0x3a   : > { %782 = vmatprep.mubr.f32.mxu1 %v8157_v6  ;;  %3010 = vmatpush1.bf16.msra.mxu1 %v6983_v60 }
  0x3b   : > { %5734 = vmatmul.mubr.msk.f32.gmra.mrb[18].mxu0 %vm297_vm1, %v240_v57  ;;  %3011 = vmatprep.subr.bf16.mxu1 %v6991_v0  ;;  %v8602_v53 = vshrl.u32 %v277_v52, 7 }
  0x3c   : > { %531 = vmatprep.mubr.f32.mxu0 %v8157_v6  ;;  %2624 = vmatpush1.bf16.msra.mxu0 %v6986_v63 }
  0x3d   : > { %5768 = vmatmul.mubr.msk.f32.gmra.mrb[18].mxu1 %vm297_vm1, %v240_v57  ;;  %2625 = vmatprep.subr.bf16.mxu0 %v6994_v2  ;;  %10906 = vst [vmem:[#allocation2_spill] sm:$0xff] %v8602_v53  ;;  %v10840_v54 = vsub.s32 0, %v8602_v53  ;;  %v10839_v55 = vsub.s32 2, %v8602_v53  ;;  %v10838_v57 = vsub.s32 1, %v8602_v53  ;;  %v10837_v58 = vsub.s32 3, %v8602_v53 }
  0x3e   : > { %788 = vmatprep.mubr.f32.mxu1 %v8157_v6  ;;  %3012 = vmatpush1.bf16.msra.mxu1 %v6989_v1 }
  0x3f   : > { %5735 = vmatmul.mubr.msk.f32.gmra.mrb[20].mxu0 %vm297_vm1, %v241_v62  ;;  %3013 = vmatprep.subr.bf16.mxu1 %v6997_v5  ;;  %v8617_v59 = vrot.slane %v275_v56, %v10839_v55  ;;  %v8621_v61 = vrot.slane %v275_v56, %v10838_v57 }
  0x40   : > { %537 = vmatprep.mubr.f32.mxu0 %v8157_v6  ;;  %2626 = vmatpush1.bf16.msra.mxu0 %v6992_v4 }
  0x41   : > { %5769 = vmatmul.mubr.msk.f32.gmra.mrb[20].mxu1 %vm297_vm1, %v241_v62  ;;  %2627 = vmatprep.subr.bf16.mxu0 %v7000_v9  ;;  %v8625_v62 = vrot.slane %v275_v56, %v10837_v58 }
  0x42   : > { %794 = vmatprep.mubr.f32.mxu1 %v8157_v6  ;;  %3014 = vmatpush1.bf16.msra.mxu1 %v6995_v8 }
  0x43   : > { %5736 = vmatmul.mubr.msk.f32.gmra.mrb[22].mxu0 %vm297_vm1, %v242_v3  ;;  %3015 = vmatprep.subr.bf16.mxu1 %v7003_v12 }
  0x44   : > { %543 = vmatprep.mubr.f32.mxu0 %v8157_v6  ;;  %2628 = vmatpush1.bf16.msra.mxu0 %v6998_v10 }
  0x45   : > { %5770 = vmatmul.mubr.msk.f32.gmra.mrb[22].mxu1 %vm297_vm1, %v242_v3  ;;  %2629 = vmatprep.subr.bf16.mxu0 %v7006_v13 }
  0x46   : > { %800 = vmatprep.mubr.f32.mxu1 %v8157_v6  ;;  %3016 = vmatpush1.bf16.msra.mxu1 %v7001_v11 }
  0x47   : > { %5737 = vmatmul.mubr.msk.f32.gmra.mrb[24].mxu0 %vm297_vm1, %v243_v7  ;;  %3017 = vmatprep.subr.bf16.mxu1 %v7009_v16 }
  0x48   : > { %549 = vmatprep.mubr.f32.mxu0 %v8157_v6  ;;  %2630 = vmatpush1.bf16.msra.mxu0 %v7004_v15 }
  0x49   : > { %5771 = vmatmul.mubr.msk.f32.gmra.mrb[24].mxu1 %vm297_vm1, %v243_v7  ;;  %2631 = vmatprep.subr.bf16.mxu0 %v7012_v18 }
  0x4a   : > { %806 = vmatprep.mubr.f32.mxu1 %v8157_v6  ;;  %3018 = vmatpush1.bf16.msra.mxu1 %v7007_v17 }
  0x4b   : > { %5738 = vmatmul.mubr.msk.f32.gmra.mrb[26].mxu0 %vm297_vm1, %v244_v14  ;;  %3019 = vmatprep.subr.bf16.mxu1 %v7015_v21 }
  0x4c   : > { %555 = vmatprep.mubr.f32.mxu0 %v8157_v6  ;;  %2632 = vmatpush1.bf16.msra.mxu0 %v7010_v20 }
  0x4d   : > { %5772 = vmatmul.mubr.msk.f32.gmra.mrb[26].mxu1 %vm297_vm1, %v244_v14  ;;  %2633 = vmatprep.subr.bf16.mxu0 %v7018_v23 }
  0x4e   : > { %812 = vmatprep.mubr.f32.mxu1 %v8157_v6  ;;  %3020 = vmatpush1.bf16.msra.mxu1 %v7013_v22 }
  0x4f   : > { %5739 = vmatmul.mubr.msk.f32.gmra.mrb[28].mxu0 %vm297_vm1, %v245_v19  ;;  %3021 = vmatprep.subr.bf16.mxu1 %v7021_v26  ;;  %v7031_v26 = vld [vmem:[%s10834_s3 + $0x388] ss:$28 sps:$4 sm:$0xff]  }
  0x50   : > { %561 = vmatprep.mubr.f32.mxu0 %v8157_v6  ;;  %2634 = vmatpush1.bf16.msra.mxu0 %v7016_v25 }
  0x51   : > { %5773 = vmatmul.mubr.msk.f32.gmra.mrb[28].mxu1 %vm297_vm1, %v245_v19  ;;  %2635 = vmatprep.subr.bf16.mxu0 %v7024_v28 }
  0x52   : > { %818 = vmatprep.mubr.f32.mxu1 %v8157_v6  ;;  %3022 = vmatpush1.bf16.msra.mxu1 %v7019_v27  ;;  %v7034_v27 = vld [vmem:[%s10834_s3 + $0x380] ss:$28 sps:$4 sm:$0xff]  }
  0x53   : > { %5740 = vmatmul.mubr.msk.f32.gmra.mrb[30].mxu0 %vm297_vm1, %v246_v24  ;;  %3023 = vmatprep.subr.bf16.mxu1 %v7027_v38 }
  0x54   : > { %567 = vmatprep.mubr.f32.mxu0 %v8157_v6  ;;  %2636 = vmatpush1.bf16.msra.mxu0 %v7022_v30 }
  0x55   : > { %5774 = vmatmul.mubr.msk.f32.gmra.mrb[30].mxu1 %vm297_vm1, %v246_v24  ;;  %2637 = vmatprep.subr.bf16.mxu0 %v7030_v39 }
  0x56   : > { %824 = vmatprep.mubr.f32.mxu1 %v8157_v6  ;;  %3024 = vmatpush1.bf16.msra.mxu1 %v7025_v41 }
  0x57   : > { %5741 = vmatmul.mubr.msk.f32.gmra.mrb[32].mxu0 %vm297_vm1, %v247_v29  ;;  %3186 = vmatprep.subr.bf16.mxu1 %v7033_v44  ;;  %v7040_v44 = vld [vmem:[%s10834_s3 + $0x3b8] ss:$28 sps:$4 sm:$0xff]  }
  0x58   : > { %573 = vmatprep.mubr.f32.mxu0 %v8157_v6  ;;  %2638 = vmatpush1.bf16.msra.mxu0 %v7028_v42  ;;  %v7037_v42 = vld [vmem:[%s10834_s3 + $0x3c0] ss:$28 sps:$4 sm:$0xff]  }
  0x59   : > { %5775 = vmatmul.mubr.msk.f32.gmra.mrb[32].mxu1 %vm297_vm1, %v247_v29  ;;  %2800 = vmatprep.subr.bf16.mxu0 %v7036_v46 }
  0x5a   : > { %830 = vmatprep.mubr.f32.mxu1 %v8157_v6 }
  0x5b   : > { %5742 = vmatmul.mubr.msk.f32.gmra.mrb[34].mxu0 %vm297_vm1, %v248_v31 }
  0x5c   : > { %579 = vmatprep.mubr.f32.mxu0 %v8157_v6 }
  0x5d   : > { %5776 = vmatmul.mubr.msk.f32.gmra.mrb[34].mxu1 %vm297_vm1, %v248_v31  ;;  %v7039_v31 = vld [vmem:[%s10834_s3 + $0x3c4] ss:$28 sps:$4 sm:$0xff]  }
  0x5e   : > { %836 = vmatprep.mubr.f32.mxu1 %v8157_v6 }
  0x5f   : > { %5743 = vmatmul.mubr.msk.f32.gmra.mrb[36].mxu0 %vm297_vm1, %v249_v32 }
  0x60   : > { %585 = vmatprep.mubr.f32.mxu0 %v8157_v6 }
  0x61   : > { %5777 = vmatmul.mubr.msk.f32.gmra.mrb[36].mxu1 %vm297_vm1, %v249_v32  ;;  %v7042_v32 = vld [vmem:[%s10834_s3 + $0x3bc] ss:$28 sps:$4 sm:$0xff]  }
  0x62   : > { %842 = vmatprep.mubr.f32.mxu1 %v8157_v6 }
  0x63   : > { %5744 = vmatmul.mubr.msk.f32.gmra.mrb[38].mxu0 %vm297_vm1, %v250_v33 }
  0x64   : > { %591 = vmatprep.mubr.f32.mxu0 %v8157_v6 }
  0x65   : > { %5778 = vmatmul.mubr.msk.f32.gmra.mrb[38].mxu1 %vm297_vm1, %v250_v33 }
  0x66   : > { %848 = vmatprep.mubr.f32.mxu1 %v8157_v6 }
  0x67   : > { %5745 = vmatmul.mubr.msk.f32.gmra.mrb[40].mxu0 %vm297_vm1, %v251_v34 }
  0x68   : > { %597 = vmatprep.mubr.f32.mxu0 %v8157_v6 }
  0x69   : > { %5779 = vmatmul.mubr.msk.f32.gmra.mrb[40].mxu1 %vm297_vm1, %v251_v34 }
  0x6a   : > { %854 = vmatprep.mubr.f32.mxu1 %v8157_v6 }
  0x6b   : > { %5746 = vmatmul.mubr.msk.f32.gmra.mrb[42].mxu0 %vm297_vm1, %v252_v35 }
  0x6c   : > { %603 = vmatprep.mubr.f32.mxu0 %v8157_v6 }
  0x6d   : > { %5780 = vmatmul.mubr.msk.f32.gmra.mrb[42].mxu1 %vm297_vm1, %v252_v35 }
  0x6e   : > { %860 = vmatprep.mubr.f32.mxu1 %v8157_v6 }
  0x6f   : > { %5747 = vmatmul.mubr.msk.f32.gmra.mrb[44].mxu0 %vm297_vm1, %v253_v36 }
  0x70   : > { %609 = vmatprep.mubr.f32.mxu0 %v8157_v6 }
  0x71   : > { %5781 = vmatmul.mubr.msk.f32.gmra.mrb[44].mxu1 %vm297_vm1, %v253_v36 }
  0x72   : > { %866 = vmatprep.mubr.f32.mxu1 %v8157_v6 }
  0x73   : > { %5748 = vmatmul.mubr.msk.f32.gmra.mrb[46].mxu0 %vm297_vm1, %v254_v37 }
  0x74   : > { %615 = vmatprep.mubr.f32.mxu0 %v8157_v6 }
  0x75   : > { %5782 = vmatmul.mubr.msk.f32.gmra.mrb[46].mxu1 %vm297_vm1, %v254_v37 }
  0x76   : > { %872 = vmatprep.mubr.f32.mxu1 %v8157_v6 }
  0x77   : > { %5749 = vmatmul.mubr.msk.f32.gmra.mrb[48].mxu0 %vm297_vm1, %v255_v40 }
  0x78   : > { %621 = vmatprep.mubr.f32.mxu0 %v8157_v6 }
  0x79   : > { %5783 = vmatmul.mubr.msk.f32.gmra.mrb[48].mxu1 %vm297_vm1, %v255_v40 }
  0x7a   : > { %878 = vmatprep.mubr.f32.mxu1 %v8157_v6 }
  0x7b   : > { %5750 = vmatmul.mubr.msk.f32.gmra.mrb[50].mxu0 %vm297_vm1, %v256_v43 }
  0x7c   : > { %627 = vmatprep.mubr.f32.mxu0 %v8157_v6 }
  0x7d   : > { %5784 = vmatmul.mubr.msk.f32.gmra.mrb[50].mxu1 %vm297_vm1, %v256_v43 }
  0x7e   : > { %884 = vmatprep.mubr.f32.mxu1 %v8157_v6 }
  0x7f   : > { %5751 = vmatmul.mubr.msk.f32.gmra.mrb[52].mxu0 %vm297_vm1, %v257_v45 }
  0x80   : > { %633 = vmatprep.mubr.f32.mxu0 %v8157_v6 }
  0x81   : > { %5785 = vmatmul.mubr.msk.f32.gmra.mrb[52].mxu1 %vm297_vm1, %v257_v45  ;;  %v7045_v45 = vld [vmem:[%s10834_s3 + $0x3fc] ss:$28 sps:$4 sm:$0xff]  }
  0x82   : > { %890 = vmatprep.mubr.f32.mxu1 %v8157_v6 }
  0x83   : > { %5752 = vmatmul.mubr.msk.f32.gmra.mrb[54].mxu0 %vm297_vm1, %v258_v47 }
  0x84   : > { %639 = vmatprep.mubr.f32.mxu0 %v8157_v6 }
  0x85   : > { %5786 = vmatmul.mubr.msk.f32.gmra.mrb[54].mxu1 %vm297_vm1, %v258_v47 }
  0x86   : > { %896 = vmatprep.mubr.f32.mxu1 %v8157_v6 }
  0x87   : > { %5753 = vmatmul.mubr.msk.f32.gmra.mrb[56].mxu0 %vm297_vm1, %v259_v48 }
  0x88   : > { %645 = vmatprep.mubr.f32.mxu0 %v8157_v6 }
  0x89   : > { %5787 = vmatmul.mubr.msk.f32.gmra.mrb[56].mxu1 %vm297_vm1, %v259_v48 }
  0x8a   : > { %902 = vmatprep.mubr.f32.mxu1 %v8157_v6 }
  0x8b   : > { %5754 = vmatmul.mubr.msk.f32.gmra.mrb[58].mxu0 %vm297_vm1, %v260_v49 }
  0x8c   : > { %651 = vmatprep.mubr.f32.mxu0 %v8157_v6 }
  0x8d   : > { %5788 = vmatmul.mubr.msk.f32.gmra.mrb[58].mxu1 %vm297_vm1, %v260_v49  ;;  %v7048_v49 = vld [vmem:[%s10834_s3 + $0x3f4] ss:$28 sps:$4 sm:$0xff]  }
  0x8e   : > { %908 = vmatprep.mubr.f32.mxu1 %v8157_v6 }
  0x8f   : > { %5755 = vmatmul.mubr.msk.f32.gmra.mrb[60].mxu0 %vm297_vm1, %v261_v50 }
  0x90   : > { %657 = vmatprep.mubr.f32.mxu0 %v8157_v6 }
  0x91   : > { %5789 = vmatmul.mubr.msk.f32.gmra.mrb[60].mxu1 %vm297_vm1, %v261_v50 }
  0x92   : > { %914 = vmatprep.mubr.f32.mxu1 %v8157_v6  ;;  %v8613_v6 = vrot.slane %v275_v56, %v10840_v54 }
  0x93   : > { %5756 = vmatmul.mubr.msk.f32.gmra.mrb[62].mxu0 %vm297_vm1, %v262_v51 }
  0x95   : > { %5790 = vmatmul.mubr.msk.f32.gmra.mrb[62].mxu1 %vm297_vm1, %v262_v51 }
  0xea   : > { %v473_v60 = vpop.f32.mrb[0].mxu0 }
  0xeb   : > { %v475_v63 = vpop.f32.mrb[1].mxu0  ;;  %v474_v1 = vadd.f32 %v473_v60, %v8613_v6 }
  0xec   : > { %v730_v0 = vpop.f32.mrb[0].mxu1  ;;  %v476_v4 = vadd.f32 %v475_v63, %v8621_v61 }
  0xed   : > { %v731_v2 = vadd.f32 %v730_v0, %v8617_v59  ;;  %v732_v3 = vpop.f32.mrb[1].mxu1  ;;  %v921_v12 = vmax.f32 %v474_v1, 0.0 }
  0xee   : > { %v479_v5 = vpop.f32.mrb[2].mxu0  ;;  %v733_v7 = vadd.f32 %v732_v3, %v8625_v62  ;;  %v922_v17 = vmax.f32 %v476_v4, 0.0 }
  0xef   : > { %v480_v8 = vadd.f32 %v479_v5, %v8613_v6  ;;  %v481_v9 = vpop.f32.mrb[3].mxu0  ;;  %v923_v14 = vmax.f32 %v731_v2, 0.0 }
  0xf0   : > { %v482_v10 = vadd.f32 %v481_v9, %v8621_v61  ;;  %v736_v11 = vpop.f32.mrb[2].mxu1  ;;  %v924_v20 = vmax.f32 %v733_v7, 0.0  ;;  %v7043_v7 = vld [vmem:[%s10834_s3 + $0x3f8] ss:$28 sps:$4 sm:$0xff]  }
  0xf1   : > { %v925_v13 = vmax.f32 %v480_v8, 0.0  ;;  %v737_v15 = vadd.f32 %v736_v11, %v8617_v59  ;;  %v738_v16 = vpop.f32.mrb[3].mxu1  ;;  %v7046_v8 = vld [vmem:[%s10834_s3 + $0x3f0] ss:$28 sps:$4 sm:$0xff]  }
  0xf2   : > { %v926_v18 = vmax.f32 %v482_v10, 0.0  ;;  %v485_v19 = vpop.f32.mrb[4].mxu0  ;;  %v739_v21 = vadd.f32 %v738_v16, %v8625_v62 }
  0xf3   : > { %v8635_v22 = vpack.c.bf16 %v925_v13, %v921_v12  ;;  %v487_v23 = vpop.f32.mrb[5].mxu0  ;;  %v927_v24 = vmax.f32 %v737_v15, 0.0  ;;  %v486_v30 = vadd.f32 %v485_v19, %v8613_v6  ;;  %v7051_v12 = vld [vmem:[%s10834_s3 + $0x434] ss:$28 sps:$4 sm:$0xff]   ;;  %v7054_v13 = vld [vmem:[%s10834_s3 + $0x42c] ss:$28 sps:$4 sm:$0xff]  }
  0xf4   : > { %v8637_v25 = vpack.c.bf16 %v926_v18, %v922_v17  ;;  %v928_v28 = vmax.f32 %v739_v21, 0.0  ;;  %v742_v29 = vpop.f32.mrb[4].mxu1  ;;  %v488_v36 = vadd.f32 %v487_v23, %v8621_v61 }
  0xf5   : > { %v8652_v33 = vpack.c.bf16 %v927_v24, %v923_v14  ;;  %v743_v34 = vadd.f32 %v742_v29, %v8617_v59  ;;  %v744_v35 = vpop.f32.mrb[5].mxu1  ;;  %v929_v47 = vmax.f32 %v486_v30, 0.0  ;;  %v7049_v24 = vld [vmem:[%s10834_s3 + $0x430] ss:$28 sps:$4 sm:$0xff]  }
  0xf6   : > { %v491_v37 = vpop.f32.mrb[6].mxu0  ;;  %2639 = vmatprep.mubr.bf16.mxu0 %v8637_v25  ;;  %3025 = vmatprep.mubr.bf16.mxu1 %v8637_v25  ;;  %v8658_v38 = vpack.c.bf16 %v928_v28, %v924_v20  ;;  %v745_v39 = vadd.f32 %v744_v35, %v8625_v62  ;;  %v930_v56 = vmax.f32 %v488_v36, 0.0  ;;  %v7057_v28 = vld [vmem:[%s10834_s3 + $0x46c] ss:$28 sps:$4 sm:$0xff]  }
  0xf7   : > { %v492_v40 = vadd.f32 %v491_v37, %v8613_v6  ;;  %v493_v41 = vpop.f32.mrb[7].mxu0  ;;  %2640 = vmatmul.mubr.bf16.vlgmr.msra.gmra.mrb[64].mxu0 %v8635_v22  ;;  %3026 = vmatmul.mubr.bf16.vlgmr.msra.gmra.mrb[64].mxu1 %v8635_v22  ;;  %v931_v50 = vmax.f32 %v743_v34, 0.0 }
  0xf8   : > { %v494_v43 = vadd.f32 %v493_v41, %v8621_v61  ;;  %3187 = vmatpush1.bf16.msra.mxu1 %v7031_v26  ;;  %2801 = vmatpush1.bf16.msra.mxu0 %v7034_v27  ;;  %v748_v46 = vpop.f32.mrb[6].mxu1  ;;  %v932_v0 = vmax.f32 %v745_v39, 0.0  ;;  %v7052_v27 = vld [vmem:[%s10834_s3 + $0x428] ss:$28 sps:$4 sm:$0xff]  }
  0xf9   : > { %v933_v48 = vmax.f32 %v492_v40, 0.0  ;;  %3188 = vmatprep.subr.bf16.mxu1 %v7039_v31  ;;  %2802 = vmatprep.subr.bf16.mxu0 %v7042_v32  ;;  %v749_v51 = vadd.f32 %v748_v46, %v8617_v59  ;;  %v750_v52 = vpop.f32.mrb[7].mxu1  ;;  %v7060_v32 = vld [vmem:[%s10834_s3 + $0x464] ss:$28 sps:$4 sm:$0xff]  }
  0xfa   : > { %v934_v60 = vmax.f32 %v494_v43, 0.0  ;;  %v497_v63 = vpop.f32.mrb[8].mxu0  ;;  %v751_v1 = vadd.f32 %v750_v52, %v8625_v62  ;;  %v7063_v52 = vld [vmem:[%s10834_s3 + $0x4a4] ss:$28 sps:$4 sm:$0xff]  }
  0xfb   : > { %v8679_v2 = vpack.c.bf16 %v933_v48, %v929_v47  ;;  %v499_v3 = vpop.f32.mrb[9].mxu0  ;;  %v935_v4 = vmax.f32 %v749_v51, 0.0  ;;  %v498_v11 = vadd.f32 %v497_v63, %v8613_v6  ;;  %v7055_v47 = vld [vmem:[%s10834_s3 + $0x468] ss:$28 sps:$4 sm:$0xff]   ;;  %v7058_v48 = vld [vmem:[%s10834_s3 + $0x460] ss:$28 sps:$4 sm:$0xff]  }
  0xfc   : > { %v8681_v5 = vpack.c.bf16 %v934_v60, %v930_v56  ;;  %3189 = vmatpush1.bf16.msra.mxu1 %v7037_v42  ;;  %2803 = vmatpush1.bf16.msra.mxu0 %v7040_v44  ;;  %v936_v9 = vmax.f32 %v751_v1, 0.0  ;;  %v754_v10 = vpop.f32.mrb[8].mxu1  ;;  %v500_v17 = vadd.f32 %v499_v3, %v8621_v61  ;;  %v7066_v56 = vld [vmem:[%s10834_s3 + $0x49c] ss:$28 sps:$4 sm:$0xff]  }
  0xfd   : > { %3190 = vmatprep.subr.bf16.mxu1 %v7045_v45  ;;  %2804 = vmatprep.subr.bf16.mxu0 %v7048_v49  ;;  %v8696_v14 = vpack.c.bf16 %v935_v4, %v931_v50  ;;  %v755_v15 = vadd.f32 %v754_v10, %v8617_v59  ;;  %v756_v16 = vpop.f32.mrb[9].mxu1  ;;  %v937_v30 = vmax.f32 %v498_v11, 0.0  ;;  %v7061_v10 = vld [vmem:[%s10834_s3 + $0x4a0] ss:$28 sps:$4 sm:$0xff]  }
  0xfe   : > { %v503_v18 = vpop.f32.mrb[10].mxu0  ;;  %2649 = vmatprep.mubr.bf16.mxu0 %v8681_v5  ;;  %3035 = vmatprep.mubr.bf16.mxu1 %v8681_v5  ;;  %v8702_v19 = vpack.c.bf16 %v936_v9, %v932_v0  ;;  %v757_v20 = vadd.f32 %v756_v16, %v8625_v62  ;;  %v938_v37 = vmax.f32 %v500_v17, 0.0 }
  0xff   : > { %v504_v21 = vadd.f32 %v503_v18, %v8613_v6  ;;  %v505_v23 = vpop.f32.mrb[11].mxu0  ;;  %2650 = vmatmul.mubr.bf16.gmra.mrb[68].mxu0 %v8679_v2  ;;  %3036 = vmatmul.mubr.bf16.gmra.mrb[68].mxu1 %v8679_v2  ;;  %v939_v34 = vmax.f32 %v755_v15, 0.0  ;;  %v7072_v18 = vld [vmem:[%s10834_s3 + $0x4d4] ss:$28 sps:$4 sm:$0xff]  }
 0x100   : > { %v506_v26 = vadd.f32 %v505_v23, %v8621_v61  ;;  %3191 = vmatpush1.bf16.msra.mxu1 %v7043_v7  ;;  %2805 = vmatpush1.bf16.msra.mxu0 %v7046_v8  ;;  %v760_v29 = vpop.f32.mrb[10].mxu1  ;;  %v940_v41 = vmax.f32 %v757_v20, 0.0 }
 0x101   : > { %v941_v31 = vmax.f32 %v504_v21, 0.0  ;;  %3192 = vmatprep.subr.bf16.mxu1 %v7051_v12  ;;  %2806 = vmatprep.subr.bf16.mxu0 %v7054_v13  ;;  %v761_v35 = vadd.f32 %v760_v29, %v8617_v59  ;;  %v762_v36 = vpop.f32.mrb[11].mxu1  ;;  %v7064_v12 = vld [vmem:[%s10834_s3 + $0x498] ss:$28 sps:$4 sm:$0xff]  }
 0x102   : > { %v942_v39 = vmax.f32 %v506_v26, 0.0  ;;  %v509_v40 = vpop.f32.mrb[12].mxu0  ;;  %v763_v42 = vadd.f32 %v762_v36, %v8625_v62  ;;  %v7069_v13 = vld [vmem:[%s10834_s3 + $0x4dc] ss:$28 sps:$4 sm:$0xff]   ;;  %v7070_v36 = vld [vmem:[%s10834_s3 + $0x4d0] ss:$28 sps:$4 sm:$0xff]  }
 0x103   : > { %v8723_v43 = vpack.c.bf16 %v941_v31, %v937_v30  ;;  %v511_v44 = vpop.f32.mrb[13].mxu0  ;;  %v943_v45 = vmax.f32 %v761_v35, 0.0  ;;  %v510_v51 = vadd.f32 %v509_v40, %v8613_v6  ;;  %v7067_v35 = vld [vmem:[%s10834_s3 + $0x4d8] ss:$28 sps:$4 sm:$0xff]  }
 0x104   : > { %v8725_v46 = vpack.c.bf16 %v942_v39, %v938_v37  ;;  %3193 = vmatpush1.bf16.msra.mxu1 %v7049_v24  ;;  %2807 = vmatpush1.bf16.msra.mxu0 %v7052_v27  ;;  %v944_v49 = vmax.f32 %v763_v42, 0.0  ;;  %v766_v50 = vpop.f32.mrb[12].mxu1  ;;  %v512_v1 = vadd.f32 %v511_v44, %v8621_v61  ;;  %v7078_v42 = vld [vmem:[%s10834_s3 + $0x50c] ss:$28 sps:$4 sm:$0xff]  }
 0x105   : > { %3194 = vmatprep.subr.bf16.mxu1 %v7057_v28  ;;  %2808 = vmatprep.subr.bf16.mxu0 %v7060_v32  ;;  %v8740_v60 = vpack.c.bf16 %v943_v45, %v939_v34  ;;  %v767_v63 = vadd.f32 %v766_v50, %v8617_v59  ;;  %v768_v0 = vpop.f32.mrb[13].mxu1  ;;  %v945_v16 = vmax.f32 %v510_v51, 0.0 }
 0x106   : > { %v515_v3 = vpop.f32.mrb[14].mxu0  ;;  %2659 = vmatprep.mubr.bf16.mxu0 %v8725_v46  ;;  %3045 = vmatprep.mubr.bf16.mxu1 %v8725_v46  ;;  %v8746_v4 = vpack.c.bf16 %v944_v49, %v940_v41  ;;  %v769_v7 = vadd.f32 %v768_v0, %v8625_v62  ;;  %v946_v24 = vmax.f32 %v512_v1, 0.0  ;;  %v7075_v41 = vld [vmem:[%s10834_s3 + $0x514] ss:$28 sps:$4 sm:$0xff]   ;;  %v7076_v1 = vld [vmem:[%s10834_s3 + $0x508] ss:$28 sps:$4 sm:$0xff]  }
 0x107   : > { %v516_v8 = vadd.f32 %v515_v3, %v8613_v6  ;;  %v517_v9 = vpop.f32.mrb[15].mxu0  ;;  %2660 = vmatmul.mubr.bf16.gmra.mrb[72].mxu0 %v8723_v43  ;;  %3046 = vmatmul.mubr.bf16.gmra.mrb[72].mxu1 %v8723_v43  ;;  %v947_v20 = vmax.f32 %v767_v63, 0.0  ;;  %v7073_v63 = vld [vmem:[%s10834_s3 + $0x510] ss:$28 sps:$4 sm:$0xff]  }
 0x108   : > { %v518_v11 = vadd.f32 %v517_v9, %v8621_v61  ;;  %3195 = vmatpush1.bf16.msra.mxu1 %v7055_v47  ;;  %2809 = vmatpush1.bf16.msra.mxu0 %v7058_v48  ;;  %v772_v15 = vpop.f32.mrb[14].mxu1  ;;  %v948_v28 = vmax.f32 %v769_v7, 0.0  ;;  %v7081_v3 = vld [vmem:[%s10834_s3 + $0x54c] ss:$28 sps:$4 sm:$0xff]  }
 0x109   : > { %v949_v17 = vmax.f32 %v516_v8, 0.0  ;;  %3196 = vmatprep.subr.bf16.mxu1 %v7063_v52  ;;  %2810 = vmatprep.subr.bf16.mxu0 %v7066_v56  ;;  %v773_v21 = vadd.f32 %v772_v15, %v8617_v59  ;;  %v774_v23 = vpop.f32.mrb[15].mxu1 }
 0x10a   : > { %v950_v26 = vmax.f32 %v518_v11, 0.0  ;;  %v521_v27 = vpop.f32.mrb[16].mxu0  ;;  %v775_v29 = vadd.f32 %v774_v23, %v8625_v62 }
 0x10b   : > { %v8767_v30 = vpack.c.bf16 %v949_v17, %v945_v16  ;;  %v523_v31 = vpop.f32.mrb[17].mxu0  ;;  %v951_v32 = vmax.f32 %v773_v21, 0.0  ;;  %v522_v40 = vadd.f32 %v521_v27, %v8613_v6  ;;  %v7079_v27 = vld [vmem:[%s10834_s3 + $0x548] ss:$28 sps:$4 sm:$0xff]  }
 0x10c   : > { %v8769_v34 = vpack.c.bf16 %v950_v26, %v946_v24  ;;  %3197 = vmatpush1.bf16.msra.mxu1 %v7061_v10  ;;  %2811 = vmatpush1.bf16.msra.mxu0 %v7064_v12  ;;  %v952_v37 = vmax.f32 %v775_v29, 0.0  ;;  %v778_v39 = vpop.f32.mrb[16].mxu1  ;;  %v524_v48 = vadd.f32 %v523_v31, %v8621_v61  ;;  %v7084_v10 = vld [vmem:[%s10834_s3 + $0x544] ss:$28 sps:$4 sm:$0xff]  }
 0x10d   : > { %3198 = vmatprep.subr.bf16.mxu1 %v7069_v13  ;;  %2812 = vmatprep.subr.bf16.mxu0 %v7072_v18  ;;  %v8784_v44 = vpack.c.bf16 %v951_v32, %v947_v20  ;;  %v779_v45 = vadd.f32 %v778_v39, %v8617_v59  ;;  %v780_v47 = vpop.f32.mrb[17].mxu1  ;;  %v953_v8 = vmax.f32 %v522_v40, 0.0 }
 0x10e   : > { %v527_v49 = vpop.f32.mrb[18].mxu0  ;;  %2669 = vmatprep.mubr.bf16.mxu0 %v8769_v34  ;;  %3055 = vmatprep.mubr.bf16.mxu1 %v8769_v34  ;;  %v8790_v50 = vpack.c.bf16 %v952_v37, %v948_v28  ;;  %v781_v51 = vadd.f32 %v780_v47, %v8625_v62  ;;  %v954_v15 = vmax.f32 %v524_v48, 0.0  ;;  %v7082_v28 = vld [vmem:[%s10834_s3 + $0x540] ss:$28 sps:$4 sm:$0xff]  }
 0x10f   : > { %v528_v52 = vadd.f32 %v527_v49, %v8613_v6  ;;  %v529_v56 = vpop.f32.mrb[19].mxu0  ;;  %2670 = vmatmul.mubr.bf16.gmra.mrb[76].mxu0 %v8767_v30  ;;  %3056 = vmatmul.mubr.bf16.gmra.mrb[76].mxu1 %v8767_v30  ;;  %v955_v11 = vmax.f32 %v779_v45, 0.0 }
 0x110   : > { %v530_v0 = vadd.f32 %v529_v56, %v8621_v61  ;;  %3199 = vmatpush1.bf16.msra.mxu1 %v7067_v35  ;;  %2813 = vmatpush1.bf16.msra.mxu0 %v7070_v36  ;;  %v784_v7 = vpop.f32.mrb[18].mxu1  ;;  %v956_v18 = vmax.f32 %v781_v51, 0.0  ;;  %v7087_v35 = vld [vmem:[%s10834_s3 + $0x584] ss:$28 sps:$4 sm:$0xff]   ;;  %v7090_v36 = vld [vmem:[%s10834_s3 + $0x57c] ss:$28 sps:$4 sm:$0xff]  }
 0x111   : > { %v957_v9 = vmax.f32 %v528_v52, 0.0  ;;  %3200 = vmatprep.subr.bf16.mxu1 %v7075_v41  ;;  %2814 = vmatprep.subr.bf16.mxu0 %v7078_v42  ;;  %v785_v12 = vadd.f32 %v784_v7, %v8617_v59  ;;  %v786_v13 = vpop.f32.mrb[19].mxu1  ;;  %v7085_v51 = vld [vmem:[%s10834_s3 + $0x580] ss:$28 sps:$4 sm:$0xff]   ;;  %v7088_v56 = vld [vmem:[%s10834_s3 + $0x578] ss:$28 sps:$4 sm:$0xff]  }
 0x112   : > { %v958_v16 = vmax.f32 %v530_v0, 0.0  ;;  %v533_v17 = vpop.f32.mrb[20].mxu0  ;;  %v787_v20 = vadd.f32 %v786_v13, %v8625_v62  ;;  %v7096_v7 = vld [vmem:[%s10834_s3 + $0x5b4] ss:$28 sps:$4 sm:$0xff]  }
 0x113   : > { %v8811_v21 = vpack.c.bf16 %v957_v9, %v953_v8  ;;  %v535_v23 = vpop.f32.mrb[21].mxu0  ;;  %v959_v24 = vmax.f32 %v785_v12, 0.0  ;;  %v534_v32 = vadd.f32 %v533_v17, %v8613_v6 }
 0x114   : > { %v8813_v26 = vpack.c.bf16 %v958_v16, %v954_v15  ;;  %3201 = vmatpush1.bf16.msra.mxu1 %v7073_v63  ;;  %2815 = vmatpush1.bf16.msra.mxu0 %v7076_v1  ;;  %v960_v29 = vmax.f32 %v787_v20, 0.0  ;;  %v790_v31 = vpop.f32.mrb[20].mxu1  ;;  %v536_v41 = vadd.f32 %v535_v23, %v8621_v61  ;;  %v7093_v63 = vld [vmem:[%s10834_s3 + $0x5bc] ss:$28 sps:$4 sm:$0xff]  }
 0x115   : > { %10907 = vst [vmem:[#allocation3_spill] sm:$0xff] %v8811_v21  ;;  %3202 = vmatprep.subr.bf16.mxu1 %v7081_v3  ;;  %2816 = vmatprep.subr.bf16.mxu0 %v7084_v10  ;;  %v8828_v37 = vpack.c.bf16 %v959_v24, %v955_v11  ;;  %v791_v39 = vadd.f32 %v790_v31, %v8617_v59  ;;  %v792_v40 = vpop.f32.mrb[21].mxu1  ;;  %v961_v1 = vmax.f32 %v534_v32, 0.0  ;;  %v7091_v24 = vld [vmem:[%s10834_s3 + $0x5b8] ss:$28 sps:$4 sm:$0xff]  }
 0x116   : > { %v539_v42 = vpop.f32.mrb[22].mxu0  ;;  %2679 = vmatprep.mubr.bf16.mxu0 %v8813_v26  ;;  %3065 = vmatprep.mubr.bf16.mxu1 %v8813_v26  ;;  %v8834_v45 = vpack.c.bf16 %v960_v29, %v956_v18  ;;  %v793_v47 = vadd.f32 %v792_v40, %v8625_v62  ;;  %v962_v11 = vmax.f32 %v536_v41, 0.0  ;;  %v7099_v32 = vld [vmem:[%s10834_s3 + $0x5f4] ss:$28 sps:$4 sm:$0xff]  }
 0x117   : > { %v540_v48 = vadd.f32 %v539_v42, %v8613_v6  ;;  %v541_v49 = vpop.f32.mrb[23].mxu0  ;;  %2680 = vmatmul.mubr.bf16.gmra.mrb[80].mxu0 %v8811_v21  ;;  %3066 = vmatmul.mubr.bf16.gmra.mrb[80].mxu1 %v8811_v21  ;;  %v963_v8 = vmax.f32 %v791_v39, 0.0 }
 0x118   : > { %v542_v52 = vadd.f32 %v541_v49, %v8621_v61  ;;  %3203 = vmatpush1.bf16.msra.mxu1 %v7079_v27  ;;  %2817 = vmatpush1.bf16.msra.mxu0 %v7082_v28  ;;  %v796_v0 = vpop.f32.mrb[22].mxu1  ;;  %v964_v15 = vmax.f32 %v793_v47, 0.0  ;;  %v7094_v27 = vld [vmem:[%s10834_s3 + $0x5b0] ss:$28 sps:$4 sm:$0xff]  }
 0x119   : > { %v965_v3 = vmax.f32 %v540_v48, 0.0  ;;  %3204 = vmatprep.subr.bf16.mxu1 %v7087_v35  ;;  %2818 = vmatprep.subr.bf16.mxu0 %v7090_v36  ;;  %v797_v9 = vadd.f32 %v796_v0, %v8617_v59  ;;  %v798_v10 = vpop.f32.mrb[23].mxu1  ;;  %v7102_v35 = vld [vmem:[%s10834_s3 + $0x5ec] ss:$28 sps:$4 sm:$0xff]  }
 0x11a   : > { %v966_v12 = vmax.f32 %v542_v52, 0.0  ;;  %v545_v13 = vpop.f32.mrb[24].mxu0  ;;  %v799_v16 = vadd.f32 %v798_v10, %v8625_v62  ;;  %v7097_v52 = vld [vmem:[%s10834_s3 + $0x5f0] ss:$28 sps:$4 sm:$0xff]  }
 0x11b   : > { %v8855_v17 = vpack.c.bf16 %v965_v3, %v961_v1  ;;  %v547_v18 = vpop.f32.mrb[25].mxu0  ;;  %v967_v20 = vmax.f32 %v797_v9, 0.0  ;;  %v546_v31 = vadd.f32 %v545_v13, %v8613_v6  ;;  %v7105_v0 = vld [vmem:[%s10834_s3 + $0x62c] ss:$28 sps:$4 sm:$0xff]  }
 0x11c   : > { %v8857_v23 = vpack.c.bf16 %v966_v12, %v962_v11  ;;  %3205 = vmatpush1.bf16.msra.mxu1 %v7085_v51  ;;  %2819 = vmatpush1.bf16.msra.mxu0 %v7088_v56  ;;  %v968_v28 = vmax.f32 %v799_v16, 0.0  ;;  %v802_v29 = vpop.f32.mrb[24].mxu1  ;;  %v548_v41 = vadd.f32 %v547_v18, %v8621_v61 }
 0x11d   : > { %10908 = vst [vmem:[#allocation4_spill] sm:$0xff] %v8855_v17  ;;  %3206 = vmatprep.subr.bf16.mxu1 %v7093_v63  ;;  %2820 = vmatprep.subr.bf16.mxu0 %v7096_v7  ;;  %v8872_v36 = vpack.c.bf16 %v967_v20, %v963_v8  ;;  %v803_v39 = vadd.f32 %v802_v29, %v8617_v59  ;;  %v804_v40 = vpop.f32.mrb[25].mxu1  ;;  %v7100_v63 = vld [vmem:[%s10834_s3 + $0x5e8] ss:$28 sps:$4 sm:$0xff]   ;;  %v969_v3 = vmax.f32 %v546_v31, 0.0 }
 0x11e   : > { %10909 = vst [vmem:[#allocation5_spill] sm:$0xff] %v8857_v23  ;;  %v551_v42 = vpop.f32.mrb[26].mxu0  ;;  %2689 = vmatprep.mubr.bf16.mxu0 %v8857_v23  ;;  %3075 = vmatprep.mubr.bf16.mxu1 %v8857_v23  ;;  %v8878_v47 = vpack.c.bf16 %v968_v28, %v964_v15  ;;  %v805_v48 = vadd.f32 %v804_v40, %v8625_v62  ;;  %v7108_v8 = vld [vmem:[%s10834_s3 + $0x624] ss:$28 sps:$4 sm:$0xff]   ;;  %v970_v12 = vmax.f32 %v548_v41, 0.0 }
 0x11f   : > { %v552_v49 = vadd.f32 %v551_v42, %v8613_v6  ;;  %v553_v51 = vpop.f32.mrb[27].mxu0  ;;  %2690 = vmatmul.mubr.bf16.gmra.mrb[84].mxu0 %v8855_v17  ;;  %3076 = vmatmul.mubr.bf16.gmra.mrb[84].mxu1 %v8855_v17  ;;  %v971_v9 = vmax.f32 %v803_v39, 0.0  ;;  %v7103_v29 = vld [vmem:[%s10834_s3 + $0x628] ss:$28 sps:$4 sm:$0xff]   ;;  %v7106_v31 = vld [vmem:[%s10834_s3 + $0x620] ss:$28 sps:$4 sm:$0xff]  }
 0x120   : > { %v554_v56 = vadd.f32 %v553_v51, %v8621_v61  ;;  %3207 = vmatpush1.bf16.msra.mxu1 %v7091_v24  ;;  %2821 = vmatpush1.bf16.msra.mxu0 %v7094_v27  ;;  %v808_v1 = vpop.f32.mrb[26].mxu1  ;;  %v972_v16 = vmax.f32 %v805_v48, 0.0  ;;  %v7111_v40 = vld [vmem:[%s10834_s3 + $0x664] ss:$28 sps:$4 sm:$0xff]   ;;  %v7114_v41 = vld [vmem:[%s10834_s3 + $0x65c] ss:$28 sps:$4 sm:$0xff]  }
 0x121   : > { %v973_v7 = vmax.f32 %v552_v49, 0.0  ;;  %3208 = vmatprep.subr.bf16.mxu1 %v7099_v32  ;;  %2822 = vmatprep.subr.bf16.mxu0 %v7102_v35  ;;  %v809_v10 = vadd.f32 %v808_v1, %v8617_v59  ;;  %v810_v11 = vpop.f32.mrb[27].mxu1 }
 0x122   : > { %v974_v13 = vmax.f32 %v554_v56, 0.0  ;;  %v557_v15 = vpop.f32.mrb[28].mxu0  ;;  %v811_v18 = vadd.f32 %v810_v11, %v8625_v62  ;;  %v7109_v56 = vld [vmem:[%s10834_s3 + $0x660] ss:$28 sps:$4 sm:$0xff]   ;;  %v1362_v11 = vld [vmem:[%s10834_s3 + $0x6d0] sm:$0x33] }
 0x123   : > { %v8899_v20 = vpack.c.bf16 %v973_v7, %v969_v3  ;;  %v559_v24 = vpop.f32.mrb[29].mxu0  ;;  %v975_v27 = vmax.f32 %v809_v10, 0.0  ;;  %v558_v39 = vadd.f32 %v557_v15, %v8613_v6  ;;  %v7112_v7 = vld [vmem:[%s10834_s3 + $0x658] ss:$28 sps:$4 sm:$0xff]  }
 0x124   : > { %v8901_v28 = vpack.c.bf16 %v974_v13, %v970_v12  ;;  %3209 = vmatpush1.bf16.msra.mxu1 %v7097_v52  ;;  %2823 = vmatpush1.bf16.msra.mxu0 %v7100_v63  ;;  %v976_v32 = vmax.f32 %v811_v18, 0.0  ;;  %v814_v35 = vpop.f32.mrb[28].mxu1  ;;  %v560_v51 = vadd.f32 %v559_v24, %v8621_v61  ;;  %v7120_v10 = vld [vmem:[%s10834_s3 + $0x694] ss:$28 sps:$4 sm:$0xff]  }
 0x125   : > { %10910 = vst [vmem:[#allocation6_spill] sm:$0xff] %v8899_v20  ;;  %3210 = vmatprep.subr.bf16.mxu1 %v7105_v0  ;;  %2824 = vmatprep.subr.bf16.mxu0 %v7108_v8  ;;  %v8916_v42 = vpack.c.bf16 %v975_v27, %v971_v9  ;;  %v815_v48 = vadd.f32 %v814_v35, %v8617_v59  ;;  %v816_v49 = vpop.f32.mrb[29].mxu1  ;;  %v7117_v8 = vld [vmem:[%s10834_s3 + $0x69c] ss:$28 sps:$4 sm:$0xff]   ;;  %v977_v13 = vmax.f32 %v558_v39, 0.0 }
 0x126   : > { %10911 = vst [vmem:[#allocation7_spill] sm:$0xff] %v8901_v28  ;;  %v563_v52 = vpop.f32.mrb[30].mxu0  ;;  %2699 = vmatprep.mubr.bf16.mxu0 %v8901_v28  ;;  %3085 = vmatprep.mubr.bf16.mxu1 %v8901_v28  ;;  %v8925_v63 = vpack.c.bf16 %v976_v32, %v972_v16  ;;  %v817_v0 = vadd.f32 %v816_v49, %v8625_v62  ;;  %v1361_v16 = vld [vmem:[%s10834_s3 + $0x6c8] sm:$0x33] }
 0x127   : > { %v564_v1 = vadd.f32 %v563_v52, %v8613_v6  ;;  %v565_v3 = vpop.f32.mrb[31].mxu0  ;;  %2700 = vmatmul.mubr.bf16.gmra.mrb[88].mxu0 %v8899_v20  ;;  %3086 = vmatmul.mubr.bf16.gmra.mrb[88].mxu1 %v8899_v20  ;;  %v979_v18 = vmax.f32 %v815_v48, 0.0  ;;  %v7115_v48 = vld [vmem:[%s10834_s3 + $0x698] ss:$28 sps:$4 sm:$0xff]  }
 0x128   : > { %v566_v9 = vadd.f32 %v565_v3, %v8621_v61  ;;  %3211 = vmatpush1.bf16.msra.mxu1 %v7103_v29  ;;  %2825 = vmatpush1.bf16.msra.mxu0 %v7106_v31  ;;  %v820_v12 = vpop.f32.mrb[30].mxu1  ;;  %v978_v29 = vmax.f32 %v560_v51, 0.0  ;;  %v980_v35 = vmax.f32 %v817_v0, 0.0  ;;  %v7118_v51 = vld [vmem:[%s10834_s3 + $0x690] ss:$28 sps:$4 sm:$0xff]   ;;  %v6009_v0 = vcombine.high %v1361_v16, %v1361_v16 }
 0x129   : > { %v981_v15 = vmax.f32 %v564_v1, 0.0  ;;  %3212 = vmatprep.subr.bf16.mxu1 %v7111_v40  ;;  %2826 = vmatprep.subr.bf16.mxu0 %v7114_v41  ;;  %v821_v24 = vadd.f32 %v820_v12, %v8617_v59  ;;  %v822_v27 = vpop.f32.mrb[31].mxu1  ;;  %v6011_v1 = vcombine.high %v1362_v11, %v1362_v11  ;;  %v6010_v40 = vcombine.low %v1362_v11, %v1362_v11 }
 0x12a   : > { %v982_v31 = vmax.f32 %v566_v9, 0.0  ;;  %v569_v32 = vpop.f32.mrb[32].mxu0  ;;  %v823_v49 = vadd.f32 %v822_v27, %v8625_v62  ;;  %v6008_v9 = vcombine.low %v1361_v16, %v1361_v16 }
 0x12b   : > { %v8949_v52 = vpack.c.bf16 %v981_v15, %v977_v13  ;;  %v571_v39 = vpop.f32.mrb[33].mxu0  ;;  %v983_v41 = vmax.f32 %v821_v24, 0.0  ;;  %v570_v15 = vadd.f32 %v569_v32, %v8613_v6 }
 0x12c   : > { %v8951_v3 = vpack.c.bf16 %v982_v31, %v978_v29  ;;  %3213 = vmatpush1.bf16.msra.mxu1 %v7109_v56  ;;  %2827 = vmatpush1.bf16.msra.mxu0 %v7112_v7  ;;  %v984_v12 = vmax.f32 %v823_v49, 0.0  ;;  %v826_v13 = vpop.f32.mrb[32].mxu1  ;;  %v572_v24 = vadd.f32 %v571_v39, %v8621_v61  ;;  %v2593_v31 = vsel %vm2585_vm2, %v6010_v40, 0 }
 0x12d   : > { %10912 = vst [vmem:[#allocation8_spill] sm:$0xff] %v8949_v52  ;;  %3214 = vmatprep.subr.bf16.mxu1 %v7117_v8  ;;  %2828 = vmatprep.subr.bf16.mxu0 %v7120_v10  ;;  %v8960_v11 = vpack.c.bf16 %v983_v41, %v979_v18  ;;  %v827_v56 = vadd.f32 %v826_v13, %v8617_v59  ;;  %v828_v7 = vpop.f32.mrb[33].mxu1  ;;  %v2587_v32 = vsel %vm2585_vm2, %v6008_v9, 0  ;;  %v985_v39 = vmax.f32 %v570_v15, 0.0 }
 0x12e   : > { %10913 = vst [vmem:[#allocation9_spill] sm:$0xff] %v8951_v3  ;;  %v575_v27 = vpop.f32.mrb[34].mxu0  ;;  %2709 = vmatprep.mubr.bf16.mxu0 %v8951_v3  ;;  %3095 = vmatprep.mubr.bf16.mxu1 %v8951_v3  ;;  %v8966_v16 = vpack.c.bf16 %v984_v12, %v980_v35  ;;  %v829_v29 = vadd.f32 %v828_v7, %v8625_v62  ;;  %v7125_v35 = vld [vmem:[%s10834_s3 + $0x1d8] ss:$28 sps:$4 sm:$0xff]   ;;  %v986_v9 = vmax.f32 %v572_v24, 0.0 }
 0x12f   : > { %v576_v8 = vadd.f32 %v575_v27, %v8613_v6  ;;  %v577_v10 = vpop.f32.mrb[35].mxu0  ;;  %2710 = vmatmul.mubr.bf16.gmra.mrb[92].mxu0 %v8949_v52  ;;  %3096 = vmatmul.mubr.bf16.gmra.mrb[92].mxu1 %v8949_v52 }
 0x130   : > { %v578_v18 = vadd.f32 %v577_v10, %v8621_v61  ;;  %3215 = vmatpush1.bf16.msra.mxu1 %v7115_v48  ;;  %2829 = vmatpush1.bf16.msra.mxu0 %v7118_v51  ;;  %v832_v49 = vpop.f32.mrb[34].mxu1  ;;  %v7129_v48 = vld [vmem:[%s10834_s3 + $0x14] ss:$28 sps:$4 sm:$0xff]   ;;  %v987_v51 = vmax.f32 %v827_v56, 0.0  ;;  %v988_v27 = vmax.f32 %v829_v29, 0.0 }
 0x131   : > { %v989_v41 = vmax.f32 %v576_v8, 0.0  ;;  %6032 = vmatprep.subr.msk.bf16.mxu1 %vm2585_vm2, %v6011_v1  ;;  %6015 = vmatprep.subr.msk.bf16.mxu0 %vm2585_vm2, %v6009_v0  ;;  %v833_v40 = vadd.f32 %v832_v49, %v8617_v59  ;;  %v834_v12 = vpop.f32.mrb[35].mxu1 }
 0x132   : > { %v990_v13 = vmax.f32 %v578_v18, 0.0  ;;  %v581_v7 = vpop.f32.mrb[36].mxu0  ;;  %v835_v10 = vadd.f32 %v834_v12, %v8625_v62 }
 0x133   : > { %v8985_v15 = vpack.c.bf16 %v989_v41, %v985_v39  ;;  %v583_v8 = vpop.f32.mrb[37].mxu0  ;;  %v991_v1 = vmax.f32 %v833_v40, 0.0  ;;  %v582_v56 = vadd.f32 %v581_v7, %v8613_v6 }
 0x134   : > { %v8987_v58 = vpack.c.bf16 %v990_v13, %v986_v9  ;;  %3217 = vmatpush1.bf16.msra.mxu1 %v2593_v31  ;;  %2831 = vmatpush1.bf16.msra.mxu0 %v2587_v32  ;;  %v992_v0 = vmax.f32 %v835_v10, 0.0  ;;  %v838_v57 = vpop.f32.mrb[36].mxu1  ;;  %v584_v49 = vadd.f32 %v583_v8, %v8621_v61 }
 0x135   : > { %10914 = vst [vmem:[#allocation10_spill] sm:$0xff] %v8985_v15  ;;  %6308 = vmatprep.subr.bf16.mxu1 %v7125_v35  ;;  %3379 = vmatprep.subr.bf16.mxu0 %v7129_v48  ;;  %v8990_v24 = vpack.c.bf16 %v991_v1, %v987_v51  ;;  %v839_v29 = vadd.f32 %v838_v57, %v8617_v59  ;;  %v840_v18 = vpop.f32.mrb[37].mxu1  ;;  %v993_v51 = vmax.f32 %v582_v56, 0.0 }
 0x136   : > { %10915 = vst [vmem:[#allocation11_spill] sm:$0xff] %v8987_v58  ;;  %v587_v39 = vpop.f32.mrb[38].mxu0  ;;  %2719 = vmatprep.mubr.bf16.mxu0 %v8987_v58  ;;  %3105 = vmatprep.mubr.bf16.mxu1 %v8987_v58  ;;  %v8996_v31 = vpack.c.bf16 %v992_v0, %v988_v27  ;;  %v841_v32 = vadd.f32 %v840_v18, %v8625_v62  ;;  %v994_v7 = vmax.f32 %v584_v49, 0.0 }
 0x137   : > { %v588_v41 = vadd.f32 %v587_v39, %v8613_v6  ;;  %v589_v35 = vpop.f32.mrb[39].mxu0  ;;  %2720 = vmatmul.mubr.bf16.gmra.mrb[96].mxu0 %v8985_v15  ;;  %3106 = vmatmul.mubr.bf16.gmra.mrb[96].mxu1 %v8985_v15  ;;  %v995_v12 = vmax.f32 %v839_v29, 0.0 }
 0x138   : > { %v590_v57 = vadd.f32 %v589_v35, %v8621_v61  ;;  %v844_v48 = vpop.f32.mrb[38].mxu1  ;;  %v996_v8 = vmax.f32 %v841_v32, 0.0 }
 0x139   : > { %v997_v40 = vmax.f32 %v588_v41, 0.0  ;;  %v845_v9 = vadd.f32 %v844_v48, %v8617_v59  ;;  %v846_v13 = vpop.f32.mrb[39].mxu1 }
 0x13a   : > { %v998_v27 = vmax.f32 %v590_v57, 0.0  ;;  %v593_v10 = vpop.f32.mrb[40].mxu0  ;;  %v847_v1 = vadd.f32 %v846_v13, %v8625_v62 }
 0x13b   : > { %v9005_v0 = vpack.c.bf16 %v997_v40, %v993_v51  ;;  %v595_v18 = vpop.f32.mrb[41].mxu0  ;;  %v999_v39 = vmax.f32 %v845_v9, 0.0  ;;  %v594_v56 = vadd.f32 %v593_v10, %v8613_v6 }
 0x13c   : > { %v9007_v55 = vpack.c.bf16 %v998_v27, %v994_v7  ;;  %v1000_v35 = vmax.f32 %v847_v1, 0.0  ;;  %v850_v54 = vpop.f32.mrb[40].mxu1  ;;  %v596_v57 = vadd.f32 %v595_v18, %v8621_v61 }
 0x13d   : > { %10916 = vst [vmem:[#allocation12_spill] sm:$0xff] %v9005_v0  ;;  %v9010_v29 = vpack.c.bf16 %v999_v39, %v995_v12  ;;  %v851_v41 = vadd.f32 %v850_v54, %v8617_v59  ;;  %v852_v49 = vpop.f32.mrb[41].mxu1  ;;  %v1001_v13 = vmax.f32 %v594_v56, 0.0 }
 0x13e   : > { %10917 = vst [vmem:[#allocation13_spill] sm:$0xff] %v9007_v55  ;;  %v599_v32 = vpop.f32.mrb[42].mxu0  ;;  %2729 = vmatprep.mubr.bf16.mxu0 %v9007_v55  ;;  %3115 = vmatprep.mubr.bf16.mxu1 %v9007_v55  ;;  %v9016_v48 = vpack.c.bf16 %v1000_v35, %v996_v8  ;;  %v853_v51 = vadd.f32 %v852_v49, %v8625_v62  ;;  %v1002_v8 = vmax.f32 %v596_v57, 0.0 }
 0x13f   : > { %v600_v40 = vadd.f32 %v599_v32, %v8613_v6  ;;  %v601_v9 = vpop.f32.mrb[43].mxu0  ;;  %2730 = vmatmul.mubr.bf16.gmra.mrb[100].mxu0 %v9005_v0  ;;  %3116 = vmatmul.mubr.bf16.gmra.mrb[100].mxu1 %v9005_v0  ;;  %v1003_v27 = vmax.f32 %v851_v41, 0.0 }
 0x140   : > { %v602_v54 = vadd.f32 %v601_v9, %v8621_v61  ;;  %v856_v12 = vpop.f32.mrb[42].mxu1  ;;  %v1004_v35 = vmax.f32 %v853_v51, 0.0 }
 0x141   : > { %v1005_v7 = vmax.f32 %v600_v40, 0.0  ;;  %v857_v10 = vadd.f32 %v856_v12, %v8617_v59  ;;  %v858_v1 = vpop.f32.mrb[43].mxu1 }
 0x142   : > { %v1006_v18 = vmax.f32 %v602_v54, 0.0  ;;  %v605_v39 = vpop.f32.mrb[44].mxu0  ;;  %v859_v49 = vadd.f32 %v858_v1, %v8625_v62 }
 0x143   : > { %v9025_v32 = vpack.c.bf16 %v1005_v7, %v1001_v13  ;;  %v607_v53 = vpop.f32.mrb[45].mxu0  ;;  %v1007_v55 = vmax.f32 %v857_v10, 0.0  ;;  %v606_v56 = vadd.f32 %v605_v39, %v8613_v6 }
 0x144   : > { %v9027_v0 = vpack.c.bf16 %v1006_v18, %v1002_v8  ;;  %v1008_v9 = vmax.f32 %v859_v49, 0.0  ;;  %v862_v15 = vpop.f32.mrb[44].mxu1  ;;  %v608_v54 = vadd.f32 %v607_v53, %v8621_v61 }
 0x145   : > { %10918 = vst [vmem:[#allocation14_spill] sm:$0xff] %v9025_v32  ;;  %v9030_v41 = vpack.c.bf16 %v1007_v55, %v1003_v27  ;;  %v863_v40 = vadd.f32 %v862_v15, %v8617_v59  ;;  %v864_v57 = vpop.f32.mrb[45].mxu1  ;;  %v1009_v53 = vmax.f32 %v606_v56, 0.0 }
 0x146   : > { %10919 = vst [vmem:[#allocation15_spill] sm:$0xff] %v9027_v0  ;;  %v611_v51 = vpop.f32.mrb[46].mxu0  ;;  %2739 = vmatprep.mubr.bf16.mxu0 %v9027_v0  ;;  %3125 = vmatprep.mubr.bf16.mxu1 %v9027_v0  ;;  %v9036_v12 = vpack.c.bf16 %v1008_v9, %v1004_v35  ;;  %v865_v13 = vadd.f32 %v864_v57, %v8625_v62  ;;  %v1010_v39 = vmax.f32 %v608_v54, 0.0 }
 0x147   : > { %10920 = vst [vmem:[#allocation16_spill] sm:$0xff] %v9030_v41  ;;  %v612_v7 = vadd.f32 %v611_v51, %v8613_v6  ;;  %v613_v10 = vpop.f32.mrb[47].mxu0  ;;  %2740 = vmatmul.mubr.bf16.gmra.mrb[104].mxu0 %v9025_v32  ;;  %3126 = vmatmul.mubr.bf16.gmra.mrb[104].mxu1 %v9025_v32  ;;  %v1011_v1 = vmax.f32 %v863_v40, 0.0 }
 0x148   : > { %v614_v55 = vadd.f32 %v613_v10, %v8621_v61  ;;  %v868_v15 = vpop.f32.mrb[46].mxu1  ;;  %v1012_v9 = vmax.f32 %v865_v13, 0.0 }
 0x149   : > { %v1013_v27 = vmax.f32 %v612_v7, 0.0  ;;  %v869_v8 = vadd.f32 %v868_v15, %v8617_v59  ;;  %v870_v18 = vpop.f32.mrb[47].mxu1 }
 0x14a   : > { %v1014_v35 = vmax.f32 %v614_v55, 0.0  ;;  %v617_v49 = vpop.f32.mrb[48].mxu0  ;;  %v871_v57 = vadd.f32 %v870_v18, %v8625_v62 }
 0x14b   : > { %v9045_v51 = vpack.c.bf16 %v1013_v27, %v1009_v53  ;;  %v619_v0 = vpop.f32.mrb[49].mxu0  ;;  %v1015_v58 = vmax.f32 %v869_v8, 0.0  ;;  %v618_v56 = vadd.f32 %v617_v49, %v8613_v6 }
 0x14c   : > { %v9047_v32 = vpack.c.bf16 %v1014_v35, %v1010_v39  ;;  %v1016_v10 = vmax.f32 %v871_v57, 0.0  ;;  %v874_v52 = vpop.f32.mrb[48].mxu1  ;;  %v620_v55 = vadd.f32 %v619_v0, %v8621_v61 }
 0x14d   : > { %10921 = vst [vmem:[#allocation17_spill] sm:$0xff] %v9045_v51  ;;  %v9050_v40 = vpack.c.bf16 %v1015_v58, %v1011_v1  ;;  %v875_v7 = vadd.f32 %v874_v52, %v8617_v59  ;;  %v876_v54 = vpop.f32.mrb[49].mxu1  ;;  %v1017_v0 = vmax.f32 %v618_v56, 0.0 }
 0x14e   : > { %10922 = vst [vmem:[#allocation18_spill] sm:$0xff] %v9047_v32  ;;  %v623_v13 = vpop.f32.mrb[50].mxu0  ;;  %2749 = vmatprep.mubr.bf16.mxu0 %v9047_v32  ;;  %3135 = vmatprep.mubr.bf16.mxu1 %v9047_v32  ;;  %v9056_v15 = vpack.c.bf16 %v1016_v10, %v1012_v9  ;;  %v877_v53 = vadd.f32 %v876_v54, %v8625_v62  ;;  %v1018_v49 = vmax.f32 %v620_v55, 0.0 }
 0x14f   : > { %10923 = vst [vmem:[#allocation19_spill] sm:$0xff] %v9050_v40  ;;  %v624_v27 = vadd.f32 %v623_v13, %v8613_v6  ;;  %v625_v8 = vpop.f32.mrb[51].mxu0  ;;  %2750 = vmatmul.mubr.bf16.gmra.mrb[108].mxu0 %v9045_v51  ;;  %3136 = vmatmul.mubr.bf16.gmra.mrb[108].mxu1 %v9045_v51  ;;  %v1019_v18 = vmax.f32 %v875_v7, 0.0 }
 0x150   : > { %10924 = vst [vmem:[#allocation20_spill] sm:$0xff] %v9056_v15  ;;  %v626_v58 = vadd.f32 %v625_v8, %v8621_v61  ;;  %v880_v52 = vpop.f32.mrb[50].mxu1  ;;  %v1020_v10 = vmax.f32 %v877_v53, 0.0 }
 0x151   : > { %v1021_v1 = vmax.f32 %v624_v27, 0.0  ;;  %v881_v39 = vadd.f32 %v880_v52, %v8617_v59  ;;  %v882_v35 = vpop.f32.mrb[51].mxu1 }
 0x152   : > { %v1022_v9 = vmax.f32 %v626_v58, 0.0  ;;  %v629_v57 = vpop.f32.mrb[52].mxu0  ;;  %v883_v54 = vadd.f32 %v882_v35, %v8625_v62 }
 0x153   : > { %v9065_v13 = vpack.c.bf16 %v1021_v1, %v1017_v0  ;;  %v631_v32 = vpop.f32.mrb[53].mxu0  ;;  %v1023_v3 = vmax.f32 %v881_v39, 0.0  ;;  %v630_v56 = vadd.f32 %v629_v57, %v8613_v6 }
 0x154   : > { %v9067_v51 = vpack.c.bf16 %v1022_v9, %v1018_v49  ;;  %v1024_v8 = vmax.f32 %v883_v54, 0.0  ;;  %v886_v20 = vpop.f32.mrb[52].mxu1  ;;  %v632_v58 = vadd.f32 %v631_v32, %v8621_v61 }
 0x155   : > { %10925 = vst [vmem:[#allocation21_spill] sm:$0xff] %v9065_v13  ;;  %v9070_v7 = vpack.c.bf16 %v1023_v3, %v1019_v18  ;;  %v887_v27 = vadd.f32 %v886_v20, %v8617_v59  ;;  %v888_v55 = vpop.f32.mrb[53].mxu1  ;;  %v1025_v32 = vmax.f32 %v630_v56, 0.0 }
 0x156   : > { %10926 = vst [vmem:[#allocation22_spill] sm:$0xff] %v9067_v51  ;;  %v635_v53 = vpop.f32.mrb[54].mxu0  ;;  %2759 = vmatprep.mubr.bf16.mxu0 %v9067_v51  ;;  %3145 = vmatprep.mubr.bf16.mxu1 %v9067_v51  ;;  %v9076_v52 = vpack.c.bf16 %v1024_v8, %v1020_v10  ;;  %v889_v0 = vadd.f32 %v888_v55, %v8625_v62  ;;  %v1026_v57 = vmax.f32 %v632_v58, 0.0 }
 0x157   : > { %10927 = vst [vmem:[#allocation23_spill] sm:$0xff] %v9070_v7  ;;  %v636_v1 = vadd.f32 %v635_v53, %v8613_v6  ;;  %v637_v39 = vpop.f32.mrb[55].mxu0  ;;  %2760 = vmatmul.mubr.bf16.gmra.mrb[112].mxu0 %v9065_v13  ;;  %3146 = vmatmul.mubr.bf16.gmra.mrb[112].mxu1 %v9065_v13  ;;  %v1027_v35 = vmax.f32 %v887_v27, 0.0 }
 0x158   : > { %10928 = vst [vmem:[#allocation24_spill] sm:$0xff] %v9076_v52  ;;  %v638_v20 = vadd.f32 %v637_v39, %v8621_v61  ;;  %v892_v3 = vpop.f32.mrb[54].mxu1  ;;  %v1028_v8 = vmax.f32 %v889_v0, 0.0 }
 0x159   : > { %v1029_v18 = vmax.f32 %v636_v1, 0.0  ;;  %v893_v49 = vadd.f32 %v892_v3, %v8617_v59  ;;  %v894_v9 = vpop.f32.mrb[55].mxu1 }
 0x15a   : > { %v1030_v10 = vmax.f32 %v638_v20, 0.0  ;;  %v641_v54 = vpop.f32.mrb[56].mxu0  ;;  %v895_v55 = vadd.f32 %v894_v9, %v8625_v62 }
 0x15b   : > { %v9085_v53 = vpack.c.bf16 %v1029_v18, %v1025_v32  ;;  %v643_v51 = vpop.f32.mrb[57].mxu0  ;;  %v1031_v28 = vmax.f32 %v893_v49, 0.0  ;;  %v642_v56 = vadd.f32 %v641_v54, %v8613_v6 }
 0x15c   : > { %v9087_v13 = vpack.c.bf16 %v1030_v10, %v1026_v57  ;;  %v1032_v39 = vmax.f32 %v895_v55, 0.0  ;;  %v898_v17 = vpop.f32.mrb[56].mxu1  ;;  %v644_v20 = vadd.f32 %v643_v51, %v8621_v61 }
 0x15d   : > { %10929 = vst [vmem:[#allocation25_spill] sm:$0xff] %v9085_v53  ;;  %v9090_v27 = vpack.c.bf16 %v1031_v28, %v1027_v35  ;;  %v899_v1 = vadd.f32 %v898_v17, %v8617_v59  ;;  %v900_v58 = vpop.f32.mrb[57].mxu1  ;;  %v1033_v51 = vmax.f32 %v642_v56, 0.0 }
 0x15e   : > { %10930 = vst [vmem:[#allocation26_spill] sm:$0xff] %v9087_v13  ;;  %v647_v0 = vpop.f32.mrb[58].mxu0  ;;  %2769 = vmatprep.mubr.bf16.mxu0 %v9087_v13  ;;  %3155 = vmatprep.mubr.bf16.mxu1 %v9087_v13  ;;  %v9096_v3 = vpack.c.bf16 %v1032_v39, %v1028_v8  ;;  %v901_v32 = vadd.f32 %v900_v58, %v8625_v62  ;;  %v1034_v54 = vmax.f32 %v644_v20, 0.0 }
 0x15f   : > { %10931 = vst [vmem:[#allocation27_spill] sm:$0xff] %v9090_v27  ;;  %v648_v18 = vadd.f32 %v647_v0, %v8613_v6  ;;  %v649_v49 = vpop.f32.mrb[59].mxu0  ;;  %2770 = vmatmul.mubr.bf16.gmra.mrb[116].mxu0 %v9085_v53  ;;  %3156 = vmatmul.mubr.bf16.gmra.mrb[116].mxu1 %v9085_v53  ;;  %v1035_v9 = vmax.f32 %v899_v1, 0.0 }
 0x160   : > { %10932 = vst [vmem:[#allocation28_spill] sm:$0xff] %v9096_v3  ;;  %v650_v17 = vadd.f32 %v649_v49, %v8621_v61  ;;  %v904_v28 = vpop.f32.mrb[58].mxu1  ;;  %v1036_v39 = vmax.f32 %v901_v32, 0.0 }
 0x161   : > { %v1037_v35 = vmax.f32 %v648_v18, 0.0  ;;  %v905_v57 = vadd.f32 %v904_v28, %v8617_v59  ;;  %v906_v10 = vpop.f32.mrb[59].mxu1 }
 0x162   : > { %v1038_v8 = vmax.f32 %v650_v17, 0.0  ;;  %v653_v55 = vpop.f32.mrb[60].mxu0  ;;  %v907_v58 = vadd.f32 %v906_v10, %v8625_v62 }
 0x163   : > { %v9105_v0 = vpack.c.bf16 %v1037_v35, %v1033_v51  ;;  %v655_v13 = vpop.f32.mrb[61].mxu0  ;;  %v1039_v23 = vmax.f32 %v905_v57, 0.0  ;;  %v654_v56 = vadd.f32 %v653_v55, %v8613_v6 }
 0x164   : > { %v9107_v53 = vpack.c.bf16 %v1038_v8, %v1034_v54  ;;  %v1040_v49 = vmax.f32 %v907_v58, 0.0  ;;  %v910_v21 = vpop.f32.mrb[60].mxu1  ;;  %v656_v17 = vadd.f32 %v655_v13, %v8621_v61 }
 0x165   : > { %10933 = vst [vmem:[#allocation29_spill] sm:$0xff] %v9105_v0  ;;  %v9110_v1 = vpack.c.bf16 %v1039_v23, %v1035_v9  ;;  %v911_v18 = vadd.f32 %v910_v21, %v8617_v59  ;;  %v912_v20 = vpop.f32.mrb[61].mxu1  ;;  %v1041_v13 = vmax.f32 %v654_v56, 0.0  ;;  %v7127_v56 = vld [vmem:[%s10834_s3 + $0x10] ss:$28 sps:$4 sm:$0xff]  }
 0x166   : > { %v659_v32 = vpop.f32.mrb[62].mxu0  ;;  %2779 = vmatprep.mubr.bf16.mxu0 %v9107_v53  ;;  %3165 = vmatprep.mubr.bf16.mxu1 %v9107_v53  ;;  %v9116_v28 = vpack.c.bf16 %v1040_v49, %v1036_v39  ;;  %v913_v51 = vadd.f32 %v912_v20, %v8625_v62  ;;  %v1042_v55 = vmax.f32 %v656_v17, 0.0  ;;  %v7134_v17 = vld [vmem:[%s10834_s3 + $0x50] ss:$28 sps:$4 sm:$0xff]  }
 0x167   : > { %10934 = vst [vmem:[#allocation30_spill] sm:$0xff] %v9110_v1  ;;  %v660_v35 = vadd.f32 %v659_v32, %v8613_v6  ;;  %v661_v57 = vpop.f32.mrb[63].mxu0  ;;  %2780 = vmatmul.mubr.bf16.gmra.mrb[120].mxu0 %v9105_v0  ;;  %3166 = vmatmul.mubr.bf16.gmra.mrb[120].mxu1 %v9105_v0  ;;  %v1043_v10 = vmax.f32 %v911_v18, 0.0  ;;  %v7133_v18 = vld [vmem:[%s10834_s3 + $0x210] ss:$28 sps:$4 sm:$0xff]  }
 0x168   : > { %10935 = vst [vmem:[#allocation31_spill] sm:$0xff] %v9116_v28  ;;  %v662_v21 = vadd.f32 %v661_v57, %v8621_v61  ;;  %v916_v23 = vpop.f32.mrb[62].mxu1  ;;  %v1044_v58 = vmax.f32 %v913_v51, 0.0  ;;  %v7130_v51 = vld [vmem:[%s10834_s3 + $0x48] ss:$28 sps:$4 sm:$0xff]  }
 0x169   : > { %v1045_v9 = vmax.f32 %v660_v35, 0.0  ;;  %v917_v54 = vadd.f32 %v916_v23, %v8617_v59  ;;  %v918_v8 = vpop.f32.mrb[63].mxu1  ;;  %v7141_v35 = vld [vmem:[%s10834_s3 + $0x248] ss:$28 sps:$4 sm:$0xff]  }
 0x16a   : > { %v1046_v39 = vmax.f32 %v662_v21, 0.0  ;;  %v919_v49 = vadd.f32 %v918_v8, %v8625_v62  ;;  %v7126_v62 = vld [vmem:[%s10834_s3 + $0x18] ss:$28 sps:$4 sm:$0xff]   ;;  %v7137_v57 = vld [vmem:[%s10834_s3 + $0x84] ss:$28 sps:$4 sm:$0xff]  }
 0x16b   : > { %v9125_v6 = vpack.c.bf16 %v1045_v9, %v1041_v13  ;;  %v1047_v20 = vmax.f32 %v917_v54, 0.0  ;;  %v7135_v21 = vld [vmem:[%s10834_s3 + $0x80] ss:$28 sps:$4 sm:$0xff]   ;;  %v7142_v23 = vld [vmem:[%s10834_s3 + $0x88] ss:$28 sps:$4 sm:$0xff]  }
 0x16c   : > { %v9127_v32 = vpack.c.bf16 %v1046_v39, %v1042_v55  ;;  %v1048_v0 = vmax.f32 %v919_v49, 0.0  ;;  %v7140_v13 = vld [vmem:[%s10834_s3 + $0xbc] ss:$28 sps:$4 sm:$0xff]   ;;  %v7145_v8 = vld [vmem:[%s10834_s3 + $0xf4] ss:$28 sps:$4 sm:$0xff]  }
 0x16d   : > { %v9129_v61 = vpack.c.bf16 %v1047_v20, %v1043_v10  ;;  %v7149_v9 = vld [vmem:[%s10834_s3 + $0x280] ss:$28 sps:$4 sm:$0xff]   ;;  %v7138_v10 = vld [vmem:[%s10834_s3 + $0xb8] ss:$28 sps:$4 sm:$0xff]   ;;  %v7143_v39 = vld [vmem:[%s10834_s3 + $0xf0] ss:$28 sps:$4 sm:$0xff]  }
 0x16e   : > { %2789 = vmatprep.mubr.bf16.mxu0 %v9127_v32  ;;  %3175 = vmatprep.mubr.bf16.mxu1 %v9127_v32  ;;  %v9133_v59 = vpack.c.bf16 %v1048_v0, %v1044_v58  ;;  %v7132_v0 = vld [vmem:[%s10834_s3 + $0x4c] ss:$28 sps:$4 sm:$0xff]   ;;  %v7150_v54 = vld [vmem:[%s10834_s3 + $0xc0] ss:$28 sps:$4 sm:$0xff]   ;;  %v7157_v55 = vld [vmem:[%s10834_s3 + $0x2b8] ss:$28 sps:$4 sm:$0xff]  }
 0x16f   : > { %10936 = vst [vmem:[#allocation32_spill] sm:$0xff] %v9129_v61  ;;  %2790 = vmatmul.mubr.bf16.gmra.mrb[124].mxu0 %v9125_v6  ;;  %3176 = vmatmul.mubr.bf16.gmra.mrb[124].mxu1 %v9125_v6  ;;  %v7158_v58 = vld [vmem:[%s10834_s3 + $0xf8] ss:$28 sps:$4 sm:$0xff]   ;;  %v7148_v49 = vld [vmem:[%s10834_s3 + $0x12c] ss:$28 sps:$4 sm:$0xff]  }
 0x170   : > { %10937 = vst [vmem:[#allocation33_spill] sm:$0xff] %v9133_v59  ;;  %6016 = vmatprep.mubr.msk.bf16.mxu0 %vm2536_vm3, %v8658_v38  ;;  %6033 = vmatprep.mubr.msk.bf16.mxu1 %vm2536_vm3, %v8658_v38  ;;  %v7165_v20 = vld [vmem:[%s10834_s3 + $0x2f0] ss:$28 sps:$4 sm:$0xff]  }
 0x177   : > { %2833 = vmatmul.mubr.bf16.vlgmr.msra.gmra.mrb[64].mxu0 %v8652_v33  ;;  %3219 = vmatmul.mubr.bf16.vlgmr.msra.gmra.mrb[64].mxu1 %v8652_v33 }
 0x178   : > { %6309 = vmatpush3.bf16.msra.mxu1 %v7126_v62  ;;  %6017 = vmatprep.mubr.msk.bf16.mxu0 %vm2536_vm3, %v8702_v19  ;;  %v7146_v62 = vld [vmem:[%s10834_s3 + $0x128] ss:$28 sps:$4 sm:$0xff]  }
 0x179   : > { %6034 = vmatprep.mubr.msk.bf16.mxu1 %vm2536_vm3, %v8702_v19  ;;  %3380 = vmatpush1.bf16.msra.mxu0 %v7127_v56  ;;  %v7166_v56 = vld [vmem:[%s10834_s3 + $0x130] ss:$28 sps:$4 sm:$0xff]  }
 0x17a   : > { %3381 = vmatprep.subr.bf16.mxu0 %v7132_v0  ;;  %6310 = vmatprep.subr.bf16.mxu1 %v7133_v18  ;;  %v7153_v0 = vld [vmem:[%s10834_s3 + $0x164] ss:$28 sps:$4 sm:$0xff]  }
 0x17b   : > { %v7173_v18 = vld [vmem:[%s10834_s3 + $0x328] ss:$28 sps:$4 sm:$0xff]  }
 0x17c   : > { %6311 = vmatpush3.bf16.msra.mxu1 %v7134_v17  ;;  %v7151_v17 = vld [vmem:[%s10834_s3 + $0x160] ss:$28 sps:$4 sm:$0xff]  }
 0x17d   : > { %3382 = vmatpush1.bf16.msra.mxu0 %v7130_v51  ;;  %6312 = vmatprep.subr.bf16.mxu1 %v7141_v35  ;;  %v7174_v51 = vld [vmem:[%s10834_s3 + $0x168] ss:$28 sps:$4 sm:$0xff]   ;;  %v7156_v35 = vld [vmem:[%s10834_s3 + $0x19c] ss:$28 sps:$4 sm:$0xff]  }
 0x17e   : > { %3383 = vmatprep.subr.bf16.mxu0 %v7137_v57  ;;  %v7181_v57 = vld [vmem:[%s10834_s3 + $0x360] ss:$28 sps:$4 sm:$0xff]  }
 0x17f   : > { %2843 = vmatmul.mubr.bf16.gmra.mrb[68].mxu0 %v8696_v14  ;;  %3229 = vmatmul.mubr.bf16.gmra.mrb[68].mxu1 %v8696_v14 }
 0x180   : > { %6018 = vmatprep.mubr.msk.bf16.mxu0 %vm2536_vm3, %v8746_v4  ;;  %6035 = vmatprep.mubr.msk.bf16.mxu1 %vm2536_vm3, %v8746_v4 }
 0x181   : > { %3384 = vmatpush1.bf16.msra.mxu0 %v7135_v21  ;;  %6313 = vmatpush3.bf16.msra.mxu1 %v7142_v23  ;;  %v7154_v21 = vld [vmem:[%s10834_s3 + $0x198] ss:$28 sps:$4 sm:$0xff]   ;;  %v7182_v23 = vld [vmem:[%s10834_s3 + $0x1a0] ss:$28 sps:$4 sm:$0xff]  }
 0x182   : > { %3385 = vmatprep.subr.bf16.mxu0 %v7140_v13  ;;  %6314 = vmatprep.subr.bf16.mxu1 %v7149_v9  ;;  %v7161_v13 = vld [vmem:[%s10834_s3 + $0x1d4] ss:$28 sps:$4 sm:$0xff]  }
 0x183   : > { %v7189_v9 = vld [vmem:[%s10834_s3 + $0x558] ss:$28 sps:$4 sm:$0xff]  }
 0x185   : > { %3386 = vmatpush1.bf16.msra.mxu0 %v7138_v10  ;;  %6315 = vmatpush3.bf16.msra.mxu1 %v7150_v54  ;;  %v7159_v10 = vld [vmem:[%s10834_s3 + $0x1d0] ss:$28 sps:$4 sm:$0xff]  }
 0x186   : > { %3387 = vmatprep.subr.bf16.mxu0 %v7145_v8  ;;  %6316 = vmatprep.subr.bf16.mxu1 %v7157_v55  ;;  %v7164_v54 = vld [vmem:[%s10834_s3 + $0x20c] ss:$28 sps:$4 sm:$0xff]   ;;  %v7169_v55 = vld [vmem:[%s10834_s3 + $0x244] ss:$28 sps:$4 sm:$0xff]  }
 0x187   : > { %2853 = vmatmul.mubr.bf16.gmra.mrb[72].mxu0 %v8740_v60  ;;  %3239 = vmatmul.mubr.bf16.gmra.mrb[72].mxu1 %v8740_v60  ;;  %v7162_v8 = vld [vmem:[%s10834_s3 + $0x208] ss:$28 sps:$4 sm:$0xff]  }
 0x188   : > { %6019 = vmatprep.mubr.msk.bf16.mxu0 %vm2536_vm3, %v8790_v50  ;;  %6036 = vmatprep.mubr.msk.bf16.mxu1 %vm2536_vm3, %v8790_v50 }
 0x189   : > { %3388 = vmatpush1.bf16.msra.mxu0 %v7143_v39  ;;  %6317 = vmatpush3.bf16.msra.mxu1 %v7158_v58  ;;  %v7167_v39 = vld [vmem:[%s10834_s3 + $0x240] ss:$28 sps:$4 sm:$0xff]  }
 0x18a   : > { %3389 = vmatprep.subr.bf16.mxu0 %v7148_v49  ;;  %6318 = vmatprep.subr.bf16.mxu1 %v7165_v20  ;;  %v7172_v58 = vld [vmem:[%s10834_s3 + $0x27c] ss:$28 sps:$4 sm:$0xff]   ;;  %v7177_v20 = vld [vmem:[%s10834_s3 + $0x2b4] ss:$28 sps:$4 sm:$0xff]  }
 0x18b   : > { %v7170_v49 = vld [vmem:[%s10834_s3 + $0x278] ss:$28 sps:$4 sm:$0xff]  }
 0x18d   : > { %3390 = vmatpush1.bf16.msra.mxu0 %v7146_v62  ;;  %6319 = vmatpush3.bf16.msra.mxu1 %v7166_v56  ;;  %v7175_v62 = vld [vmem:[%s10834_s3 + $0x2b0] ss:$28 sps:$4 sm:$0xff]  }
 0x18e   : > { %3391 = vmatprep.subr.bf16.mxu0 %v7153_v0  ;;  %6320 = vmatprep.subr.bf16.mxu1 %v7173_v18  ;;  %v7180_v56 = vld [vmem:[%s10834_s3 + $0x2ec] ss:$28 sps:$4 sm:$0xff]   ;;  %v7185_v18 = vld [vmem:[%s10834_s3 + $0x324] ss:$28 sps:$4 sm:$0xff]  }
 0x18f   : > { %2863 = vmatmul.mubr.bf16.gmra.mrb[76].mxu0 %v8784_v44  ;;  %3249 = vmatmul.mubr.bf16.gmra.mrb[76].mxu1 %v8784_v44  ;;  %v7178_v0 = vld [vmem:[%s10834_s3 + $0x2e8] ss:$28 sps:$4 sm:$0xff]  }
 0x190   : > { %6020 = vmatprep.mubr.msk.bf16.mxu0 %vm2536_vm3, %v8834_v45  ;;  %6037 = vmatprep.mubr.msk.bf16.mxu1 %vm2536_vm3, %v8834_v45 }
 0x191   : > { %3392 = vmatpush1.bf16.msra.mxu0 %v7151_v17  ;;  %6321 = vmatpush3.bf16.msra.mxu1 %v7174_v51  ;;  %v7183_v17 = vld [vmem:[%s10834_s3 + $0x320] ss:$28 sps:$4 sm:$0xff]  }
 0x192   : > { %3393 = vmatprep.subr.bf16.mxu0 %v7156_v35  ;;  %6322 = vmatprep.subr.bf16.mxu1 %v7181_v57  ;;  %v7188_v51 = vld [vmem:[%s10834_s3 + $0x35c] ss:$28 sps:$4 sm:$0xff]   ;;  %v7193_v57 = vld [vmem:[%s10834_s3 + $0x394] ss:$28 sps:$4 sm:$0xff]  }
 0x193   : > { %v7186_v35 = vld [vmem:[%s10834_s3 + $0x358] ss:$28 sps:$4 sm:$0xff]  }
 0x195   : > { %3394 = vmatpush1.bf16.msra.mxu0 %v7154_v21  ;;  %6323 = vmatpush3.bf16.msra.mxu1 %v7182_v23  ;;  %v7190_v21 = vld [vmem:[%s10834_s3 + $0x398] ss:$28 sps:$4 sm:$0xff]   ;;  %v7191_v23 = vld [vmem:[%s10834_s3 + $0x390] ss:$28 sps:$4 sm:$0xff]  }
 0x196   : > { %3395 = vmatprep.subr.bf16.mxu0 %v7161_v13  ;;  %6420 = vmatprep.subr.bf16.mxu1 %v7189_v9  ;;  %v7196_v13 = vld [vmem:[%s10834_s3 + $0x3cc] ss:$28 sps:$4 sm:$0xff]  }
 0x197   : > { %2873 = vmatmul.mubr.bf16.gmra.mrb[80].mxu0 %v8828_v37  ;;  %3259 = vmatmul.mubr.bf16.gmra.mrb[80].mxu1 %v8828_v37  ;;  %v7197_v9 = vld [vmem:[%s10834_s3 + $0x590] ss:$28 sps:$4 sm:$0xff]  }
 0x198   : > { %6021 = vmatprep.mubr.msk.bf16.mxu0 %vm2536_vm3, %v8878_v47  ;;  %6038 = vmatprep.mubr.msk.bf16.mxu1 %vm2536_vm3, %v8878_v47 }
 0x199   : > { %3396 = vmatpush1.bf16.msra.mxu0 %v7159_v10  ;;  %v7194_v10 = vld [vmem:[%s10834_s3 + $0x3c8] ss:$28 sps:$4 sm:$0xff]  }
 0x19a   : > { %3397 = vmatprep.subr.bf16.mxu0 %v7164_v54  ;;  %v7205_v54 = vld [vmem:[%s10834_s3 + $0x5c8] ss:$28 sps:$4 sm:$0xff]  }
 0x19d   : > { %3398 = vmatpush1.bf16.msra.mxu0 %v7162_v8  ;;  %v7206_v8 = vld [vmem:[%s10834_s3 + $0x408] ss:$28 sps:$4 sm:$0xff]  }
 0x19e   : > { %3399 = vmatprep.subr.bf16.mxu0 %v7169_v55  ;;  %v7204_v55 = vld [vmem:[%s10834_s3 + $0x43c] ss:$28 sps:$4 sm:$0xff]  }
 0x19f   : > { %2883 = vmatmul.mubr.bf16.gmra.mrb[84].mxu0 %v8872_v36  ;;  %3269 = vmatmul.mubr.bf16.gmra.mrb[84].mxu1 %v8872_v36 }
 0x1a0   : > { %6022 = vmatprep.mubr.msk.bf16.mxu0 %vm2536_vm3, %v8925_v63  ;;  %6039 = vmatprep.mubr.msk.bf16.mxu1 %vm2536_vm3, %v8925_v63 }
 0x1a1   : > { %3400 = vmatpush1.bf16.msra.mxu0 %v7167_v39  ;;  %v7213_v39 = vld [vmem:[%s10834_s3 + $0x600] ss:$28 sps:$4 sm:$0xff]  }
 0x1a2   : > { %3401 = vmatprep.subr.bf16.mxu0 %v7172_v58  ;;  %v7202_v58 = vld [vmem:[%s10834_s3 + $0x438] ss:$28 sps:$4 sm:$0xff]  }
 0x1a5   : > { %3402 = vmatpush1.bf16.msra.mxu0 %v7170_v49  ;;  %v7214_v49 = vld [vmem:[%s10834_s3 + $0x440] ss:$28 sps:$4 sm:$0xff]  }
 0x1a6   : > { %3403 = vmatprep.subr.bf16.mxu0 %v7177_v20  ;;  %v7209_v20 = vld [vmem:[%s10834_s3 + $0x474] ss:$28 sps:$4 sm:$0xff]  }
 0x1a7   : > { %2893 = vmatmul.mubr.bf16.gmra.mrb[88].mxu0 %v8916_v42  ;;  %3279 = vmatmul.mubr.bf16.gmra.mrb[88].mxu1 %v8916_v42 }
 0x1a8   : > { %6023 = vmatprep.mubr.msk.bf16.mxu0 %vm2536_vm3, %v8966_v16  ;;  %6040 = vmatprep.mubr.msk.bf16.mxu1 %vm2536_vm3, %v8966_v16 }
 0x1a9   : > { %3404 = vmatpush1.bf16.msra.mxu0 %v7175_v62  ;;  %v7222_v62 = vld [vmem:[%s10834_s3 + $0x478] ss:$28 sps:$4 sm:$0xff]  }
 0x1aa   : > { %3405 = vmatprep.subr.bf16.mxu0 %v7180_v56  ;;  %v7212_v56 = vld [vmem:[%s10834_s3 + $0x4ac] ss:$28 sps:$4 sm:$0xff]  }
 0x1ad   : > { %3406 = vmatpush1.bf16.msra.mxu0 %v7178_v0  ;;  %v7229_v0 = vld [vmem:[%s10834_s3 + $0x670] ss:$28 sps:$4 sm:$0xff]  }
 0x1ae   : > { %3407 = vmatprep.subr.bf16.mxu0 %v7185_v18  ;;  %v7210_v18 = vld [vmem:[%s10834_s3 + $0x4a8] ss:$28 sps:$4 sm:$0xff]  }
 0x1af   : > { %2903 = vmatmul.mubr.bf16.gmra.mrb[92].mxu0 %v8960_v11  ;;  %3289 = vmatmul.mubr.bf16.gmra.mrb[92].mxu1 %v8960_v11 }
 0x1b0   : > { %6024 = vmatprep.mubr.msk.bf16.mxu0 %vm2536_vm3, %v8996_v31  ;;  %6041 = vmatprep.mubr.msk.bf16.mxu1 %vm2536_vm3, %v8996_v31 }
 0x1b1   : > { %3408 = vmatpush1.bf16.msra.mxu0 %v7183_v17  ;;  %v7230_v17 = vld [vmem:[%s10834_s3 + $0x4b0] ss:$28 sps:$4 sm:$0xff]  }
 0x1b2   : > { %3409 = vmatprep.subr.bf16.mxu0 %v7188_v51  ;;  %v7217_v51 = vld [vmem:[%s10834_s3 + $0x4e4] ss:$28 sps:$4 sm:$0xff]  }
 0x1b5   : > { %3410 = vmatpush1.bf16.msra.mxu0 %v7186_v35  ;;  %v7238_v35 = vld [vmem:[%s10834_s3 + $0x4e8] ss:$28 sps:$4 sm:$0xff]  }
 0x1b6   : > { %3572 = vmatprep.subr.bf16.mxu0 %v7193_v57  ;;  %v7220_v57 = vld [vmem:[%s10834_s3 + $0x51c] ss:$28 sps:$4 sm:$0xff]  }
 0x1b7   : > { %2913 = vmatmul.mubr.bf16.gmra.mrb[96].mxu0 %v8990_v24  ;;  %3299 = vmatmul.mubr.bf16.gmra.mrb[96].mxu1 %v8990_v24 }
 0x1b8   : > { %6025 = vmatprep.mubr.msk.bf16.mxu0 %vm2536_vm3, %v9016_v48  ;;  %6042 = vmatprep.mubr.msk.bf16.mxu1 %vm2536_vm3, %v9016_v48 }
 0x1bf   : > { %2923 = vmatmul.mubr.bf16.gmra.mrb[100].mxu0 %v9010_v29  ;;  %3309 = vmatmul.mubr.bf16.gmra.mrb[100].mxu1 %v9010_v29 }
 0x1c0   : > { %6026 = vmatprep.mubr.msk.bf16.mxu0 %vm2536_vm3, %v9036_v12  ;;  %6043 = vmatprep.mubr.msk.bf16.mxu1 %vm2536_vm3, %v9036_v12 }
 0x1c7   : > { %2933 = vmatmul.mubr.bf16.gmra.mrb[104].mxu0 %v9030_v41  ;;  %3319 = vmatmul.mubr.bf16.gmra.mrb[104].mxu1 %v9030_v41 }
 0x1c8   : > { %6027 = vmatprep.mubr.msk.bf16.mxu0 %vm2536_vm3, %v9056_v15  ;;  %6044 = vmatprep.mubr.msk.bf16.mxu1 %vm2536_vm3, %v9056_v15 }
 0x1cf   : > { %2943 = vmatmul.mubr.bf16.gmra.mrb[108].mxu0 %v9050_v40  ;;  %3329 = vmatmul.mubr.bf16.gmra.mrb[108].mxu1 %v9050_v40 }
 0x1d0   : > { %6028 = vmatprep.mubr.msk.bf16.mxu0 %vm2536_vm3, %v9076_v52  ;;  %6045 = vmatprep.mubr.msk.bf16.mxu1 %vm2536_vm3, %v9076_v52 }
 0x1d7   : > { %2953 = vmatmul.mubr.bf16.gmra.mrb[112].mxu0 %v9070_v7  ;;  %3339 = vmatmul.mubr.bf16.gmra.mrb[112].mxu1 %v9070_v7 }
 0x1d8   : > { %6029 = vmatprep.mubr.msk.bf16.mxu0 %vm2536_vm3, %v9096_v3  ;;  %6046 = vmatprep.mubr.msk.bf16.mxu1 %vm2536_vm3, %v9096_v3 }
 0x1df   : > { %2963 = vmatmul.mubr.bf16.gmra.mrb[116].mxu0 %v9090_v27  ;;  %3349 = vmatmul.mubr.bf16.gmra.mrb[116].mxu1 %v9090_v27 }
 0x1e0   : > { %6030 = vmatprep.mubr.msk.bf16.mxu0 %vm2536_vm3, %v9116_v28  ;;  %6047 = vmatprep.mubr.msk.bf16.mxu1 %vm2536_vm3, %v9116_v28 }
 0x1e7   : > { %2973 = vmatmul.mubr.bf16.gmra.mrb[120].mxu0 %v9110_v1  ;;  %3359 = vmatmul.mubr.bf16.gmra.mrb[120].mxu1 %v9110_v1 }
 0x1e8   : > { %6031 = vmatprep.mubr.msk.bf16.mxu0 %vm2536_vm3, %v9133_v59  ;;  %6048 = vmatprep.mubr.msk.bf16.mxu1 %vm2536_vm3, %v9133_v59 }
 0x1ef   : > { %2983 = vmatmul.mubr.bf16.gmra.mrb[124].mxu0 %v9129_v61  ;;  %3369 = vmatmul.mubr.bf16.gmra.mrb[124].mxu1 %v9129_v61 }
 0x1f0   : > { %3411 = vmatprep.mubr.bf16.mxu0 %v8637_v25  ;;  %3797 = vmatprep.mubr.bf16.mxu1 %v8637_v25  ;;  %v7198_v25 = vld [vmem:[%s10834_s3 + $0x3d0] ss:$28 sps:$4 sm:$0xff]  }
 0x1f7   : > { %3412 = vmatmul.mubr.bf16.vlgmr.msra.gmra.mrb[128].mxu0 %v8635_v22  ;;  %3798 = vmatmul.mubr.bf16.vlgmr.msra.gmra.mrb[128].mxu1 %v8635_v22  ;;  %v7201_v22 = vld [vmem:[%s10834_s3 + $0x404] ss:$28 sps:$4 sm:$0xff]  }
 0x1f8   : > { %6421 = vmatpush3.bf16.msra.mxu1 %v7190_v21  ;;  %3421 = vmatprep.mubr.bf16.mxu0 %v8681_v5  ;;  %v7245_v21 = vld [vmem:[%s10834_s3 + $0x6e0] ss:$0 sps:$4 sm:$0x33]  }
 0x1f9   : > { %3805 = vmatprep.mubr.bf16.mxu1 %v8681_v5  ;;  %3573 = vmatpush1.bf16.msra.mxu0 %v7191_v23  ;;  %v7199_v5 = vld [vmem:[%s10834_s3 + $0x400] ss:$28 sps:$4 sm:$0xff]   ;;  %v7218_v23 = vld [vmem:[%s10834_s3 + $0x518] ss:$28 sps:$4 sm:$0xff]  }
 0x1fa   : > { %3574 = vmatprep.subr.bf16.mxu0 %v7196_v13  ;;  %6422 = vmatprep.subr.bf16.mxu1 %v7197_v9  ;;  %v7246_v13 = vld [vmem:[%s10834_s3 + $0x520] ss:$28 sps:$4 sm:$0xff]   ;;  %v7228_v9 = vld [vmem:[%s10834_s3 + $0x58c] ss:$28 sps:$4 sm:$0xff]  }
 0x1fc   : > { %6423 = vmatpush3.bf16.msra.mxu1 %v7198_v25  ;;  %v10938_v25 = vld [vmem:[#allocation3_spill] sm:$0xff] }
 0x1fd   : > { %3575 = vmatpush1.bf16.msra.mxu0 %v7194_v10  ;;  %6424 = vmatprep.subr.bf16.mxu1 %v7205_v54  ;;  %v10939_v10 = vld [vmem:[#allocation5_spill] sm:$0xff]  ;;  %v7226_v54 = vld [vmem:[%s10834_s3 + $0x588] ss:$28 sps:$4 sm:$0xff]  }
 0x1fe   : > { %3576 = vmatprep.subr.bf16.mxu0 %v7201_v22  ;;  %v7233_v22 = vld [vmem:[%s10834_s3 + $0x5c4] ss:$28 sps:$4 sm:$0xff]  }
 0x1ff   : > { %3422 = vmatmul.mubr.bf16.gmra.mrb[132].mxu0 %v8679_v2  ;;  %3806 = vmatmul.mubr.bf16.gmra.mrb[132].mxu1 %v8679_v2  ;;  %v7221_v2 = vld [vmem:[%s10834_s3 + $0x638] ss:$28 sps:$4 sm:$0xff]  }
 0x200   : > { %3431 = vmatprep.mubr.bf16.mxu0 %v8725_v46  ;;  %3813 = vmatprep.mubr.bf16.mxu1 %v8725_v46  ;;  %v7207_v46 = vld [vmem:[%s10834_s3 + $0x470] ss:$28 sps:$4 sm:$0xff]  }
 0x201   : > { %3577 = vmatpush1.bf16.msra.mxu0 %v7199_v5  ;;  %6425 = vmatpush3.bf16.msra.mxu1 %v7206_v8  ;;  %v7231_v5 = vld [vmem:[%s10834_s3 + $0x5c0] ss:$28 sps:$4 sm:$0xff]  }
 0x202   : > { %3578 = vmatprep.subr.bf16.mxu0 %v7204_v55  ;;  %6426 = vmatprep.subr.bf16.mxu1 %v7213_v39  ;;  %v7236_v8 = vld [vmem:[%s10834_s3 + $0x5fc] ss:$28 sps:$4 sm:$0xff]   ;;  %v10940_v55 = vld [vmem:[#allocation4_spill] sm:$0xff]  ;;  %v10941_v39 = vld [vmem:[#allocation7_spill] sm:$0xff] }
 0x205   : > { %3579 = vmatpush1.bf16.msra.mxu0 %v7202_v58  ;;  %6427 = vmatpush3.bf16.msra.mxu1 %v7214_v49  ;;  %v7234_v58 = vld [vmem:[%s10834_s3 + $0x5f8] ss:$28 sps:$4 sm:$0xff]  }
 0x206   : > { %3580 = vmatprep.subr.bf16.mxu0 %v7209_v20  ;;  %6428 = vmatprep.subr.bf16.mxu1 %v7221_v2  ;;  %v7241_v49 = vld [vmem:[%s10834_s3 + $0x634] ss:$28 sps:$4 sm:$0xff]   ;;  %v7244_v2 = vld [vmem:[%s10834_s3 + $0x66c] ss:$28 sps:$4 sm:$0xff]  }
 0x207   : > { %3432 = vmatmul.mubr.bf16.gmra.mrb[136].mxu0 %v8723_v43  ;;  %3814 = vmatmul.mubr.bf16.gmra.mrb[136].mxu1 %v8723_v43  ;;  %v7237_v43 = vld [vmem:[%s10834_s3 + $0x6a8] ss:$28 sps:$4 sm:$0xff]   ;;  %v7239_v20 = vld [vmem:[%s10834_s3 + $0x630] ss:$28 sps:$4 sm:$0xff]  }
 0x208   : > { %3441 = vmatprep.mubr.bf16.mxu0 %v8769_v34  ;;  %3821 = vmatprep.mubr.bf16.mxu1 %v8769_v34  ;;  %v7215_v34 = vld [vmem:[%s10834_s3 + $0x4e0] ss:$28 sps:$4 sm:$0xff]  }
 0x209   : > { %3581 = vmatpush1.bf16.msra.mxu0 %v7207_v46  ;;  %6429 = vmatpush3.bf16.msra.mxu1 %v7222_v62  ;;  %v10942_v46 = vld [vmem:[#allocation6_spill] sm:$0xff]  ;;  %v10943_v62 = vld [vmem:[#allocation9_spill] sm:$0xff] }
 0x20a   : > { %3582 = vmatprep.subr.bf16.mxu0 %v7212_v56  ;;  %6430 = vmatprep.subr.bf16.mxu1 %v7229_v0  ;;  %v7242_v56 = vld [vmem:[%s10834_s3 + $0x668] ss:$28 sps:$4 sm:$0xff]  }
 0x20b   : > { %v7249_v0 = vld [vmem:[%s10834_s3 + $0x6a4] ss:$28 sps:$4 sm:$0xff]  }
 0x20d   : > { %3583 = vmatpush1.bf16.msra.mxu0 %v7210_v18  ;;  %6431 = vmatpush3.bf16.msra.mxu1 %v7230_v17  ;;  %v1363_v18 = vld [vmem:[%s10834_s3 + $0x6d8] sm:$0x33] }
 0x20e   : > { %3584 = vmatprep.subr.bf16.mxu0 %v7217_v51  ;;  %6432 = vmatprep.subr.bf16.mxu1 %v7237_v43  ;;  %v7247_v17 = vld [vmem:[%s10834_s3 + $0x6a0] ss:$28 sps:$4 sm:$0xff]   ;;  %v6013_v51 = vcombine.high %v1363_v18, %v1363_v18  ;;  %v6012_v43 = vcombine.low %v1363_v18, %v1363_v18 }
 0x20f   : > { %3442 = vmatmul.mubr.bf16.gmra.mrb[140].mxu0 %v8767_v30  ;;  %3822 = vmatmul.mubr.bf16.gmra.mrb[140].mxu1 %v8767_v30  ;;  %v7225_v30 = vld [vmem:[%s10834_s3 + $0x554] ss:$28 sps:$4 sm:$0xff]  }
 0x210   : > { %3451 = vmatprep.mubr.bf16.mxu0 %v8813_v26  ;;  %3829 = vmatprep.mubr.bf16.mxu1 %v8813_v26  ;;  %v7223_v26 = vld [vmem:[%s10834_s3 + $0x550] ss:$28 sps:$4 sm:$0xff]  }
 0x211   : > { %3585 = vmatpush1.bf16.msra.mxu0 %v7215_v34  ;;  %6433 = vmatpush3.bf16.msra.mxu1 %v7238_v35  ;;  %v10944_v34 = vld [vmem:[#allocation8_spill] sm:$0xff]  ;;  %v10945_v35 = vld [vmem:[#allocation11_spill] sm:$0xff] }
 0x212   : > { %3586 = vmatprep.subr.bf16.mxu0 %v7220_v57  ;;  %6924 = vmatprep.subr.msk.bf16.mxu1 %vm2585_vm2, %v7245_v21  ;;  %v2599_v57 = vsel %vm2585_vm2, %v6012_v43, 0  ;;  %v10946_v21 = vld [vmem:[#allocation10_spill] sm:$0xff] }
 0x215   : > { %3587 = vmatpush1.bf16.msra.mxu0 %v7218_v23  ;;  %6435 = vmatpush3.bf16.msra.mxu1 %v7246_v13  ;;  %v10947_v23 = vld [vmem:[#allocation13_spill] sm:$0xff]  ;;  %v10948_v13 = vld [vmem:[#allocation12_spill] sm:$0xff] }
 0x216   : > { %3588 = vmatprep.subr.bf16.mxu0 %v7225_v30  ;;  %v10949_v30 = vld [vmem:[#allocation15_spill] sm:$0xff] }
 0x217   : > { %3452 = vmatmul.mubr.bf16.gmra.mrb[144].mxu0 %v10938_v25  ;;  %3830 = vmatmul.mubr.bf16.gmra.mrb[144].mxu1 %v10938_v25  ;;  %v10951_v25 = vld [vmem:[#allocation2_spill] sm:$0xff] }
 0x218   : > { %3461 = vmatprep.mubr.bf16.mxu0 %v10939_v10  ;;  %3837 = vmatprep.mubr.bf16.mxu1 %v10939_v10  ;;  %v10952_v10 = vsub.s32 0, %v10951_v25 }
 0x219   : > { %3589 = vmatpush1.bf16.msra.mxu0 %v7223_v26  ;;  %v1365_v26 = vld [vmem:[%s10835_s4] sm:$0x7f] }
 0x21a   : > { %3590 = vmatprep.subr.bf16.mxu0 %v7228_v9  ;;  %v10950_v9 = vld [vmem:[#allocation14_spill] sm:$0xff] }
 0x21d   : > { %3591 = vmatpush1.bf16.msra.mxu0 %v7226_v54  ;;  %v9564_v54 = vrot.slane %v1365_v26, %v10952_v10 }
 0x21e   : > { %3592 = vmatprep.subr.bf16.mxu0 %v7233_v22  ;;  %v10953_v22 = vsub.s32 2, %v10951_v25 }
 0x21f   : > { %3462 = vmatmul.mubr.bf16.gmra.mrb[148].mxu0 %v10940_v55  ;;  %3838 = vmatmul.mubr.bf16.gmra.mrb[148].mxu1 %v10940_v55  ;;  %v10955_v55 = vsub.s32 1, %v10951_v25 }
 0x220   : > { %3471 = vmatprep.mubr.bf16.mxu0 %v10941_v39  ;;  %3845 = vmatprep.mubr.bf16.mxu1 %v10941_v39 }
 0x221   : > { %3593 = vmatpush1.bf16.msra.mxu0 %v7231_v5  ;;  %v9568_v5 = vrot.slane %v1365_v26, %v10953_v22  ;;  %v9574_v39 = vrot.slane %v1365_v26, %v10955_v55 }
 0x222   : > { %3594 = vmatprep.subr.bf16.mxu0 %v7236_v8  ;;  %v10954_v8 = vld [vmem:[#allocation18_spill] sm:$0xff] }
 0x225   : > { %3595 = vmatpush1.bf16.msra.mxu0 %v7234_v58  ;;  %v10956_v58 = vsub.s32 3, %v10951_v25 }
 0x226   : > { %3596 = vmatprep.subr.bf16.mxu0 %v7241_v49 }
 0x227   : > { %3472 = vmatmul.mubr.bf16.gmra.mrb[152].mxu0 %v10942_v46  ;;  %3846 = vmatmul.mubr.bf16.gmra.mrb[152].mxu1 %v10942_v46  ;;  %v9578_v49 = vrot.slane %v1365_v26, %v10956_v58  ;;  %v10958_v58 = vld [vmem:[#allocation22_spill] sm:$0xff] }
 0x228   : > { %3481 = vmatprep.mubr.bf16.mxu0 %v10943_v62  ;;  %3853 = vmatprep.mubr.bf16.mxu1 %v10943_v62 }
 0x229   : > { %3597 = vmatpush1.bf16.msra.mxu0 %v7239_v20 }
 0x22a   : > { %3598 = vmatprep.subr.bf16.mxu0 %v7244_v2 }
 0x22d   : > { %3599 = vmatpush1.bf16.msra.mxu0 %v7242_v56 }
 0x22e   : > { %3600 = vmatprep.subr.bf16.mxu0 %v7249_v0 }
 0x22f   : > { %3482 = vmatmul.mubr.bf16.gmra.mrb[156].mxu0 %v10944_v34  ;;  %3854 = vmatmul.mubr.bf16.gmra.mrb[156].mxu1 %v10944_v34 }
 0x230   : > { %3491 = vmatprep.mubr.bf16.mxu0 %v10945_v35  ;;  %3861 = vmatprep.mubr.bf16.mxu1 %v10945_v35 }
 0x231   : > { %3601 = vmatpush1.bf16.msra.mxu0 %v7247_v17 }
 0x232   : > { %6049 = vmatprep.subr.msk.bf16.mxu0 %vm2585_vm2, %v6013_v51 }
 0x235   : > { %3603 = vmatpush1.bf16.msra.mxu0 %v2599_v57 }
 0x237   : > { %3492 = vmatmul.mubr.bf16.gmra.mrb[160].mxu0 %v10946_v21  ;;  %3862 = vmatmul.mubr.bf16.gmra.mrb[160].mxu1 %v10946_v21 }
 0x238   : > { %3501 = vmatprep.mubr.bf16.mxu0 %v10947_v23  ;;  %3869 = vmatprep.mubr.bf16.mxu1 %v10947_v23 }
 0x23f   : > { %3502 = vmatmul.mubr.bf16.gmra.mrb[164].mxu0 %v10948_v13  ;;  %3870 = vmatmul.mubr.bf16.gmra.mrb[164].mxu1 %v10948_v13 }
 0x240   : > { %3511 = vmatprep.mubr.bf16.mxu0 %v10949_v30  ;;  %3877 = vmatprep.mubr.bf16.mxu1 %v10949_v30 }
 0x247   : > { %3512 = vmatmul.mubr.bf16.gmra.mrb[168].mxu0 %v10950_v9  ;;  %3878 = vmatmul.mubr.bf16.gmra.mrb[168].mxu1 %v10950_v9 }
 0x248   : > { %3521 = vmatprep.mubr.bf16.mxu0 %v10954_v8  ;;  %3885 = vmatprep.mubr.bf16.mxu1 %v10954_v8  ;;  %v10957_v8 = vld [vmem:[#allocation17_spill] sm:$0xff] }
 0x24a   : > { %v2834_v20 = vpop.f32.mrb[64].mxu0  ;;  %v3220_v2 = vpop.f32.mrb[64].mxu1 }
 0x24b   : > { %v6540_v46 = vadd.f32 %v2834_v20, %v9564_v54  ;;  %v6604_v62 = vadd.f32 %v3220_v2, %v9568_v5  ;;  %v2836_v56 = vpop.f32.mrb[65].mxu0  ;;  %v3222_v0 = vpop.f32.mrb[65].mxu1 }
 0x24c   : > { %v6541_v18 = vadd.f32 %v2836_v56, %v9574_v39  ;;  %v6605_v17 = vadd.f32 %v3222_v0, %v9578_v49  ;;  %v2838_v51 = vpop.f32.mrb[66].mxu0  ;;  %v3224_v43 = vpop.f32.mrb[66].mxu1 }
 0x24d   : > { %v6082_v34 = vmul.f32 -1.442695, %v6540_v46  ;;  %v6084_v35 = vmul.f32 -1.442695, %v6604_v62  ;;  %v6542_v57 = vadd.f32 %v2838_v51, %v9564_v54  ;;  %v6606_v21 = vadd.f32 %v3224_v43, %v9568_v5  ;;  %v2840_v23 = vpop.f32.mrb[67].mxu0  ;;  %v3226_v13 = vpop.f32.mrb[67].mxu1 }
 0x24e   : > { %v6083_v30 = vmul.f32 -1.442695, %v6541_v18  ;;  %v6085_v26 = vmul.f32 -1.442695, %v6605_v17  ;;  %v6543_v9 = vadd.f32 %v2840_v23, %v9574_v39  ;;  %v6607_v10 = vadd.f32 %v3226_v13, %v9578_v49 }
 0x24f   : > { %7252 = vpow2.f32 %v6082_v34  ;;  %v6089_v22 = vmul.f32 -1.442695, %v6542_v57  ;;  %3522 = vmatmul.mubr.bf16.gmra.mrb[172].mxu0 %v10957_v8  ;;  %3886 = vmatmul.mubr.bf16.gmra.mrb[172].mxu1 %v10957_v8  ;;  %v6091_v55 = vmul.f32 -1.442695, %v6606_v21  ;;  %v10960_v8 = vld [vmem:[#allocation26_spill] sm:$0xff] }
 0x250   : > { %7254 = vpow2.f32 %v6084_v35  ;;  %3531 = vmatprep.mubr.bf16.mxu0 %v10958_v58  ;;  %3893 = vmatprep.mubr.bf16.mxu1 %v10958_v58  ;;  %v6090_v20 = vmul.f32 -1.442695, %v6543_v9  ;;  %v6092_v2 = vmul.f32 -1.442695, %v6607_v10 }
 0x251   : > { %7256 = vpow2.f32 %v6083_v30 }
 0x252   : > { %7258 = vpow2.f32 %v6085_v26  ;;  %v2844_v46 = vpop.f32.mrb[68].mxu0  ;;  %v3230_v62 = vpop.f32.mrb[68].mxu1 }
 0x253   : > { %7260 = vpow2.f32 %v6089_v22  ;;  %v6544_v56 = vadd.f32 %v2844_v46, %v9564_v54  ;;  %v6608_v0 = vadd.f32 %v3230_v62, %v9568_v5  ;;  %v2846_v18 = vpop.f32.mrb[69].mxu0  ;;  %v3232_v17 = vpop.f32.mrb[69].mxu1  ;;  %v10959_v22 = vld [vmem:[#allocation21_spill] sm:$0xff] }
 0x254   : > { %7262 = vpow2.f32 %v6091_v55  ;;  %v6545_v51 = vadd.f32 %v2846_v18, %v9574_v39  ;;  %v6609_v43 = vadd.f32 %v3232_v17, %v9578_v49  ;;  %v2848_v34 = vpop.f32.mrb[70].mxu0  ;;  %v3234_v35 = vpop.f32.mrb[70].mxu1 }
 0x255   : > { %7264 = vpow2.f32 %v6090_v20  ;;  %v6096_v57 = vmul.f32 -1.442695, %v6544_v56  ;;  %v6098_v21 = vmul.f32 -1.442695, %v6608_v0  ;;  %v6546_v23 = vadd.f32 %v2848_v34, %v9564_v54  ;;  %v2850_v13 = vpop.f32.mrb[71].mxu0  ;;  %v3236_v30 = vpop.f32.mrb[71].mxu1 }
 0x256   : > { %7266 = vpow2.f32 %v6092_v2  ;;  %v6097_v26 = vmul.f32 -1.442695, %v6545_v51  ;;  %v6099_v9 = vmul.f32 -1.442695, %v6609_v43 }
 0x257   : > { %7268 = vpow2.f32 %v6096_v57  ;;  %v6103_v10 = vmul.f32 -1.442695, %v6546_v23  ;;  %3532 = vmatmul.mubr.bf16.gmra.mrb[176].mxu0 %v10959_v22  ;;  %3894 = vmatmul.mubr.bf16.gmra.mrb[176].mxu1 %v10959_v22 }
 0x258   : > { %7270 = vpow2.f32 %v6098_v21  ;;  %3541 = vmatprep.mubr.bf16.mxu0 %v10960_v8  ;;  %3901 = vmatprep.mubr.bf16.mxu1 %v10960_v8 }
 0x259   : > { %v7253_v55 = vpop.eup %7252  ;;  %7272 = vpow2.f32 %v6097_v26 }
 0x25a   : > { %v7255_v58 = vpop.eup %7254  ;;  %v4759_v20 = vadd.f32 1.0, %v7253_v55  ;;  %7274 = vpow2.f32 %v6099_v9  ;;  %v2854_v46 = vpop.f32.mrb[72].mxu0  ;;  %v10961_v55 = vld [vmem:[#allocation25_spill] sm:$0xff] }
 0x25b   : > { %v3240_v2 = vpop.f32.mrb[72].mxu1  ;;  %v7257_v62 = vpop.eup %7256  ;;  %v4761_v56 = vadd.f32 1.0, %v7255_v58  ;;  %7276 = vpow2.f32 %v6103_v10 }
 0x25c   : > { %v2856_v0 = vpop.f32.mrb[73].mxu0  ;;  %v9601_v18 = vpop.f32.mrb[73].mxu1  ;;  %7278 = vrcp.f32 %v4759_v20  ;;  %v4760_v51 = vadd.f32 1.0, %v7257_v62 }
 0x25d   : > { %v7259_v17 = vpop.eup %7258  ;;  %v9603_v43 = vpop.f32.mrb[74].mxu0  ;;  %7280 = vrcp.f32 %v4761_v56  ;;  %v6549_v1 = vadd.f32 %v2856_v0, %v9574_v39 }
 0x25e   : > { %v9605_v34 = vpop.f32.mrb[74].mxu1  ;;  %v7261_v57 = vpop.eup %7260  ;;  %v4762_v21 = vadd.f32 1.0, %v7259_v17  ;;  %7282 = vrcp.f32 %v4760_v51  ;;  %v6610_v17 = vadd.f32 %v3234_v35, %v9568_v5  ;;  %v6550_v0 = vadd.f32 %v9603_v43, %v9564_v54 }
 0x25f   : > { %v9607_v23 = vpop.f32.mrb[75].mxu0  ;;  %v7263_v26 = vpop.eup %7262  ;;  %v4766_v9 = vadd.f32 1.0, %v7261_v57  ;;  %3542 = vmatmul.mubr.bf16.gmra.mrb[180].mxu0 %v10961_v55  ;;  %3902 = vmatmul.mubr.bf16.gmra.mrb[180].mxu1 %v10961_v55 }
 0x260   : > { %v9609_v10 = vpop.f32.mrb[75].mxu1  ;;  %v7265_v22 = vpop.eup %7264  ;;  %7284 = vrcp.f32 %v4762_v21  ;;  %v4768_v8 = vadd.f32 1.0, %v7263_v26  ;;  %3551 = vmatprep.mubr.bf16.mxu0 %v9107_v53  ;;  %3909 = vmatprep.mubr.bf16.mxu1 %v9107_v53  ;;  %v6547_v21 = vadd.f32 %v2850_v13, %v9574_v39  ;;  %v6548_v13 = vadd.f32 %v2854_v46, %v9564_v54 }
 0x261   : > { %v7267_v58 = vpop.eup %7266  ;;  %7286 = vrcp.f32 %v4766_v9  ;;  %v4767_v20 = vadd.f32 1.0, %v7265_v22  ;;  %v6611_v22 = vadd.f32 %v3236_v30, %v9578_v49  ;;  %v6551_v43 = vadd.f32 %v9607_v23, %v9574_v39 }
 0x262   : > { %v7269_v62 = vpop.eup %7268  ;;  %7288 = vrcp.f32 %v4768_v8  ;;  %v4769_v56 = vadd.f32 1.0, %v7267_v58  ;;  %v9618_v26 = vpop.f32.mrb[76].mxu0  ;;  %v6104_v46 = vmul.f32 -1.442695, %v6547_v21  ;;  %v6110_v21 = vmul.f32 -1.442695, %v6548_v13 }
 0x263   : > { %v7271_v51 = vpop.eup %7270  ;;  %7290 = vrcp.f32 %v4767_v20  ;;  %v4773_v57 = vadd.f32 1.0, %v7269_v62  ;;  %v9621_v25 = vpop.f32.mrb[76].mxu1  ;;  %v6117_v23 = vmul.f32 -1.442695, %v6550_v0 }
 0x264   : > { %v7273_v55 = vpop.eup %7272  ;;  %7292 = vrcp.f32 %v4769_v56  ;;  %v4775_v9 = vadd.f32 1.0, %v7271_v51  ;;  %v9623_v53 = vpop.f32.mrb[77].mxu0  ;;  %v6105_v56 = vmul.f32 -1.442695, %v6610_v17  ;;  %v6612_v51 = vadd.f32 %v3240_v2, %v9568_v5 }
 0x265   : > { %v7275_v8 = vpop.eup %7274  ;;  %7294 = vrcp.f32 %v4773_v57  ;;  %v4774_v35 = vadd.f32 1.0, %v7273_v55  ;;  %v9631_v58 = vpop.f32.mrb[77].mxu1  ;;  %v6106_v17 = vmul.f32 -1.442695, %v6611_v22  ;;  %v6613_v2 = vadd.f32 %v9601_v18, %v9578_v49 }
 0x266   : > { %v9633_v20 = vpop.f32.mrb[78].mxu0  ;;  %v7277_v30 = vpop.eup %7276  ;;  %7296 = vrcp.f32 %v4775_v9  ;;  %v4776_v62 = vadd.f32 1.0, %v7275_v8  ;;  %v10962_v9 = vld [vmem:[#allocation29_spill] sm:$0xff]  ;;  %v6112_v18 = vmul.f32 -1.442695, %v6612_v51 }
 0x267   : > { %v9636_v61 = vpop.f32.mrb[78].mxu1  ;;  %v9638_v59 = vpop.f32.mrb[79].mxu0  ;;  %7298 = vrcp.f32 %v4774_v35  ;;  %v4780_v55 = vadd.f32 1.0, %v7277_v30  ;;  %3552 = vmatmul.mubr.bf16.gmra.mrb[184].mxu0 %v10962_v9  ;;  %3910 = vmatmul.mubr.bf16.gmra.mrb[184].mxu1 %v10962_v9  ;;  %v6614_v35 = vadd.f32 %v9605_v34, %v9568_v5  ;;  %v6615_v34 = vadd.f32 %v9609_v10, %v9578_v49 }
 0x268   : > { %v7279_v57 = vpop.eup %7278  ;;  %v9641_v28 = vpop.f32.mrb[79].mxu1  ;;  %7300 = vrcp.f32 %v4776_v62  ;;  %3561 = vmatprep.mubr.bf16.mxu0 %v9127_v32  ;;  %3917 = vmatprep.mubr.bf16.mxu1 %v9127_v32  ;;  %v6616_v9 = vadd.f32 %v9621_v25, %v9568_v5 }
 0x269   : > { %v7281_v27 = vpop.eup %7280  ;;  %5431 = vst [vmem:[%s9628_s17] sm:$0xff] %v7279_v57  ;;  %7302 = vrcp.f32 %v4780_v55  ;;  %v6552_v55 = vadd.f32 %v9618_v26, %v9564_v54  ;;  %v6119_v10 = vmul.f32 -1.442695, %v6614_v35  ;;  %v6118_v26 = vmul.f32 -1.442695, %v6551_v43 }
 0x26a   : > { %v7283_v8 = vpop.eup %7282  ;;  %5433 = vst [vmem:[%s9628_s17 + $0x10] sm:$0xff] %v7281_v27  ;;  %7304 = vpow2.f32 %v6105_v56  ;;  %v6111_v27 = vmul.f32 -1.442695, %v6549_v1  ;;  %v9659_v13 = vpop.f32.mrb[80].mxu0  ;;  %v6113_v56 = vmul.f32 -1.442695, %v6613_v2 }
 0x26b   : > { %v7285_v22 = vpop.eup %7284  ;;  %5432 = vst [vmem:[%s9628_s17 + $0x8] sm:$0xff] %v7283_v8  ;;  %7306 = vpow2.f32 %v6104_v46  ;;  %v9661_v62 = vpop.f32.mrb[80].mxu1  ;;  %v6124_v25 = vmul.f32 -1.442695, %v6552_v55 }
 0x26c   : > { %v7287_v30 = vpop.eup %7286  ;;  %5434 = vst [vmem:[%s9628_s17 + $0x18] sm:$0xff] %v7285_v22  ;;  %7308 = vpow2.f32 %v6106_v17  ;;  %v9666_v51 = vpop.f32.mrb[81].mxu0 }
 0x26d   : > { %v7289_v32 = vpop.eup %7288  ;;  %5439 = vst [vmem:[%s9628_s17 + $0x38] sm:$0xff] %v7287_v30  ;;  %v9668_v57 = vpop.f32.mrb[81].mxu1  ;;  %7310 = vpow2.f32 %v6110_v21  ;;  %v6120_v30 = vmul.f32 -1.442695, %v6615_v34 }
 0x26e   : > { %v7291_v1 = vpop.eup %7290  ;;  %5441 = vst [vmem:[%s9628_s17 + $0x48] sm:$0xff] %v7289_v32  ;;  %v9673_v46 = vpop.f32.mrb[82].mxu0  ;;  %7312 = vpow2.f32 %v6112_v18 }
 0x26f   : > { %v9675_v17 = vpop.f32.mrb[82].mxu1  ;;  %v7293_v2 = vpop.eup %7292  ;;  %5440 = vst [vmem:[%s9628_s17 + $0x40] sm:$0xff] %v7291_v1  ;;  %7314 = vpow2.f32 %v6111_v27  ;;  %3562 = vmatmul.mubr.bf16.gmra.mrb[188].mxu0 %v9125_v6  ;;  %3918 = vmatmul.mubr.bf16.gmra.mrb[188].mxu1 %v9125_v6  ;;  %v6126_v27 = vmul.f32 -1.442695, %v6616_v9 }
 0x270   : > { %v9680_v8 = vpop.f32.mrb[83].mxu0  ;;  %v9682_v21 = vpop.f32.mrb[83].mxu1  ;;  %5442 = vst [vmem:[%s9628_s17 + $0x50] sm:$0xff] %v7293_v2  ;;  %7316 = vpow2.f32 %v6113_v56  ;;  %6050 = vmatprep.mubr.msk.bf16.mxu0 %vm2536_vm3, %v8658_v38  ;;  %6066 = vmatprep.mubr.msk.bf16.mxu1 %vm2536_vm3, %v8658_v38 }
 0x271   : > { %v7295_v0 = vpop.eup %7294  ;;  %7318 = vpow2.f32 %v6117_v23 }
 0x272   : > { %v7297_v22 = vpop.eup %7296  ;;  %5446 = vst [vmem:[%s9628_s17 + $0x70] sm:$0xff] %v7295_v0  ;;  %7320 = vpow2.f32 %v6119_v10  ;;  %v9695_v32 = vpop.f32.mrb[84].mxu0 }
 0x273   : > { %v7299_v18 = vpop.eup %7298  ;;  %5448 = vst [vmem:[%s9628_s17 + $0x80] sm:$0xff] %v7297_v22  ;;  %7322 = vpow2.f32 %v6118_v26  ;;  %v9697_v6 = vpop.f32.mrb[84].mxu1 }
 0x274   : > { %v7301_v35 = vpop.eup %7300  ;;  %5447 = vst [vmem:[%s9628_s17 + $0x78] sm:$0xff] %v7299_v18  ;;  %7324 = vpow2.f32 %v6120_v30  ;;  %v9700_v34 = vpop.f32.mrb[85].mxu0 }
 0x275   : > { %v7303_v43 = vpop.eup %7302  ;;  %5449 = vst [vmem:[%s9628_s17 + $0x88] sm:$0xff] %v7301_v35  ;;  %v9702_v1 = vpop.f32.mrb[85].mxu1  ;;  %7326 = vpow2.f32 %v6124_v25 }
 0x276   : > { %v7305_v56 = vpop.eup %7304  ;;  %5453 = vst [vmem:[%s9628_s17 + $0xa8] sm:$0xff] %v7303_v43  ;;  %v9704_v55 = vpop.f32.mrb[86].mxu0  ;;  %7328 = vpow2.f32 %v6126_v27 }
 0x277   : > { %v7307_v23 = vpop.eup %7306  ;;  %v4782_v38 = vadd.f32 1.0, %v7305_v56  ;;  %v9706_v2 = vpop.f32.mrb[86].mxu1  ;;  %3605 = vmatmul.mubr.bf16.vlgmr.msra.gmra.mrb[128].mxu0 %v8652_v33  ;;  %3959 = vmatmul.mubr.bf16.vlgmr.msra.gmra.mrb[192].mxu1 %v8652_v33 }
 0x278   : > { %v7309_v10 = vpop.eup %7308  ;;  %v4781_v9 = vadd.f32 1.0, %v7307_v23  ;;  %v9708_v0 = vpop.f32.mrb[87].mxu0  ;;  %6051 = vmatprep.mubr.msk.bf16.mxu0 %vm2536_vm3, %v8702_v19  ;;  %6067 = vmatprep.mubr.msk.bf16.mxu1 %vm2536_vm3, %v8702_v19 }
 0x279   : > { %v7311_v26 = vpop.eup %7310  ;;  %7330 = vrcp.f32 %v4782_v38  ;;  %v4783_v22 = vadd.f32 1.0, %v7309_v10  ;;  %v9710_v30 = vpop.f32.mrb[87].mxu1 }
 0x27a   : > { %v7313_v18 = vpop.eup %7312  ;;  %7332 = vrcp.f32 %v4781_v9  ;;  %v4787_v35 = vadd.f32 1.0, %v7311_v26  ;;  %v9718_v10 = vpop.f32.mrb[88].mxu0  ;;  %v6553_v26 = vadd.f32 %v9623_v53, %v9574_v39  ;;  %v6554_v53 = vadd.f32 %v9633_v20, %v9564_v54 }
 0x27b   : > { %v7315_v25 = vpop.eup %7314  ;;  %7334 = vrcp.f32 %v4783_v22  ;;  %v4789_v43 = vadd.f32 1.0, %v7313_v18  ;;  %v9722_v22 = vpop.f32.mrb[88].mxu1  ;;  %v6555_v20 = vadd.f32 %v9638_v59, %v9574_v39 }
 0x27c   : > { %v7317_v27 = vpop.eup %7316  ;;  %7336 = vrcp.f32 %v4787_v35  ;;  %v4788_v56 = vadd.f32 1.0, %v7315_v25  ;;  %v9724_v18 = vpop.f32.mrb[89].mxu0  ;;  %v6617_v35 = vadd.f32 %v9631_v58, %v9578_v49  ;;  %v6618_v58 = vadd.f32 %v9636_v61, %v9568_v5 }
 0x27d   : > { %v7319_v23 = vpop.eup %7318  ;;  %7338 = vrcp.f32 %v4789_v43  ;;  %v4790_v38 = vadd.f32 1.0, %v7317_v27  ;;  %v9728_v25 = vpop.f32.mrb[89].mxu1  ;;  %v6619_v61 = vadd.f32 %v9641_v28, %v9578_v49  ;;  %v6131_v59 = vmul.f32 -1.442695, %v6554_v53 }
 0x27e   : > { %v7321_v9 = vpop.eup %7320  ;;  %7340 = vrcp.f32 %v4788_v56  ;;  %v4794_v33 = vadd.f32 1.0, %v7319_v23  ;;  %v9730_v43 = vpop.f32.mrb[90].mxu0  ;;  %v6127_v15 = vmul.f32 -1.442695, %v6617_v35  ;;  %v6620_v28 = vadd.f32 %v9661_v62, %v9568_v5 }
 0x27f   : > { %v7323_v3 = vpop.eup %7322  ;;  %7342 = vrcp.f32 %v4790_v38  ;;  %v4796_v19 = vadd.f32 1.0, %v7321_v9  ;;  %v9734_v23 = vpop.f32.mrb[90].mxu1  ;;  %3615 = vmatmul.mubr.bf16.gmra.mrb[132].mxu0 %v8696_v14  ;;  %3967 = vmatmul.mubr.bf16.gmra.mrb[196].mxu1 %v8696_v14  ;;  %v6556_v14 = vadd.f32 %v9659_v13, %v9564_v54  ;;  %v6132_v53 = vmul.f32 -1.442695, %v6555_v20 }
 0x280   : > { %v7325_v27 = vpop.eup %7324  ;;  %7344 = vrcp.f32 %v4794_v33  ;;  %v4795_v56 = vadd.f32 1.0, %v7323_v3  ;;  %v9736_v7 = vpop.f32.mrb[91].mxu0  ;;  %v6125_v3 = vmul.f32 -1.442695, %v6553_v26  ;;  %6052 = vmatprep.mubr.msk.bf16.mxu0 %vm2536_vm3, %v8746_v4  ;;  %6068 = vmatprep.mubr.msk.bf16.mxu1 %vm2536_vm3, %v8746_v4  ;;  %v6133_v26 = vmul.f32 -1.442695, %v6618_v58 }
 0x281   : > { %v7327_v52 = vpop.eup %7326  ;;  %7346 = vrcp.f32 %v4796_v19  ;;  %v4797_v38 = vadd.f32 1.0, %v7325_v27  ;;  %v9740_v9 = vpop.f32.mrb[91].mxu1  ;;  %v6557_v13 = vadd.f32 %v9666_v51, %v9574_v39  ;;  %v6134_v62 = vmul.f32 -1.442695, %v6619_v61 }
 0x282   : > { %v7329_v40 = vpop.eup %7328  ;;  %7348 = vrcp.f32 %v4795_v56  ;;  %v4801_v33 = vadd.f32 1.0, %v7327_v52  ;;  %v9758_v35 = vpop.f32.mrb[92].mxu0  ;;  %v6138_v51 = vmul.f32 -1.442695, %v6556_v14 }
 0x283   : > { %v7331_v19 = vpop.eup %7330  ;;  %7350 = vrcp.f32 %v4797_v38  ;;  %v4803_v27 = vadd.f32 1.0, %v7329_v40  ;;  %v9760_v56 = vpop.f32.mrb[92].mxu1 }
 0x284   : > { %v7333_v52 = vpop.eup %7332  ;;  %5455 = vst [vmem:[%s9628_s17 + $0xb8] sm:$0xff] %v7331_v19  ;;  %7352 = vrcp.f32 %v4801_v33  ;;  %v9765_v38 = vpop.f32.mrb[93].mxu0  ;;  %v6621_v19 = vadd.f32 %v9668_v57, %v9578_v49  ;;  %v6140_v57 = vmul.f32 -1.442695, %v6620_v28 }
 0x285   : > { %v7335_v40 = vpop.eup %7334  ;;  %5454 = vst [vmem:[%s9628_s17 + $0xb0] sm:$0xff] %v7333_v52  ;;  %7354 = vrcp.f32 %v4803_v27  ;;  %v9767_v33 = vpop.f32.mrb[93].mxu1  ;;  %v6558_v52 = vadd.f32 %v9673_v46, %v9564_v54  ;;  %v6559_v46 = vadd.f32 %v9680_v8, %v9574_v39 }
 0x286   : > { %v7337_v4 = vpop.eup %7336  ;;  %5456 = vst [vmem:[%s9628_s17 + $0xc0] sm:$0xff] %v7335_v40  ;;  %7356 = vpow2.f32 %v6125_v3  ;;  %v9772_v27 = vpop.f32.mrb[94].mxu0 }
 0x287   : > { %v7339_v58 = vpop.eup %7338  ;;  %5460 = vst [vmem:[%s9628_s17 + $0xe0] sm:$0xff] %v7337_v4  ;;  %7358 = vpow2.f32 %v6127_v15  ;;  %v9774_v3 = vpop.f32.mrb[94].mxu1  ;;  %v6622_v4 = vadd.f32 %v9675_v17, %v9568_v5  ;;  %3625 = vmatmul.mubr.bf16.gmra.mrb[136].mxu0 %v8740_v60  ;;  %3975 = vmatmul.mubr.bf16.gmra.mrb[200].mxu1 %v8740_v60  ;;  %v6145_v8 = vmul.f32 -1.442695, %v6558_v52 }
 0x288   : > { %v7341_v20 = vpop.eup %7340  ;;  %5462 = vst [vmem:[%s9628_s17 + $0xf0] sm:$0xff] %v7339_v58  ;;  %7360 = vpow2.f32 %v6131_v59  ;;  %v9779_v40 = vpop.f32.mrb[95].mxu0  ;;  %v6139_v59 = vmul.f32 -1.442695, %v6557_v13  ;;  %6053 = vmatprep.mubr.msk.bf16.mxu0 %vm2536_vm3, %v8790_v50  ;;  %6069 = vmatprep.mubr.msk.bf16.mxu1 %vm2536_vm3, %v8790_v50  ;;  %v6146_v58 = vmul.f32 -1.442695, %v6559_v46 }
 0x289   : > { %v9781_v15 = vpop.f32.mrb[95].mxu1  ;;  %v7343_v61 = vpop.eup %7342  ;;  %5461 = vst [vmem:[%s9628_s17 + $0xe8] sm:$0xff] %v7341_v20  ;;  %7362 = vpow2.f32 %v6133_v26  ;;  %v6141_v26 = vmul.f32 -1.442695, %v6621_v19  ;;  %v6147_v60 = vmul.f32 -1.442695, %v6622_v4 }
 0x28a   : > { %v7345_v41 = vpop.eup %7344  ;;  %5463 = vst [vmem:[%s9628_s17 + $0xf8] sm:$0xff] %v7343_v61  ;;  %7364 = vpow2.f32 %v6132_v53  ;;  %v9800_v53 = vpop.f32.mrb[96].mxu1 }
 0x28b   : > { %v7347_v14 = vpop.eup %7346  ;;  %5467 = vst [vmem:[%s9628_s17 + $0x118] sm:$0xff] %v7345_v41  ;;  %7366 = vpow2.f32 %v6134_v62  ;;  %v9798_v41 = vpop.f32.mrb[96].mxu0 }
 0x28c   : > { %v7349_v17 = vpop.eup %7348  ;;  %5469 = vst [vmem:[%s9628_s17 + $0x128] sm:$0xff] %v7347_v14  ;;  %7368 = vpow2.f32 %v6138_v51  ;;  %v9803_v62 = vpop.f32.mrb[97].mxu0 }
 0x28d   : > { %v7351_v28 = vpop.eup %7350  ;;  %5468 = vst [vmem:[%s9628_s17 + $0x120] sm:$0xff] %v7349_v17  ;;  %7370 = vpow2.f32 %v6140_v57  ;;  %v9805_v50 = vpop.f32.mrb[97].mxu1 }
 0x28e   : > { %v7353_v13 = vpop.eup %7352  ;;  %5470 = vst [vmem:[%s9628_s17 + $0x130] sm:$0xff] %v7351_v28  ;;  %7372 = vpow2.f32 %v6139_v59  ;;  %v9808_v20 = vpop.f32.mrb[98].mxu0 }
 0x28f   : > { %v7355_v19 = vpop.eup %7354  ;;  %5474 = vst [vmem:[%s9628_s17 + $0x150] sm:$0xff] %v7353_v13  ;;  %7374 = vpow2.f32 %v6141_v26  ;;  %v9810_v51 = vpop.f32.mrb[98].mxu1  ;;  %3635 = vmatmul.mubr.bf16.gmra.mrb[140].mxu0 %v8784_v44  ;;  %3983 = vmatmul.mubr.bf16.gmra.mrb[204].mxu1 %v8784_v44 }
 0x290   : > { %v7357_v52 = vpop.eup %7356  ;;  %5476 = vst [vmem:[%s9628_s17 + $0x160] sm:$0xff] %v7355_v19  ;;  %7376 = vpow2.f32 %v6145_v8  ;;  %v9813_v61 = vpop.f32.mrb[99].mxu0  ;;  %6054 = vmatprep.mubr.msk.bf16.mxu0 %vm2536_vm3, %v8834_v45  ;;  %6070 = vmatprep.mubr.msk.bf16.mxu1 %vm2536_vm3, %v8834_v45 }
 0x291   : > { %v9815_v57 = vpop.f32.mrb[99].mxu1  ;;  %v7359_v4 = vpop.eup %7358  ;;  %v4802_v59 = vadd.f32 1.0, %v7357_v52  ;;  %7378 = vpow2.f32 %v6147_v60 }
 0x292   : > { %10963 = vst [vmem:[#allocation3_spill] sm:$0xff] %v9815_v57  ;;  %v7361_v46 = vpop.eup %7360  ;;  %v4804_v14 = vadd.f32 1.0, %v7359_v4  ;;  %7380 = vpow2.f32 %v6146_v58  ;;  %v9823_v58 = vpop.f32.mrb[100].mxu0 }
 0x293   : > { %v7363_v26 = vpop.eup %7362  ;;  %7382 = vrcp.f32 %v4802_v59  ;;  %v4808_v17 = vadd.f32 1.0, %v7361_v46  ;;  %v9825_v52 = vpop.f32.mrb[100].mxu1 }
 0x294   : > { %v7365_v8 = vpop.eup %7364  ;;  %7384 = vrcp.f32 %v4804_v14  ;;  %v4810_v28 = vadd.f32 1.0, %v7363_v26  ;;  %v9827_v4 = vpop.f32.mrb[101].mxu0 }
 0x295   : > { %v7367_v60 = vpop.eup %7366  ;;  %7386 = vrcp.f32 %v4808_v17  ;;  %v4809_v13 = vadd.f32 1.0, %v7365_v8  ;;  %10964 = vst [vmem:[#allocation5_spill] sm:$0xff] %v9827_v4  ;;  %v9829_v57 = vpop.f32.mrb[101].mxu1  ;;  %v6623_v17 = vadd.f32 %v9682_v21, %v9578_v49 }
 0x296   : > { %v7369_v19 = vpop.eup %7368  ;;  %7388 = vrcp.f32 %v4810_v28  ;;  %v4811_v44 = vadd.f32 1.0, %v7367_v60  ;;  %10965 = vst [vmem:[#allocation4_spill] sm:$0xff] %v9829_v57  ;;  %v9831_v45 = vpop.f32.mrb[102].mxu0 }
 0x297   : > { %v7371_v59 = vpop.eup %7370  ;;  %7390 = vrcp.f32 %v4809_v13  ;;  %v4815_v46 = vadd.f32 1.0, %v7369_v19  ;;  %10966 = vst [vmem:[#allocation7_spill] sm:$0xff] %v9831_v45  ;;  %v9835_v8 = vpop.f32.mrb[102].mxu1  ;;  %v6560_v13 = vadd.f32 %v9695_v32, %v9564_v54  ;;  %3645 = vmatmul.mubr.bf16.gmra.mrb[144].mxu0 %v8828_v37  ;;  %3991 = vmatmul.mubr.bf16.gmra.mrb[208].mxu1 %v8828_v37  ;;  %v6625_v37 = vadd.f32 %v9702_v1, %v9578_v49 }
 0x298   : > { %v7373_v14 = vpop.eup %7372  ;;  %7392 = vrcp.f32 %v4811_v44  ;;  %v4817_v26 = vadd.f32 1.0, %v7371_v59  ;;  %v9837_v28 = vpop.f32.mrb[103].mxu0  ;;  %v6624_v44 = vadd.f32 %v9697_v6, %v9568_v5  ;;  %6055 = vmatprep.mubr.msk.bf16.mxu0 %vm2536_vm3, %v8878_v47  ;;  %6071 = vmatprep.mubr.msk.bf16.mxu1 %vm2536_vm3, %v8878_v47 }
 0x299   : > { %v7375_v60 = vpop.eup %7374  ;;  %7394 = vrcp.f32 %v4815_v46  ;;  %v4816_v4 = vadd.f32 1.0, %v7373_v14  ;;  %v9841_v19 = vpop.f32.mrb[103].mxu1  ;;  %v6561_v46 = vadd.f32 %v9700_v34, %v9574_v39  ;;  %v6148_v14 = vmul.f32 -1.442695, %v6623_v17 }
 0x29a   : > { %10967 = vst [vmem:[#allocation6_spill] sm:$0xff] %v9841_v19  ;;  %v7377_v57 = vpop.eup %7376  ;;  %7396 = vrcp.f32 %v4817_v26  ;;  %v4818_v45 = vadd.f32 1.0, %v7375_v60  ;;  %v6152_v26 = vmul.f32 -1.442695, %v6560_v13  ;;  %v6562_v34 = vadd.f32 %v9704_v55, %v9564_v54  ;;  %v9857_v60 = vpop.f32.mrb[104].mxu0 }
 0x29b   : > { %v7379_v21 = vpop.eup %7378  ;;  %7398 = vrcp.f32 %v4816_v4  ;;  %v4822_v59 = vadd.f32 1.0, %v7377_v57  ;;  %v6154_v47 = vmul.f32 -1.442695, %v6624_v44  ;;  %v9862_v17 = vpop.f32.mrb[104].mxu1  ;;  %v6153_v13 = vmul.f32 -1.442695, %v6561_v46 }
 0x29c   : > { %v7381_v32 = vpop.eup %7380  ;;  %7400 = vrcp.f32 %v4818_v45  ;;  %v4824_v6 = vadd.f32 1.0, %v7379_v21  ;;  %v6626_v45 = vadd.f32 %v9706_v2, %v9568_v5  ;;  %v9864_v1 = vpop.f32.mrb[105].mxu0  ;;  %v6563_v55 = vadd.f32 %v9708_v0, %v9574_v39 }
 0x29d   : > { %v7383_v4 = vpop.eup %7382  ;;  %7402 = vrcp.f32 %v4822_v59  ;;  %v4823_v57 = vadd.f32 1.0, %v7381_v32  ;;  %v9869_v59 = vpop.f32.mrb[105].mxu1  ;;  %v6155_v2 = vmul.f32 -1.442695, %v6625_v37  ;;  %v6159_v0 = vmul.f32 -1.442695, %v6562_v34 }
 0x29e   : > { %v7385_v19 = vpop.eup %7384  ;;  %5475 = vst [vmem:[%s9628_s17 + $0x158] sm:$0xff] %v7383_v4  ;;  %7404 = vrcp.f32 %v4824_v6  ;;  %v9871_v32 = vpop.f32.mrb[106].mxu0  ;;  %v6627_v6 = vadd.f32 %v9710_v30, %v9578_v49  ;;  %v6161_v37 = vmul.f32 -1.442695, %v6626_v45  ;;  %v6628_v30 = vadd.f32 %v9722_v22, %v9568_v5 }
 0x29f   : > { %v7387_v21 = vpop.eup %7386  ;;  %5477 = vst [vmem:[%s9628_s17 + $0x168] sm:$0xff] %v7385_v19  ;;  %7406 = vrcp.f32 %v4823_v57  ;;  %10968 = vst [vmem:[#allocation9_spill] sm:$0xff] %v9871_v32  ;;  %v9876_v4 = vpop.f32.mrb[106].mxu1  ;;  %v6564_v57 = vadd.f32 %v9718_v10, %v9564_v54  ;;  %3655 = vmatmul.mubr.bf16.gmra.mrb[148].mxu0 %v8872_v36  ;;  %3999 = vmatmul.mubr.bf16.gmra.mrb[212].mxu1 %v8872_v36  ;;  %v6160_v34 = vmul.f32 -1.442695, %v6563_v55 }
 0x2a0   : > { %v7389_v44 = vpop.eup %7388  ;;  %5481 = vst [vmem:[%s9628_s17 + $0x188] sm:$0xff] %v7387_v21  ;;  %7408 = vpow2.f32 %v6148_v14  ;;  %v9878_v19 = vpop.f32.mrb[107].mxu0  ;;  %v6565_v10 = vadd.f32 %v9724_v18, %v9574_v39  ;;  %6056 = vmatprep.mubr.msk.bf16.mxu0 %vm2536_vm3, %v8925_v63  ;;  %6072 = vmatprep.mubr.msk.bf16.mxu1 %vm2536_vm3, %v8925_v63  ;;  %v6629_v36 = vadd.f32 %v9728_v25, %v9578_v49  ;;  %v6168_v63 = vmul.f32 -1.442695, %v6628_v30 }
 0x2a1   : > { %v7391_v46 = vpop.eup %7390  ;;  %5483 = vst [vmem:[%s9628_s17 + $0x198] sm:$0xff] %v7389_v44  ;;  %7410 = vpow2.f32 %v6152_v26  ;;  %v9883_v32 = vpop.f32.mrb[107].mxu1  ;;  %v6166_v21 = vmul.f32 -1.442695, %v6564_v57 }
 0x2a2   : > { %v7393_v14 = vpop.eup %7392  ;;  %5482 = vst [vmem:[%s9628_s17 + $0x190] sm:$0xff] %v7391_v46  ;;  %7412 = vpow2.f32 %v6154_v47  ;;  %v6162_v47 = vmul.f32 -1.442695, %v6627_v6  ;;  %v9901_v18 = vpop.f32.mrb[108].mxu0  ;;  %v6167_v25 = vmul.f32 -1.442695, %v6565_v10 }
 0x2a3   : > { %v7395_v26 = vpop.eup %7394  ;;  %5484 = vst [vmem:[%s9628_s17 + $0x1a0] sm:$0xff] %v7393_v14  ;;  %7414 = vpow2.f32 %v6153_v13  ;;  %v9903_v13 = vpop.f32.mrb[108].mxu1  ;;  %v6169_v14 = vmul.f32 -1.442695, %v6629_v36 }
 0x2a4   : > { %v7397_v22 = vpop.eup %7396  ;;  %5488 = vst [vmem:[%s9628_s17 + $0x1c0] sm:$0xff] %v7395_v26  ;;  %7416 = vpow2.f32 %v6155_v2  ;;  %v9906_v44 = vpop.f32.mrb[109].mxu0 }
 0x2a5   : > { %v7399_v45 = vpop.eup %7398  ;;  %5490 = vst [vmem:[%s9628_s17 + $0x1d0] sm:$0xff] %v7397_v22  ;;  %7418 = vpow2.f32 %v6159_v0  ;;  %v9908_v2 = vpop.f32.mrb[109].mxu1 }
 0x2a6   : > { %v7401_v55 = vpop.eup %7400  ;;  %5489 = vst [vmem:[%s9628_s17 + $0x1c8] sm:$0xff] %v7399_v45  ;;  %7420 = vpow2.f32 %v6161_v37  ;;  %v9911_v46 = vpop.f32.mrb[110].mxu0 }
 0x2a7   : > { %v7403_v6 = vpop.eup %7402  ;;  %5491 = vst [vmem:[%s9628_s17 + $0x1d8] sm:$0xff] %v7401_v55  ;;  %7422 = vpow2.f32 %v6160_v34  ;;  %v9913_v0 = vpop.f32.mrb[110].mxu1  ;;  %3665 = vmatmul.mubr.bf16.gmra.mrb[152].mxu0 %v8916_v42  ;;  %4007 = vmatmul.mubr.bf16.gmra.mrb[216].mxu1 %v8916_v42 }
 0x2a8   : > { %v7405_v57 = vpop.eup %7404  ;;  %5495 = vst [vmem:[%s9628_s17 + $0x1f8] sm:$0xff] %v7403_v6  ;;  %7424 = vpow2.f32 %v6162_v47  ;;  %v9916_v37 = vpop.f32.mrb[111].mxu0  ;;  %6057 = vmatprep.mubr.msk.bf16.mxu0 %vm2536_vm3, %v8966_v16  ;;  %6073 = vmatprep.mubr.msk.bf16.mxu1 %vm2536_vm3, %v8966_v16 }
 0x2a9   : > { %v9918_v30 = vpop.f32.mrb[111].mxu1  ;;  %v7407_v26 = vpop.eup %7406  ;;  %5497 = vst [vmem:[%s9628_s17 + $0x208] sm:$0xff] %v7405_v57  ;;  %7426 = vpow2.f32 %v6166_v21 }
 0x2aa   : > { %v7409_v22 = vpop.eup %7408  ;;  %5496 = vst [vmem:[%s9628_s17 + $0x200] sm:$0xff] %v7407_v26  ;;  %7428 = vpow2.f32 %v6168_v63  ;;  %v9928_v55 = vpop.f32.mrb[112].mxu0 }
 0x2ab   : > { %v7411_v34 = vpop.eup %7410  ;;  %v4825_v10 = vadd.f32 1.0, %v7409_v22  ;;  %7430 = vpow2.f32 %v6167_v25  ;;  %v9930_v63 = vpop.f32.mrb[112].mxu1 }
 0x2ac   : > { %v7413_v47 = vpop.eup %7412  ;;  %v4829_v36 = vadd.f32 1.0, %v7411_v34  ;;  %7432 = vpow2.f32 %v6169_v14  ;;  %10969 = vst [vmem:[#allocation8_spill] sm:$0xff] %v9930_v63  ;;  %v9932_v25 = vpop.f32.mrb[113].mxu0 }
 0x2ad   : > { %v7415_v45 = vpop.eup %7414  ;;  %7434 = vrcp.f32 %v4825_v10  ;;  %v4831_v21 = vadd.f32 1.0, %v7413_v47  ;;  %10970 = vst [vmem:[#allocation11_spill] sm:$0xff] %v9932_v25  ;;  %v9934_v57 = vpop.f32.mrb[113].mxu1 }
 0x2ae   : > { %v7417_v42 = vpop.eup %7416  ;;  %7436 = vrcp.f32 %v4829_v36  ;;  %v4830_v6 = vadd.f32 1.0, %v7415_v45  ;;  %10971 = vst [vmem:[#allocation10_spill] sm:$0xff] %v9934_v57  ;;  %v9936_v22 = vpop.f32.mrb[114].mxu0 }
 0x2af   : > { %v7419_v26 = vpop.eup %7418  ;;  %7438 = vrcp.f32 %v4831_v21  ;;  %v4832_v16 = vadd.f32 1.0, %v7417_v42  ;;  %v9938_v14 = vpop.f32.mrb[114].mxu1  ;;  %v6566_v21 = vadd.f32 %v9730_v43, %v9564_v54  ;;  %3675 = vmatmul.mubr.bf16.gmra.mrb[156].mxu0 %v8960_v11  ;;  %4015 = vmatmul.mubr.bf16.gmra.mrb[220].mxu1 %v8960_v11  ;;  %v6567_v43 = vadd.f32 %v9736_v7, %v9574_v39 }
 0x2b0   : > { %v7421_v34 = vpop.eup %7420  ;;  %7440 = vrcp.f32 %v4830_v6  ;;  %v4836_v10 = vadd.f32 1.0, %v7419_v26  ;;  %v9940_v47 = vpop.f32.mrb[115].mxu0  ;;  %v6630_v26 = vadd.f32 %v9734_v23, %v9568_v5  ;;  %6058 = vmatprep.mubr.msk.bf16.mxu0 %vm2536_vm3, %v8996_v31  ;;  %6074 = vmatprep.mubr.msk.bf16.mxu1 %vm2536_vm3, %v8996_v31  ;;  %v6568_v31 = vadd.f32 %v9758_v35, %v9564_v54 }
 0x2b1   : > { %v7423_v63 = vpop.eup %7422  ;;  %7442 = vrcp.f32 %v4832_v16  ;;  %v4838_v36 = vadd.f32 1.0, %v7421_v34  ;;  %v9942_v45 = vpop.f32.mrb[115].mxu1  ;;  %v6174_v35 = vmul.f32 -1.442695, %v6567_v43 }
 0x2b2   : > { %10972 = vst [vmem:[#allocation13_spill] sm:$0xff] %v9942_v45  ;;  %v7425_v25 = vpop.eup %7424  ;;  %7444 = vrcp.f32 %v4836_v10  ;;  %v4837_v57 = vadd.f32 1.0, %v7423_v63  ;;  %v9958_v10 = vpop.f32.mrb[116].mxu0  ;;  %v6173_v45 = vmul.f32 -1.442695, %v6566_v21 }
 0x2b3   : > { %v7427_v42 = vpop.eup %7426  ;;  %7446 = vrcp.f32 %v4838_v36  ;;  %v4839_v6 = vadd.f32 1.0, %v7425_v25  ;;  %v6631_v25 = vadd.f32 %v9740_v9, %v9578_v49  ;;  %10973 = vst [vmem:[#allocation12_spill] sm:$0xff] %v9958_v10  ;;  %v6632_v9 = vadd.f32 %v9760_v56, %v9568_v5 }
 0x2b4   : > { %v7429_v63 = vpop.eup %7428  ;;  %7448 = vrcp.f32 %v4837_v57  ;;  %v4843_v16 = vadd.f32 1.0, %v7427_v42  ;;  %v9962_v57 = vpop.f32.mrb[116].mxu1  ;;  %v6180_v43 = vmul.f32 -1.442695, %v6568_v31 }
 0x2b5   : > { %v7431_v34 = vpop.eup %7430  ;;  %7450 = vrcp.f32 %v4839_v6  ;;  %v4845_v11 = vadd.f32 1.0, %v7429_v63  ;;  %v9964_v42 = vpop.f32.mrb[117].mxu0  ;;  %v6175_v63 = vmul.f32 -1.442695, %v6630_v26  ;;  %v6176_v56 = vmul.f32 -1.442695, %v6631_v25 }
 0x2b6   : > { %v7433_v23 = vpop.eup %7432  ;;  %7452 = vrcp.f32 %v4843_v16  ;;  %v4844_v36 = vadd.f32 1.0, %v7431_v34  ;;  %10974 = vst [vmem:[#allocation15_spill] sm:$0xff] %v9964_v42  ;;  %v9968_v10 = vpop.f32.mrb[117].mxu1  ;;  %v6569_v34 = vadd.f32 %v9765_v38, %v9574_v39  ;;  %v6570_v38 = vadd.f32 %v9772_v27, %v9564_v54 }
 0x2b7   : > { %v7435_v7 = vpop.eup %7434  ;;  %7454 = vrcp.f32 %v4845_v11  ;;  %v4846_v6 = vadd.f32 1.0, %v7433_v23  ;;  %v9970_v16 = vpop.f32.mrb[118].mxu0  ;;  %v6633_v23 = vadd.f32 %v9767_v33, %v9578_v49  ;;  %3685 = vmatmul.mubr.bf16.gmra.mrb[160].mxu0 %v8990_v24  ;;  %4023 = vmatmul.mubr.bf16.gmra.mrb[224].mxu1 %v8990_v24  ;;  %v6182_v25 = vmul.f32 -1.442695, %v6632_v9 }
 0x2b8   : > { %10975 = vst [vmem:[#allocation14_spill] sm:$0xff] %v9970_v16  ;;  %v7437_v21 = vpop.eup %7436  ;;  %5498 = vst [vmem:[%s9628_s17 + $0x210] sm:$0xff] %v7435_v7  ;;  %7456 = vrcp.f32 %v4844_v36  ;;  %v9975_v42 = vpop.f32.mrb[118].mxu1  ;;  %v6634_v33 = vadd.f32 %v9774_v3, %v9568_v5  ;;  %6059 = vmatprep.mubr.msk.bf16.mxu0 %vm2536_vm3, %v9016_v48  ;;  %6075 = vmatprep.mubr.msk.bf16.mxu1 %vm2536_vm3, %v9016_v48  ;;  %v6571_v24 = vadd.f32 %v9779_v40, %v9574_v39 }
 0x2b9   : > { %v9977_v11 = vpop.f32.mrb[119].mxu0  ;;  %v7439_v26 = vpop.eup %7438  ;;  %5502 = vst [vmem:[%s9628_s17 + $0x230] sm:$0xff] %v7437_v21  ;;  %7458 = vrcp.f32 %v4846_v6  ;;  %v6183_v6 = vmul.f32 -1.442695, %v6633_v23  ;;  %v6635_v3 = vadd.f32 %v9781_v15, %v9578_v49  ;;  %v6187_v21 = vmul.f32 -1.442695, %v6570_v38 }
 0x2ba   : > { %v9982_v16 = vpop.f32.mrb[119].mxu1  ;;  %v7441_v36 = vpop.eup %7440  ;;  %5504 = vst [vmem:[%s9628_s17 + $0x240] sm:$0xff] %v7439_v26  ;;  %7460 = vpow2.f32 %v6173_v45  ;;  %v6181_v45 = vmul.f32 -1.442695, %v6569_v34  ;;  %v6572_v40 = vadd.f32 %v9798_v41, %v9564_v54  ;;  %v6189_v15 = vmul.f32 -1.442695, %v6634_v33 }
 0x2bb   : > { %v7443_v7 = vpop.eup %7442  ;;  %5503 = vst [vmem:[%s9628_s17 + $0x238] sm:$0xff] %v7441_v36  ;;  %7462 = vpow2.f32 %v6175_v63  ;;  %v10002_v63 = vpop.f32.mrb[120].mxu0 }
 0x2bc   : > { %v7445_v27 = vpop.eup %7444  ;;  %5505 = vst [vmem:[%s9628_s17 + $0x248] sm:$0xff] %v7443_v7  ;;  %7464 = vpow2.f32 %v6174_v35  ;;  %v10004_v9 = vpop.f32.mrb[120].mxu1  ;;  %v6194_v33 = vmul.f32 -1.442695, %v6572_v40 }
 0x2bd   : > { %v7447_v31 = vpop.eup %7446  ;;  %5509 = vst [vmem:[%s9628_s17 + $0x268] sm:$0xff] %v7445_v27  ;;  %7466 = vpow2.f32 %v6176_v56  ;;  %v10009_v35 = vpop.f32.mrb[121].mxu0  ;;  %v6190_v27 = vmul.f32 -1.442695, %v6635_v3 }
 0x2be   : > { %v7449_v48 = vpop.eup %7448  ;;  %5511 = vst [vmem:[%s9628_s17 + $0x278] sm:$0xff] %v7447_v31  ;;  %7468 = vpow2.f32 %v6180_v43  ;;  %v10011_v34 = vpop.f32.mrb[121].mxu1  ;;  %v6188_v43 = vmul.f32 -1.442695, %v6571_v24 }
 0x2bf   : > { %v7451_v26 = vpop.eup %7450  ;;  %5510 = vst [vmem:[%s9628_s17 + $0x270] sm:$0xff] %v7449_v48  ;;  %7470 = vpow2.f32 %v6182_v25  ;;  %v10014_v56 = vpop.f32.mrb[122].mxu0  ;;  %3695 = vmatmul.mubr.bf16.gmra.mrb[164].mxu0 %v9010_v29  ;;  %4031 = vmatmul.mubr.bf16.gmra.mrb[228].mxu1 %v9010_v29 }
 0x2c0   : > { %v10016_v23 = vpop.f32.mrb[122].mxu1  ;;  %v7453_v36 = vpop.eup %7452  ;;  %5512 = vst [vmem:[%s9628_s17 + $0x280] sm:$0xff] %v7451_v26  ;;  %7472 = vpow2.f32 %v6181_v45  ;;  %6060 = vmatprep.mubr.msk.bf16.mxu0 %vm2536_vm3, %v9036_v12  ;;  %6076 = vmatprep.mubr.msk.bf16.mxu1 %vm2536_vm3, %v9036_v12 }
 0x2c1   : > { %v10019_v41 = vpop.f32.mrb[123].mxu0  ;;  %v10021_v38 = vpop.f32.mrb[123].mxu1  ;;  %5516 = vst [vmem:[%s9628_s17 + $0x2a0] sm:$0xff] %v7453_v36  ;;  %7474 = vpow2.f32 %v6183_v6 }
 0x2c2   : > { %v7455_v7 = vpop.eup %7454  ;;  %7476 = vpow2.f32 %v6187_v21  ;;  %v10033_v3 = vpop.f32.mrb[124].mxu0 }
 0x2c3   : > { %v7457_v25 = vpop.eup %7456  ;;  %5518 = vst [vmem:[%s9628_s17 + $0x2b0] sm:$0xff] %v7455_v7  ;;  %7478 = vpow2.f32 %v6189_v15  ;;  %v10035_v48 = vpop.f32.mrb[124].mxu1 }
 0x2c4   : > { %v7459_v31 = vpop.eup %7458  ;;  %5517 = vst [vmem:[%s9628_s17 + $0x2a8] sm:$0xff] %v7457_v25  ;;  %7480 = vpow2.f32 %v6188_v43  ;;  %10976 = vst [vmem:[#allocation18_spill] sm:$0xff] %v10035_v48  ;;  %v10037_v40 = vpop.f32.mrb[125].mxu0 }
 0x2c5   : > { %v7461_v45 = vpop.eup %7460  ;;  %5519 = vst [vmem:[%s9628_s17 + $0x2b8] sm:$0xff] %v7459_v31  ;;  %7482 = vpow2.f32 %v6190_v27  ;;  %10977 = vst [vmem:[#allocation17_spill] sm:$0xff] %v10037_v40  ;;  %v10039_v26 = vpop.f32.mrb[125].mxu1 }
 0x2c6   : > { %v7463_v24 = vpop.eup %7462  ;;  %v4850_v6 = vadd.f32 1.0, %v7461_v45  ;;  %7484 = vpow2.f32 %v6194_v33  ;;  %10978 = vst [vmem:[#allocation22_spill] sm:$0xff] %v10039_v26  ;;  %v10041_v36 = vpop.f32.mrb[126].mxu0 }
 0x2c7   : > { %v7465_v29 = vpop.eup %7464  ;;  %v4852_v21 = vadd.f32 1.0, %v7463_v24  ;;  %10979 = vst [vmem:[#allocation21_spill] sm:$0xff] %v10041_v36  ;;  %v10043_v43 = vpop.f32.mrb[126].mxu1 }
 0x2c8   : > { %v7467_v15 = vpop.eup %7466  ;;  %7486 = vrcp.f32 %v4850_v6  ;;  %v4851_v12 = vadd.f32 1.0, %v7465_v29  ;;  %10980 = vst [vmem:[#allocation26_spill] sm:$0xff] %v10043_v43  ;;  %v10045_v25 = vpop.f32.mrb[127].mxu0  ;;  %v6636_v6 = vadd.f32 %v9800_v53, %v9568_v5  ;;  %v10983_v29 = vld [vmem:[#allocation16_spill] sm:$0xff] }
 0x2c9   : > { %v7469_v7 = vpop.eup %7468  ;;  %7488 = vrcp.f32 %v4852_v21  ;;  %v4853_v27 = vadd.f32 1.0, %v7467_v15  ;;  %10981 = vst [vmem:[#allocation25_spill] sm:$0xff] %v10045_v25  ;;  %v10047_v33 = vpop.f32.mrb[127].mxu1  ;;  %3705 = vmatmul.mubr.bf16.gmra.mrb[168].mxu0 %v10983_v29  ;;  %4039 = vmatmul.mubr.bf16.gmra.mrb[232].mxu1 %v10983_v29  ;;  %v10984_v15 = vld [vmem:[#allocation20_spill] sm:$0xff]  ;;  %v6637_v25 = vadd.f32 %v9805_v50, %v9578_v49 }
 0x2ca   : > { %v7471_v31 = vpop.eup %7470  ;;  %7490 = vrcp.f32 %v4851_v12  ;;  %v4857_v45 = vadd.f32 1.0, %v7469_v7  ;;  %10982 = vst [vmem:[#allocation29_spill] sm:$0xff] %v10047_v33  ;;  %6061 = vmatprep.mubr.msk.bf16.mxu0 %vm2536_vm3, %v10984_v15  ;;  %6077 = vmatprep.mubr.msk.bf16.mxu1 %vm2536_vm3, %v10984_v15  ;;  %v6324_v33 = vpop.f32.mrb[128].mxu1 }
 0x2cb   : > { %v7473_v24 = vpop.eup %7472  ;;  %7492 = vrcp.f32 %v4853_v27  ;;  %v4859_v26 = vadd.f32 1.0, %v7471_v31  ;;  %v6573_v27 = vadd.f32 %v9803_v62, %v9574_v39  ;;  %v6325_v36 = vpop.f32.mrb[129].mxu1 }
 0x2cc   : > { %v7475_v43 = vpop.eup %7474  ;;  %7494 = vrcp.f32 %v4857_v45  ;;  %v4858_v21 = vadd.f32 1.0, %v7473_v24  ;;  %v6196_v24 = vmul.f32 -1.442695, %v6636_v6  ;;  %v10063_v62 = vadd.f32 %v6325_v36, %v6324_v33 }
 0x2cd   : > { %v7477_v12 = vpop.eup %7476  ;;  %7496 = vrcp.f32 %v4859_v26  ;;  %v4860_v7 = vadd.f32 1.0, %v7475_v43  ;;  %v6574_v26 = vadd.f32 %v9808_v20, %v9564_v54  ;;  %v6327_v43 = vpop.f32.mrb[130].mxu1  ;;  %v6638_v6 = vadd.f32 %v9810_v51, %v9568_v5 }
 0x2ce   : > { %v7479_v53 = vpop.eup %7478  ;;  %7498 = vrcp.f32 %v4858_v21  ;;  %v4864_v31 = vadd.f32 1.0, %v7477_v12  ;;  %v6328_v50 = vpop.f32.mrb[131].mxu1  ;;  %v6197_v36 = vmul.f32 -1.442695, %v6637_v25 }
 0x2cf   : > { %v7481_v29 = vpop.eup %7480  ;;  %7500 = vrcp.f32 %v4860_v7  ;;  %v4866_v45 = vadd.f32 1.0, %v7479_v53  ;;  %v6195_v7 = vmul.f32 -1.442695, %v6573_v27  ;;  %v10069_v48 = vadd.f32 %v6328_v50, %v6327_v43  ;;  %v10986_v27 = vld [vmem:[#allocation19_spill] sm:$0xff] }
 0x2d0   : > { %v7483_v40 = vpop.eup %7482  ;;  %7502 = vrcp.f32 %v4864_v31  ;;  %v4865_v15 = vadd.f32 1.0, %v7481_v29  ;;  %v6575_v29 = vadd.f32 %v9813_v61, %v9574_v39  ;;  %v6576_v61 = vadd.f32 %v9823_v58, %v9564_v54  ;;  %v10988_v58 = vld [vmem:[#allocation5_spill] sm:$0xff] }
 0x2d1   : > { %v7485_v21 = vpop.eup %7484  ;;  %7504 = vrcp.f32 %v4866_v45  ;;  %v4867_v12 = vadd.f32 1.0, %v7483_v40  ;;  %v10985_v40 = vld [vmem:[#allocation3_spill] sm:$0xff]  ;;  %3715 = vmatmul.mubr.bf16.gmra.mrb[172].mxu0 %v10986_v27  ;;  %4047 = vmatmul.mubr.bf16.gmra.mrb[236].mxu1 %v10986_v27  ;;  %v6201_v45 = vmul.f32 -1.442695, %v6574_v26  ;;  %v6203_v43 = vmul.f32 -1.442695, %v6638_v6 }
 0x2d2   : > { %v7487_v53 = vpop.eup %7486  ;;  %7506 = vrcp.f32 %v4865_v15  ;;  %v4871_v31 = vadd.f32 1.0, %v7485_v21  ;;  %v6639_v33 = vadd.f32 %v10985_v40, %v9578_v49  ;;  %v10987_v15 = vld [vmem:[#allocation24_spill] sm:$0xff]  ;;  %v6640_v21 = vadd.f32 %v9825_v52, %v9568_v5 }
 0x2d3   : > { %v7489_v20 = vpop.eup %7488  ;;  %5523 = vst [vmem:[%s9628_s17 + $0x2d8] sm:$0xff] %v7487_v53  ;;  %7508 = vrcp.f32 %v4867_v12  ;;  %6062 = vmatprep.mubr.msk.bf16.mxu0 %vm2536_vm3, %v10987_v15  ;;  %6078 = vmatprep.mubr.msk.bf16.mxu1 %vm2536_vm3, %v10987_v15  ;;  %v6202_v26 = vmul.f32 -1.442695, %v6575_v29  ;;  %v6577_v50 = vadd.f32 %v10988_v58, %v9574_v39  ;;  %v6330_v53 = vpop.f32.mrb[132].mxu1  ;;  %v6208_v52 = vmul.f32 -1.442695, %v6576_v61 }
 0x2d4   : > { %v7491_v51 = vpop.eup %7490  ;;  %5525 = vst [vmem:[%s9628_s17 + $0x2e8] sm:$0xff] %v7489_v20  ;;  %7510 = vrcp.f32 %v4871_v31  ;;  %v6204_v20 = vmul.f32 -1.442695, %v6639_v33  ;;  %v6331_v6 = vpop.f32.mrb[133].mxu1  ;;  %v6642_v33 = vadd.f32 %v9835_v8, %v9568_v5 }
 0x2d5   : > { %v7493_v25 = vpop.eup %7492  ;;  %5524 = vst [vmem:[%s9628_s17 + $0x2e0] sm:$0xff] %v7491_v51  ;;  %7512 = vpow2.f32 %v6196_v24  ;;  %v10989_v24 = vld [vmem:[#allocation4_spill] sm:$0xff]  ;;  %v10095_v51 = vadd.f32 %v6331_v6, %v6330_v53  ;;  %v6333_v15 = vpop.f32.mrb[134].mxu1 }
 0x2d6   : > { %v7495_v12 = vpop.eup %7494  ;;  %5526 = vst [vmem:[%s9628_s17 + $0x2f0] sm:$0xff] %v7493_v25  ;;  %7514 = vpow2.f32 %v6195_v7  ;;  %v6641_v40 = vadd.f32 %v10989_v24, %v9578_v49  ;;  %v10990_v7 = vld [vmem:[#allocation7_spill] sm:$0xff] }
 0x2d7   : > { %v7497_v31 = vpop.eup %7496  ;;  %5530 = vst [vmem:[%s9628_s17 + $0x310] sm:$0xff] %v7495_v12  ;;  %7516 = vpow2.f32 %v6197_v36  ;;  %v6578_v29 = vadd.f32 %v10990_v7, %v9564_v54  ;;  %v6210_v36 = vmul.f32 -1.442695, %v6640_v21  ;;  %v6334_v12 = vpop.f32.mrb[135].mxu1  ;;  %v10991_v24 = vld [vmem:[#allocation23_spill] sm:$0xff]  ;;  %v10992_v21 = vld [vmem:[#allocation28_spill] sm:$0xff] }
 0x2d8   : > { %v7499_v27 = vpop.eup %7498  ;;  %5532 = vst [vmem:[%s9628_s17 + $0x320] sm:$0xff] %v7497_v31  ;;  %7518 = vpow2.f32 %v6201_v45  ;;  %v6209_v45 = vmul.f32 -1.442695, %v6577_v50  ;;  %v10101_v61 = vadd.f32 %v6334_v12, %v6333_v15  ;;  %v6211_v53 = vmul.f32 -1.442695, %v6641_v40 }
 0x2d9   : > { %v7501_v25 = vpop.eup %7500  ;;  %5531 = vst [vmem:[%s9628_s17 + $0x318] sm:$0xff] %v7499_v27  ;;  %7520 = vpow2.f32 %v6203_v43  ;;  %3725 = vmatmul.mubr.bf16.gmra.mrb[176].mxu0 %v10991_v24  ;;  %4055 = vmatmul.mubr.bf16.gmra.mrb[240].mxu1 %v10991_v24  ;;  %v6215_v8 = vmul.f32 -1.442695, %v6578_v29  ;;  %v6217_v50 = vmul.f32 -1.442695, %v6642_v33 }
 0x2da   : > { %v7503_v58 = vpop.eup %7502  ;;  %5533 = vst [vmem:[%s9628_s17 + $0x328] sm:$0xff] %v7501_v25  ;;  %7522 = vpow2.f32 %v6202_v26  ;;  %6063 = vmatprep.mubr.msk.bf16.mxu0 %vm2536_vm3, %v10992_v21  ;;  %6079 = vmatprep.mubr.msk.bf16.mxu1 %vm2536_vm3, %v10992_v21  ;;  %v6336_v40 = vpop.f32.mrb[136].mxu1  ;;  %v10994_v21 = vld [vmem:[#allocation31_spill] sm:$0xff] }
 0x2db   : > { %v7505_v31 = vpop.eup %7504  ;;  %5537 = vst [vmem:[%s9628_s17 + $0x348] sm:$0xff] %v7503_v58  ;;  %7524 = vpow2.f32 %v6204_v20  ;;  %v6337_v27 = vpop.f32.mrb[137].mxu1 }
 0x2dc   : > { %v7507_v43 = vpop.eup %7506  ;;  %5539 = vst [vmem:[%s9628_s17 + $0x358] sm:$0xff] %v7505_v31  ;;  %7526 = vpow2.f32 %v6208_v52  ;;  %v10114_v29 = vadd.f32 %v6337_v27, %v6336_v40  ;;  %v6339_v15 = vpop.f32.mrb[138].mxu1 }
 0x2dd   : > { %v7509_v26 = vpop.eup %7508  ;;  %5538 = vst [vmem:[%s9628_s17 + $0x350] sm:$0xff] %v7507_v43  ;;  %7528 = vpow2.f32 %v6210_v36  ;;  %v6340_v58 = vpop.f32.mrb[139].mxu1 }
 0x2de   : > { %v7511_v20 = vpop.eup %7510  ;;  %5540 = vst [vmem:[%s9628_s17 + $0x360] sm:$0xff] %v7509_v26  ;;  %7530 = vpow2.f32 %v6209_v45  ;;  %v10116_v31 = vadd.f32 %v6340_v58, %v6339_v15  ;;  %v10995_v58 = vld [vmem:[#allocation6_spill] sm:$0xff] }
 0x2df   : > { %v7513_v6 = vpop.eup %7512  ;;  %5544 = vst [vmem:[%s9628_s17 + $0x380] sm:$0xff] %v7511_v20  ;;  %7532 = vpow2.f32 %v6211_v53  ;;  %v10993_v53 = vld [vmem:[#allocation27_spill] sm:$0xff] }
 0x2e0   : > { %v7515_v52 = vpop.eup %7514  ;;  %v4873_v7 = vadd.f32 1.0, %v7513_v6  ;;  %7534 = vpow2.f32 %v6215_v8 }
 0x2e1   : > { %v7517_v25 = vpop.eup %7516  ;;  %v4872_v12 = vadd.f32 1.0, %v7515_v52  ;;  %7536 = vpow2.f32 %v6217_v50  ;;  %3735 = vmatmul.mubr.bf16.gmra.mrb[180].mxu0 %v10993_v53  ;;  %4063 = vmatmul.mubr.bf16.gmra.mrb[244].mxu1 %v10993_v53 }
 0x2e2   : > { %v7519_v36 = vpop.eup %7518  ;;  %7538 = vrcp.f32 %v4873_v7  ;;  %v4874_v33 = vadd.f32 1.0, %v7517_v25  ;;  %6064 = vmatprep.mubr.msk.bf16.mxu0 %vm2536_vm3, %v10994_v21  ;;  %6080 = vmatprep.mubr.msk.bf16.mxu1 %vm2536_vm3, %v10994_v21  ;;  %v6342_v6 = vpop.f32.mrb[140].mxu1  ;;  %v6579_v7 = vadd.f32 %v9837_v28, %v9574_v39 }
 0x2e3   : > { %v7521_v45 = vpop.eup %7520  ;;  %7540 = vrcp.f32 %v4872_v12  ;;  %v4878_v24 = vadd.f32 1.0, %v7519_v36  ;;  %v6343_v15 = vpop.f32.mrb[141].mxu1  ;;  %v6643_v36 = vadd.f32 %v10995_v58, %v9578_v49  ;;  %v10998_v58 = vld [vmem:[#allocation9_spill] sm:$0xff] }
 0x2e4   : > { %v7523_v43 = vpop.eup %7522  ;;  %7542 = vrcp.f32 %v4874_v33  ;;  %v4880_v8 = vadd.f32 1.0, %v7521_v45  ;;  %v10128_v33 = vadd.f32 %v6343_v15, %v6342_v6  ;;  %v6345_v45 = vpop.f32.mrb[142].mxu1  ;;  %v6216_v6 = vmul.f32 -1.442695, %v6579_v7 }
 0x2e5   : > { %v7525_v26 = vpop.eup %7524  ;;  %7544 = vrcp.f32 %v4878_v24  ;;  %v4879_v50 = vadd.f32 1.0, %v7523_v43  ;;  %v6580_v43 = vadd.f32 %v9857_v60, %v9564_v54 }
 0x2e6   : > { %v7527_v20 = vpop.eup %7526  ;;  %7546 = vrcp.f32 %v4880_v8  ;;  %v4881_v40 = vadd.f32 1.0, %v7525_v26  ;;  %v6346_v8 = vpop.f32.mrb[143].mxu1  ;;  %v6644_v26 = vadd.f32 %v9862_v17, %v9568_v5  ;;  %v6645_v17 = vadd.f32 %v9869_v59, %v9578_v49 }
 0x2e7   : > { %v7529_v27 = vpop.eup %7528  ;;  %7548 = vrcp.f32 %v4879_v50  ;;  %v4885_v52 = vadd.f32 1.0, %v7527_v20  ;;  %v10134_v50 = vadd.f32 %v6346_v8, %v6345_v45  ;;  %v6222_v7 = vmul.f32 -1.442695, %v6580_v43 }
 0x2e8   : > { %v7531_v25 = vpop.eup %7530  ;;  %7550 = vrcp.f32 %v4881_v40  ;;  %v4887_v12 = vadd.f32 1.0, %v7529_v27  ;;  %v6581_v27 = vadd.f32 %v9864_v1, %v9574_v39  ;;  %v6582_v45 = vadd.f32 %v10998_v58, %v9564_v54 }
 0x2e9   : > { %v7533_v24 = vpop.eup %7532  ;;  %7552 = vrcp.f32 %v4885_v52  ;;  %v4886_v53 = vadd.f32 1.0, %v7531_v25  ;;  %v10996_v52 = vld [vmem:[#allocation30_spill] sm:$0xff]  ;;  %v6218_v25 = vmul.f32 -1.442695, %v6643_v36  ;;  %v6224_v36 = vmul.f32 -1.442695, %v6644_v26 }
 0x2ea   : > { %v7535_v21 = vpop.eup %7534  ;;  %7554 = vrcp.f32 %v4887_v12  ;;  %v4888_v28 = vadd.f32 1.0, %v7533_v24  ;;  %3745 = vmatmul.mubr.bf16.gmra.mrb[184].mxu0 %v10996_v52  ;;  %4071 = vmatmul.mubr.bf16.gmra.mrb[248].mxu1 %v10996_v52  ;;  %v10997_v12 = vld [vmem:[#allocation33_spill] sm:$0xff]  ;;  %v6646_v59 = vadd.f32 %v9876_v4, %v9568_v5  ;;  %v6647_v26 = vadd.f32 %v9883_v32, %v9578_v49 }
 0x2eb   : > { %v7537_v20 = vpop.eup %7536  ;;  %7556 = vrcp.f32 %v4886_v53  ;;  %v4892_v40 = vadd.f32 1.0, %v7535_v21  ;;  %6065 = vmatprep.mubr.msk.bf16.mxu0 %vm2536_vm3, %v10997_v12  ;;  %6081 = vmatprep.mubr.msk.bf16.mxu1 %vm2536_vm3, %v10997_v12  ;;  %v6348_v53 = vpop.f32.mrb[144].mxu1  ;;  %v6223_v21 = vmul.f32 -1.442695, %v6581_v27  ;;  %v6648_v32 = vadd.f32 %v9903_v13, %v9568_v5 }
 0x2ec   : > { %v7539_v60 = vpop.eup %7538  ;;  %7558 = vrcp.f32 %v4888_v28  ;;  %v4894_v15 = vadd.f32 1.0, %v7537_v20  ;;  %v6583_v28 = vadd.f32 %v9878_v19, %v9574_v39  ;;  %v6349_v43 = vpop.f32.mrb[145].mxu1  ;;  %v6584_v19 = vadd.f32 %v9901_v18, %v9564_v54 }
 0x2ed   : > { %v7541_v1 = vpop.eup %7540  ;;  %5546 = vst [vmem:[%s9628_s17 + $0x390] sm:$0xff] %v7539_v60  ;;  %7560 = vrcp.f32 %v4892_v40  ;;  %v6225_v40 = vmul.f32 -1.442695, %v6645_v17  ;;  %v10158_v4 = vadd.f32 %v6349_v43, %v6348_v53  ;;  %v6351_v52 = vpop.f32.mrb[146].mxu1  ;;  %v6585_v18 = vadd.f32 %v9906_v44, %v9574_v39 }
 0x2ee   : > { %v7543_v24 = vpop.eup %7542  ;;  %5545 = vst [vmem:[%s9628_s17 + $0x388] sm:$0xff] %v7541_v1  ;;  %7562 = vrcp.f32 %v4894_v15  ;;  %v6352_v27 = vpop.f32.mrb[147].mxu1  ;;  %v6230_v1 = vmul.f32 -1.442695, %v6583_v28 }
 0x2ef   : > { %v7545_v8 = vpop.eup %7544  ;;  %5547 = vst [vmem:[%s9628_s17 + $0x398] sm:$0xff] %v7543_v24  ;;  %7564 = vpow2.f32 %v6216_v6  ;;  %v6229_v6 = vmul.f32 -1.442695, %v6582_v45  ;;  %v10166_v17 = vadd.f32 %v6352_v27, %v6351_v52  ;;  %v6232_v45 = vmul.f32 -1.442695, %v6647_v26 }
 0x2f0   : > { %v7547_v20 = vpop.eup %7546  ;;  %5551 = vst [vmem:[%s9628_s17 + $0x3b8] sm:$0xff] %v7545_v8  ;;  %7566 = vpow2.f32 %v6218_v25  ;;  %v6231_v25 = vmul.f32 -1.442695, %v6646_v59  ;;  %v6236_v24 = vmul.f32 -1.442695, %v6584_v19 }
 0x2f1   : > { %v7549_v60 = vpop.eup %7548  ;;  %5553 = vst [vmem:[%s9628_s17 + $0x3c8] sm:$0xff] %v7547_v20  ;;  %7568 = vpow2.f32 %v6222_v7  ;;  %v10999_v7 = vld [vmem:[#allocation32_spill] sm:$0xff]  ;;  %v6238_v59 = vmul.f32 -1.442695, %v6648_v32  ;;  %v6237_v8 = vmul.f32 -1.442695, %v6585_v18 }
 0x2f2   : > { %v7551_v15 = vpop.eup %7550  ;;  %5552 = vst [vmem:[%s9628_s17 + $0x3c0] sm:$0xff] %v7549_v60  ;;  %7570 = vpow2.f32 %v6224_v36  ;;  %3755 = vmatmul.mubr.bf16.gmra.mrb[188].mxu0 %v10999_v7  ;;  %4079 = vmatmul.mubr.bf16.gmra.mrb[252].mxu1 %v10999_v7  ;;  %v6354_v44 = vpop.f32.mrb[148].mxu1 }
 0x2f3   : > { %v7553_v12 = vpop.eup %7552  ;;  %5554 = vst [vmem:[%s9628_s17 + $0x3d0] sm:$0xff] %v7551_v15  ;;  %7572 = vpow2.f32 %v6223_v21  ;;  %v6355_v21 = vpop.f32.mrb[149].mxu1 }
 0x2f4   : > { %v7555_v58 = vpop.eup %7554  ;;  %5558 = vst [vmem:[%s9628_s17 + $0x3f0] sm:$0xff] %v7553_v12  ;;  %7574 = vpow2.f32 %v6225_v40  ;;  %v10178_v43 = vadd.f32 %v6355_v21, %v6354_v44  ;;  %v6357_v20 = vpop.f32.mrb[150].mxu1  ;;  %v6649_v21 = vadd.f32 %v9908_v2, %v9578_v49  ;;  %v6587_v2 = vadd.f32 %v9916_v37, %v9574_v39 }
 0x2f5   : > { %v7557_v13 = vpop.eup %7556  ;;  %5560 = vst [vmem:[%s9628_s17 + $0x400] sm:$0xff] %v7555_v58  ;;  %7576 = vpow2.f32 %v6229_v6  ;;  %v6358_v26 = vpop.f32.mrb[151].mxu1 }
 0x2f6   : > { %v7559_v36 = vpop.eup %7558  ;;  %5559 = vst [vmem:[%s9628_s17 + $0x3f8] sm:$0xff] %v7557_v13  ;;  %7578 = vpow2.f32 %v6231_v25  ;;  %v10181_v6 = vadd.f32 %v6358_v26, %v6357_v20  ;;  %v6586_v26 = vadd.f32 %v9911_v46, %v9564_v54  ;;  %v6239_v46 = vmul.f32 -1.442695, %v6649_v21 }
 0x2f7   : > { %v7561_v53 = vpop.eup %7560  ;;  %5561 = vst [vmem:[%s9628_s17 + $0x408] sm:$0xff] %v7559_v36  ;;  %7580 = vpow2.f32 %v6230_v1 }
 0x2f8   : > { %v7563_v28 = vpop.eup %7562  ;;  %5565 = vst [vmem:[%s9628_s17 + $0x428] sm:$0xff] %v7561_v53  ;;  %7582 = vpow2.f32 %v6232_v45 }
 0x2f9   : > { %v7565_v40 = vpop.eup %7564  ;;  %5567 = vst [vmem:[%s9628_s17 + $0x438] sm:$0xff] %v7563_v28  ;;  %7584 = vpow2.f32 %v6236_v24 }
 0x2fa   : > { %v7567_v52 = vpop.eup %7566  ;;  %v4893_v60 = vadd.f32 1.0, %v7565_v40  ;;  %7586 = vpow2.f32 %v6238_v59  ;;  %v6360_v7 = vpop.f32.mrb[152].mxu1 }
 0x2fb   : > { %v7569_v19 = vpop.eup %7568  ;;  %v4895_v27 = vadd.f32 1.0, %v7567_v52  ;;  %7588 = vpow2.f32 %v6237_v8  ;;  %v6361_v13 = vpop.f32.mrb[153].mxu1 }
 0x2fc   : > { %v7571_v15 = vpop.eup %7570  ;;  %7590 = vrcp.f32 %v4893_v60  ;;  %v4899_v25 = vadd.f32 1.0, %v7569_v19  ;;  %v10183_v59 = vadd.f32 %v6361_v13, %v6360_v7  ;;  %v6363_v44 = vpop.f32.mrb[154].mxu1 }
 0x2fd   : > { %v7573_v32 = vpop.eup %7572  ;;  %7592 = vrcp.f32 %v4895_v27  ;;  %v4901_v12 = vadd.f32 1.0, %v7571_v15  ;;  %v6364_v28 = vpop.f32.mrb[155].mxu1  ;;  %v6650_v27 = vadd.f32 %v9913_v0, %v9568_v5  ;;  %v6588_v0 = vadd.f32 %v9928_v55, %v9564_v54 }
 0x2fe   : > { %v7575_v1 = vpop.eup %7574  ;;  %7594 = vrcp.f32 %v4899_v25  ;;  %v4900_v18 = vadd.f32 1.0, %v7573_v32  ;;  %v10189_v52 = vadd.f32 %v6364_v28, %v6363_v44 }
 0x2ff   : > { %v7577_v58 = vpop.eup %7576  ;;  %7596 = vrcp.f32 %v4901_v12  ;;  %v4902_v45 = vadd.f32 1.0, %v7575_v1  ;;  %v6651_v1 = vadd.f32 %v9918_v30, %v9578_v49  ;;  %v6245_v37 = vmul.f32 -1.442695, %v6650_v27 }
 0x300   : > { %v7579_v24 = vpop.eup %7578  ;;  %7598 = vrcp.f32 %v4900_v18  ;;  %v4906_v36 = vadd.f32 1.0, %v7577_v58  ;;  %v6243_v58 = vmul.f32 -1.442695, %v6586_v26  ;;  %v6244_v30 = vmul.f32 -1.442695, %v6587_v2  ;;  %v11002_v26 = vld [vmem:[#allocation10_spill] sm:$0xff] }
 0x301   : > { %v7581_v53 = vpop.eup %7580  ;;  %7600 = vrcp.f32 %v4902_v45  ;;  %v4908_v8 = vadd.f32 1.0, %v7579_v24  ;;  %v11000_v24 = vld [vmem:[#allocation8_spill] sm:$0xff] }
 0x302   : > { %v7583_v20 = vpop.eup %7582  ;;  %7602 = vrcp.f32 %v4906_v36  ;;  %v4907_v40 = vadd.f32 1.0, %v7581_v53  ;;  %v6366_v45 = vpop.f32.mrb[156].mxu1  ;;  %v6652_v36 = vadd.f32 %v11000_v24, %v9568_v5 }
 0x303   : > { %v7585_v60 = vpop.eup %7584  ;;  %7604 = vrcp.f32 %v4908_v8  ;;  %v4909_v19 = vadd.f32 1.0, %v7583_v20  ;;  %v6367_v44 = vpop.f32.mrb[157].mxu1  ;;  %v11001_v8 = vld [vmem:[#allocation11_spill] sm:$0xff] }
 0x304   : > { %v7587_v15 = vpop.eup %7586  ;;  %7606 = vrcp.f32 %v4907_v40  ;;  %v4913_v25 = vadd.f32 1.0, %v7585_v60  ;;  %v6589_v21 = vadd.f32 %v11001_v8, %v9574_v39  ;;  %v10205_v55 = vadd.f32 %v6367_v44, %v6366_v45  ;;  %v6369_v28 = vpop.f32.mrb[158].mxu1 }
 0x305   : > { %v7589_v32 = vpop.eup %7588  ;;  %7608 = vrcp.f32 %v4909_v19  ;;  %v4915_v12 = vadd.f32 1.0, %v7587_v15  ;;  %v6246_v40 = vmul.f32 -1.442695, %v6651_v1  ;;  %v6653_v60 = vadd.f32 %v11002_v26, %v9578_v49  ;;  %v6370_v19 = vpop.f32.mrb[159].mxu1 }
 0x306   : > { %v7591_v18 = vpop.eup %7590  ;;  %7610 = vrcp.f32 %v4913_v25  ;;  %v4914_v7 = vadd.f32 1.0, %v7589_v32  ;;  %v6250_v15 = vmul.f32 -1.442695, %v6588_v0  ;;  %v6590_v25 = vadd.f32 %v9936_v22, %v9564_v54  ;;  %v11003_v0 = vld [vmem:[#allocation13_spill] sm:$0xff] }
 0x307   : > { %v7593_v13 = vpop.eup %7592  ;;  %5566 = vst [vmem:[%s9628_s17 + $0x430] sm:$0xff] %v7591_v18  ;;  %7612 = vrcp.f32 %v4915_v12  ;;  %v10213_v2 = vadd.f32 %v6370_v19, %v6369_v28  ;;  %v6252_v12 = vmul.f32 -1.442695, %v6652_v36  ;;  %v6251_v18 = vmul.f32 -1.442695, %v6589_v21 }
 0x308   : > { %v7595_v53 = vpop.eup %7594  ;;  %5568 = vst [vmem:[%s9628_s17 + $0x440] sm:$0xff] %v7593_v13  ;;  %7614 = vrcp.f32 %v4914_v7  ;;  %v6591_v7 = vadd.f32 %v9940_v47, %v9574_v39  ;;  %v6253_v22 = vmul.f32 -1.442695, %v6653_v60  ;;  %v6655_v45 = vadd.f32 %v11003_v0, %v9578_v49 }
 0x309   : > { %v7597_v20 = vpop.eup %7596  ;;  %5572 = vst [vmem:[%s9628_s17 + $0x460] sm:$0xff] %v7595_v53  ;;  %7616 = vpow2.f32 %v6239_v46  ;;  %v6654_v46 = vadd.f32 %v9938_v14, %v9568_v5  ;;  %v6257_v14 = vmul.f32 -1.442695, %v6590_v25 }
 0x30a   : > { %v7599_v27 = vpop.eup %7598  ;;  %5574 = vst [vmem:[%s9628_s17 + $0x470] sm:$0xff] %v7597_v20  ;;  %7618 = vpow2.f32 %v6243_v58  ;;  %v6258_v53 = vmul.f32 -1.442695, %v6591_v7  ;;  %v6260_v28 = vmul.f32 -1.442695, %v6655_v45 }
 0x30b   : > { %v7601_v32 = vpop.eup %7600  ;;  %5573 = vst [vmem:[%s9628_s17 + $0x468] sm:$0xff] %v7599_v27  ;;  %7620 = vpow2.f32 %v6245_v37  ;;  %v6372_v37 = vpop.f32.mrb[160].mxu1  ;;  %v6259_v36 = vmul.f32 -1.442695, %v6654_v46 }
 0x30c   : > { %v7603_v1 = vpop.eup %7602  ;;  %5575 = vst [vmem:[%s9628_s17 + $0x478] sm:$0xff] %v7601_v32  ;;  %7622 = vpow2.f32 %v6244_v30  ;;  %v6373_v47 = vpop.f32.mrb[161].mxu1 }
 0x30d   : > { %v7605_v58 = vpop.eup %7604  ;;  %5579 = vst [vmem:[%s9628_s17 + $0x498] sm:$0xff] %v7603_v1  ;;  %7624 = vpow2.f32 %v6246_v40  ;;  %v10227_v30 = vadd.f32 %v6373_v47, %v6372_v37  ;;  %v6375_v8 = vpop.f32.mrb[162].mxu1  ;;  %v11004_v47 = vld [vmem:[#allocation12_spill] sm:$0xff] }
 0x30e   : > { %v7607_v13 = vpop.eup %7606  ;;  %5581 = vst [vmem:[%s9628_s17 + $0x4a8] sm:$0xff] %v7605_v58  ;;  %7626 = vpow2.f32 %v6250_v15  ;;  %v6376_v20 = vpop.f32.mrb[163].mxu1 }
 0x30f   : > { %v7609_v24 = vpop.eup %7608  ;;  %5580 = vst [vmem:[%s9628_s17 + $0x4a0] sm:$0xff] %v7607_v13  ;;  %7628 = vpow2.f32 %v6252_v12  ;;  %v10231_v26 = vadd.f32 %v6376_v20, %v6375_v8 }
 0x310   : > { %v7611_v44 = vpop.eup %7610  ;;  %5582 = vst [vmem:[%s9628_s17 + $0x4b0] sm:$0xff] %v7609_v24  ;;  %7630 = vpow2.f32 %v6251_v18 }
 0x311   : > { %v7613_v21 = vpop.eup %7612  ;;  %5586 = vst [vmem:[%s9628_s17 + $0x4d0] sm:$0xff] %v7611_v44  ;;  %7632 = vpow2.f32 %v6253_v22  ;;  %v6592_v44 = vadd.f32 %v11004_v47, %v9564_v54 }
 0x312   : > { %v7615_v40 = vpop.eup %7614  ;;  %5588 = vst [vmem:[%s9628_s17 + $0x4e0] sm:$0xff] %v7613_v21  ;;  %7634 = vpow2.f32 %v6257_v14  ;;  %v6378_v46 = vpop.f32.mrb[164].mxu1 }
 0x313   : > { %v7617_v60 = vpop.eup %7616  ;;  %5587 = vst [vmem:[%s9628_s17 + $0x4d8] sm:$0xff] %v7615_v40  ;;  %7636 = vpow2.f32 %v6259_v36  ;;  %v6379_v7 = vpop.f32.mrb[165].mxu1 }
 0x314   : > { %v7619_v19 = vpop.eup %7618  ;;  %v4916_v27 = vadd.f32 1.0, %v7617_v60  ;;  %7638 = vpow2.f32 %v6258_v53  ;;  %v10234_v0 = vadd.f32 %v6379_v7, %v6378_v46  ;;  %v6381_v45 = vpop.f32.mrb[166].mxu1  ;;  %v6657_v46 = vadd.f32 %v9968_v10, %v9578_v49 }
 0x315   : > { %v7621_v15 = vpop.eup %7620  ;;  %v4920_v25 = vadd.f32 1.0, %v7619_v19  ;;  %7640 = vpow2.f32 %v6260_v28  ;;  %v6382_v37 = vpop.f32.mrb[167].mxu1  ;;  %v6656_v28 = vadd.f32 %v9962_v57, %v9568_v5 }
 0x316   : > { %v7623_v32 = vpop.eup %7622  ;;  %7642 = vrcp.f32 %v4916_v27  ;;  %v4922_v12 = vadd.f32 1.0, %v7621_v15  ;;  %v10238_v53 = vadd.f32 %v6382_v37, %v6381_v45  ;;  %v11005_v27 = vld [vmem:[#allocation15_spill] sm:$0xff]  ;;  %v6658_v37 = vadd.f32 %v9975_v42, %v9568_v5 }
 0x317   : > { %v7625_v1 = vpop.eup %7624  ;;  %7644 = vrcp.f32 %v4920_v25  ;;  %v4921_v18 = vadd.f32 1.0, %v7623_v32  ;;  %v6593_v15 = vadd.f32 %v11005_v27, %v9574_v39  ;;  %v6266_v7 = vmul.f32 -1.442695, %v6656_v28 }
 0x318   : > { %v7627_v58 = vpop.eup %7626  ;;  %7646 = vrcp.f32 %v4922_v12  ;;  %v4923_v22 = vadd.f32 1.0, %v7625_v1  ;;  %v6264_v12 = vmul.f32 -1.442695, %v6592_v44  ;;  %v6595_v44 = vadd.f32 %v9977_v11, %v9574_v39 }
 0x319   : > { %v7629_v13 = vpop.eup %7628  ;;  %7648 = vrcp.f32 %v4921_v18  ;;  %v4927_v14 = vadd.f32 1.0, %v7627_v58  ;;  %v11006_v58 = vld [vmem:[#allocation14_spill] sm:$0xff]  ;;  %v6265_v47 = vmul.f32 -1.442695, %v6593_v15  ;;  %v6267_v28 = vmul.f32 -1.442695, %v6657_v46 }
 0x31a   : > { %v7631_v24 = vpop.eup %7630  ;;  %7650 = vrcp.f32 %v4923_v22  ;;  %v4929_v36 = vadd.f32 1.0, %v7629_v13  ;;  %v6384_v1 = vpop.f32.mrb[168].mxu1  ;;  %v6594_v22 = vadd.f32 %v11006_v58, %v9564_v54  ;;  %v6659_v42 = vadd.f32 %v9982_v16, %v9578_v49 }
 0x31b   : > { %v7633_v8 = vpop.eup %7632  ;;  %7652 = vrcp.f32 %v4927_v14  ;;  %v4928_v21 = vadd.f32 1.0, %v7631_v24  ;;  %v6385_v45 = vpop.f32.mrb[169].mxu1  ;;  %v6273_v27 = vmul.f32 -1.442695, %v6658_v37  ;;  %v6660_v15 = vadd.f32 %v10004_v9, %v9568_v5 }
 0x31c   : > { %v7635_v20 = vpop.eup %7634  ;;  %7654 = vrcp.f32 %v4929_v36  ;;  %v4930_v40 = vadd.f32 1.0, %v7633_v8  ;;  %v10250_v24 = vadd.f32 %v6385_v45, %v6384_v1  ;;  %v6387_v10 = vpop.f32.mrb[170].mxu1  ;;  %v6272_v16 = vmul.f32 -1.442695, %v6595_v44 }
 0x31d   : > { %v7637_v60 = vpop.eup %7636  ;;  %7656 = vrcp.f32 %v4928_v21  ;;  %v4934_v19 = vadd.f32 1.0, %v7635_v20  ;;  %v6388_v8 = vpop.f32.mrb[171].mxu1  ;;  %v6661_v46 = vadd.f32 %v10011_v34, %v9578_v49 }
 0x31e   : > { %v7639_v25 = vpop.eup %7638  ;;  %7658 = vrcp.f32 %v4930_v40  ;;  %v4936_v32 = vadd.f32 1.0, %v7637_v60  ;;  %v10258_v20 = vadd.f32 %v6388_v8, %v6387_v10  ;;  %v6271_v60 = vmul.f32 -1.442695, %v6594_v22 }
 0x31f   : > { %v7641_v18 = vpop.eup %7640  ;;  %7660 = vrcp.f32 %v4934_v19  ;;  %v4935_v57 = vadd.f32 1.0, %v7639_v25  ;;  %v6596_v19 = vadd.f32 %v10002_v63, %v9564_v54  ;;  %v6274_v63 = vmul.f32 -1.442695, %v6659_v42 }
 0x320   : > { %v7643_v13 = vpop.eup %7642  ;;  %7662 = vrcp.f32 %v4936_v32  ;;  %v4937_v14 = vadd.f32 1.0, %v7641_v18  ;;  %v6597_v32 = vadd.f32 %v10009_v35, %v9574_v39  ;;  %v6280_v35 = vmul.f32 -1.442695, %v6660_v15 }
 0x321   : > { %v7645_v36 = vpop.eup %7644  ;;  %5589 = vst [vmem:[%s9628_s17 + $0x4e8] sm:$0xff] %v7643_v13  ;;  %7664 = vrcp.f32 %v4935_v57  ;;  %v6278_v9 = vmul.f32 -1.442695, %v6596_v19  ;;  %v6598_v57 = vadd.f32 %v10014_v56, %v9564_v54  ;;  %v6281_v56 = vmul.f32 -1.442695, %v6661_v46 }
 0x322   : > { %v7647_v21 = vpop.eup %7646  ;;  %5593 = vst [vmem:[%s9628_s17 + $0x508] sm:$0xff] %v7645_v36  ;;  %7666 = vrcp.f32 %v4937_v14  ;;  %v6390_v1 = vpop.f32.mrb[172].mxu1  ;;  %v6279_v13 = vmul.f32 -1.442695, %v6597_v32 }
 0x323   : > { %v7649_v40 = vpop.eup %7648  ;;  %5595 = vst [vmem:[%s9628_s17 + $0x518] sm:$0xff] %v7647_v21  ;;  %7668 = vpow2.f32 %v6264_v12 }
 0x324   : > { %v7651_v11 = vpop.eup %7650  ;;  %5594 = vst [vmem:[%s9628_s17 + $0x510] sm:$0xff] %v7649_v40  ;;  %7670 = vpow2.f32 %v6266_v7  ;;  %v6391_v7 = vpop.f32.mrb[173].mxu1 }
 0x325   : > { %v7653_v25 = vpop.eup %7652  ;;  %5596 = vst [vmem:[%s9628_s17 + $0x520] sm:$0xff] %v7651_v11  ;;  %7672 = vpow2.f32 %v6265_v47  ;;  %v10276_v22 = vadd.f32 %v6391_v7, %v6390_v1  ;;  %v6393_v45 = vpop.f32.mrb[174].mxu1  ;;  %v6285_v47 = vmul.f32 -1.442695, %v6598_v57  ;;  %v6662_v57 = vadd.f32 %v10016_v23, %v9568_v5 }
 0x326   : > { %v7655_v12 = vpop.eup %7654  ;;  %5600 = vst [vmem:[%s9628_s17 + $0x540] sm:$0xff] %v7653_v25  ;;  %7674 = vpow2.f32 %v6267_v28  ;;  %v6394_v14 = vpop.f32.mrb[175].mxu1  ;;  %v6663_v23 = vadd.f32 %v10021_v38, %v9578_v49 }
 0x327   : > { %v7657_v18 = vpop.eup %7656  ;;  %5602 = vst [vmem:[%s9628_s17 + $0x550] sm:$0xff] %v7655_v12  ;;  %7676 = vpow2.f32 %v6271_v60  ;;  %v10280_v10 = vadd.f32 %v6394_v14, %v6393_v45 }
 0x328   : > { %v7659_v58 = vpop.eup %7658  ;;  %5601 = vst [vmem:[%s9628_s17 + $0x548] sm:$0xff] %v7657_v18  ;;  %7678 = vpow2.f32 %v6273_v27 }
 0x329   : > { %v7661_v34 = vpop.eup %7660  ;;  %5603 = vst [vmem:[%s9628_s17 + $0x558] sm:$0xff] %v7659_v58  ;;  %7680 = vpow2.f32 %v6272_v16 }
 0x32a   : > { %v7663_v37 = vpop.eup %7662  ;;  %5607 = vst [vmem:[%s9628_s17 + $0x578] sm:$0xff] %v7661_v34  ;;  %7682 = vpow2.f32 %v6274_v63  ;;  %v6396_v42 = vpop.f32.mrb[176].mxu1  ;;  %v6599_v34 = vadd.f32 %v10019_v41, %v9574_v39 }
 0x32b   : > { %v7665_v36 = vpop.eup %7664  ;;  %5609 = vst [vmem:[%s9628_s17 + $0x588] sm:$0xff] %v7663_v37  ;;  %7684 = vpow2.f32 %v6278_v9  ;;  %v6397_v19 = vpop.f32.mrb[177].mxu1 }
 0x32c   : > { %v7667_v44 = vpop.eup %7666  ;;  %5608 = vst [vmem:[%s9628_s17 + $0x580] sm:$0xff] %v7665_v36  ;;  %7686 = vpow2.f32 %v6280_v35  ;;  %v10285_v15 = vadd.f32 %v6397_v19, %v6396_v42  ;;  %v6399_v25 = vpop.f32.mrb[178].mxu1  ;;  %v6286_v19 = vmul.f32 -1.442695, %v6599_v34 }
 0x32d   : > { %v7669_v8 = vpop.eup %7668  ;;  %5610 = vst [vmem:[%s9628_s17 + $0x590] sm:$0xff] %v7667_v44  ;;  %7688 = vpow2.f32 %v6279_v13  ;;  %v6400_v12 = vpop.f32.mrb[179].mxu1 }
 0x32e   : > { %v7671_v21 = vpop.eup %7670  ;;  %v4941_v28 = vadd.f32 1.0, %v7669_v8  ;;  %7690 = vpow2.f32 %v6281_v56  ;;  %v10287_v1 = vadd.f32 %v6400_v12, %v6399_v25 }
 0x32f   : > { %v7673_v40 = vpop.eup %7672  ;;  %v4943_v60 = vadd.f32 1.0, %v7671_v21  ;;  %7692 = vpow2.f32 %v6285_v47  ;;  %v6287_v47 = vmul.f32 -1.442695, %v6662_v57 }
 0x330   : > { %v7675_v11 = vpop.eup %7674  ;;  %7694 = vrcp.f32 %v4941_v28  ;;  %v4942_v27 = vadd.f32 1.0, %v7673_v40  ;;  %v6600_v28 = vadd.f32 %v10033_v3, %v9564_v54 }
 0x331   : > { %v7677_v16 = vpop.eup %7676  ;;  %7696 = vrcp.f32 %v4943_v60  ;;  %v4944_v32 = vadd.f32 1.0, %v7675_v11  ;;  %v11007_v11 = vld [vmem:[#allocation18_spill] sm:$0xff] }
 0x332   : > { %v7679_v63 = vpop.eup %7678  ;;  %7698 = vrcp.f32 %v4942_v27  ;;  %v4948_v46 = vadd.f32 1.0, %v7677_v16  ;;  %v6402_v37 = vpop.f32.mrb[180].mxu1  ;;  %v6664_v27 = vadd.f32 %v11007_v11, %v9568_v5 }
 0x333   : > { %v7681_v18 = vpop.eup %7680  ;;  %7700 = vrcp.f32 %v4944_v32  ;;  %v4950_v9 = vadd.f32 1.0, %v7679_v63  ;;  %v6403_v44 = vpop.f32.mrb[181].mxu1  ;;  %v11008_v32 = vld [vmem:[#allocation17_spill] sm:$0xff] }
 0x334   : > { %v7683_v7 = vpop.eup %7682  ;;  %7702 = vrcp.f32 %v4948_v46  ;;  %v4949_v58 = vadd.f32 1.0, %v7681_v18  ;;  %v10297_v41 = vadd.f32 %v6403_v44, %v6402_v37  ;;  %v6405_v42 = vpop.f32.mrb[182].mxu1  ;;  %v6601_v12 = vadd.f32 %v11008_v32, %v9574_v39  ;;  %v11009_v18 = vld [vmem:[#allocation22_spill] sm:$0xff] }
 0x335   : > { %v7685_v35 = vpop.eup %7684  ;;  %7704 = vrcp.f32 %v4950_v9  ;;  %v4951_v45 = vadd.f32 1.0, %v7683_v7  ;;  %v6406_v38 = vpop.f32.mrb[183].mxu1  ;;  %v6288_v46 = vmul.f32 -1.442695, %v6663_v23  ;;  %v6665_v9 = vadd.f32 %v11009_v18, %v9578_v49 }
 0x336   : > { %v7687_v13 = vpop.eup %7686  ;;  %7706 = vrcp.f32 %v4949_v58  ;;  %v4955_v14 = vadd.f32 1.0, %v7685_v35  ;;  %v10303_v3 = vadd.f32 %v6406_v38, %v6405_v42  ;;  %v6292_v7 = vmul.f32 -1.442695, %v6600_v28  ;;  %v11010_v58 = vld [vmem:[#allocation21_spill] sm:$0xff] }
 0x337   : > { %v7689_v56 = vpop.eup %7688  ;;  %7708 = vrcp.f32 %v4951_v45  ;;  %v4957_v36 = vadd.f32 1.0, %v7687_v13  ;;  %v6602_v35 = vadd.f32 %v11010_v58, %v9564_v54  ;;  %v6294_v34 = vmul.f32 -1.442695, %v6664_v27  ;;  %v11011_v13 = vld [vmem:[#allocation26_spill] sm:$0xff] }
 0x338   : > { %v7691_v8 = vpop.eup %7690  ;;  %7710 = vrcp.f32 %v4955_v14  ;;  %v4956_v21 = vadd.f32 1.0, %v7689_v56  ;;  %v6666_v14 = vadd.f32 %v11011_v13, %v9568_v5  ;;  %v6293_v56 = vmul.f32 -1.442695, %v6601_v12 }
 0x339   : > { %v7693_v40 = vpop.eup %7692  ;;  %7712 = vrcp.f32 %v4957_v36  ;;  %v4958_v60 = vadd.f32 1.0, %v7691_v8  ;;  %v11012_v36 = vld [vmem:[#allocation25_spill] sm:$0xff]  ;;  %v6295_v54 = vmul.f32 -1.442695, %v6665_v9  ;;  %v6299_v5 = vmul.f32 -1.442695, %v6602_v35 }
 0x33a   : > { %v7695_v25 = vpop.eup %7694  ;;  %7714 = vrcp.f32 %v4956_v21  ;;  %v4962_v16 = vadd.f32 1.0, %v7693_v40  ;;  %v6603_v23 = vadd.f32 %v11012_v36, %v9574_v39  ;;  %v6408_v44 = vpop.f32.mrb[184].mxu1  ;;  %v11014_v9 = vld [vmem:[#allocation2_spill] sm:$0xff] }
 0x33b   : > { %v7697_v63 = vpop.eup %7696  ;;  %5614 = vst [vmem:[%s9628_s17 + $0x5b0] sm:$0xff] %v7695_v25  ;;  %7716 = vrcp.f32 %v4958_v60  ;;  %v6409_v28 = vpop.f32.mrb[185].mxu1  ;;  %v1385_v58 = vsub.s32 4, %v11014_v9 }
 0x33c   : > { %v7699_v57 = vpop.eup %7698  ;;  %5616 = vst [vmem:[%s9628_s17 + $0x5c0] sm:$0xff] %v7697_v63  ;;  %7718 = vrcp.f32 %v4962_v16  ;;  %v10321_v40 = vadd.f32 %v6409_v28, %v6408_v44  ;;  %v6411_v60 = vpop.f32.mrb[186].mxu1 }
 0x33d   : > { %v7701_v45 = vpop.eup %7700  ;;  %5615 = vst [vmem:[%s9628_s17 + $0x5b8] sm:$0xff] %v7699_v57  ;;  %7720 = vpow2.f32 %v6287_v47  ;;  %v11013_v47 = vld [vmem:[#allocation29_spill] sm:$0xff]  ;;  %v6412_v11 = vpop.f32.mrb[187].mxu1  ;;  %v1393_v57 = vsub.s32 6, %v11014_v9 }
 0x33e   : > { %v7703_v37 = vpop.eup %7702  ;;  %5617 = vst [vmem:[%s9628_s17 + $0x5c8] sm:$0xff] %v7701_v45  ;;  %7722 = vpow2.f32 %v6286_v19  ;;  %v6667_v21 = vadd.f32 %v11013_v47, %v9578_v49  ;;  %v6301_v19 = vmul.f32 -1.442695, %v6666_v14  ;;  %v6300_v49 = vmul.f32 -1.442695, %v6603_v23 }
 0x33f   : > { %v7705_v8 = vpop.eup %7704  ;;  %5621 = vst [vmem:[%s9628_s17 + $0x5e8] sm:$0xff] %v7703_v37  ;;  %7724 = vpow2.f32 %v6288_v46  ;;  %v10325_v38 = vadd.f32 %v6412_v11, %v6411_v60  ;;  %v1389_v14 = vsub.s32 5, %v11014_v9 }
 0x340   : > { %v7707_v42 = vpop.eup %7706  ;;  %5623 = vst [vmem:[%s9628_s17 + $0x5f8] sm:$0xff] %v7705_v8  ;;  %7726 = vpow2.f32 %v6292_v7  ;;  %v6302_v16 = vmul.f32 -1.442695, %v6667_v21  ;;  %v8148_v21 = vld [vmem:[%s10835_s4] sm:$0x7f] }
 0x341   : > { %v7709_v39 = vpop.eup %7708  ;;  %5622 = vst [vmem:[%s9628_s17 + $0x5f0] sm:$0xff] %v7707_v42  ;;  %7728 = vpow2.f32 %v6294_v34  ;;  %v10342_v28 = vrot.slane %v8148_v21, %v1393_v57  ;;  %v10344_v42 = vrot.slane %v8148_v21, %v1385_v58 }
 0x342   : > { %v7711_v27 = vpop.eup %7710  ;;  %5624 = vst [vmem:[%s9628_s17 + $0x600] sm:$0xff] %v7709_v39  ;;  %7730 = vpow2.f32 %v6293_v56  ;;  %v6414_v46 = vpop.f32.mrb[188].mxu1  ;;  %v10346_v39 = vrot.slane %v8148_v21, %v1389_v14 }
 0x343   : > { %v7713_v25 = vpop.eup %7712  ;;  %5628 = vst [vmem:[%s9628_s17 + $0x620] sm:$0xff] %v7711_v27  ;;  %7732 = vpow2.f32 %v6295_v54  ;;  %v6415_v7 = vpop.f32.mrb[189].mxu1  ;;  %v3803_v21 = vadd.f32 %v10069_v48, %v10342_v28 }
 0x344   : > { %v7715_v32 = vpop.eup %7714  ;;  %5630 = vst [vmem:[%s9628_s17 + $0x630] sm:$0xff] %v7713_v25  ;;  %7734 = vpow2.f32 %v6299_v5  ;;  %v10334_v34 = vadd.f32 %v6415_v7, %v6414_v46  ;;  %v6417_v13 = vpop.f32.mrb[190].mxu1 }
 0x345   : > { %v7717_v12 = vpop.eup %7716  ;;  %5629 = vst [vmem:[%s9628_s17 + $0x628] sm:$0xff] %v7715_v32  ;;  %7736 = vpow2.f32 %v6301_v19  ;;  %v6418_v36 = vpop.f32.mrb[191].mxu1 }
 0x346   : > { %v7719_v63 = vpop.eup %7718  ;;  %5631 = vst [vmem:[%s9628_s17 + $0x638] sm:$0xff] %v7717_v12  ;;  %7738 = vpow2.f32 %v6300_v49  ;;  %v10337_v8 = vadd.f32 %v6418_v36, %v6417_v13 }
 0x347   : > { %v7721_v18 = vpop.eup %7720  ;;  %5635 = vst [vmem:[%s9628_s17 + $0x658] sm:$0xff] %v7719_v63  ;;  %7740 = vpow2.f32 %v6302_v16  ;;  %v3800_v63 = vadd.f32 %v10063_v62, %v10342_v28 }
 0x348   : > { %v7723_v35 = vpop.eup %7722  ;;  %v4964_v45 = vadd.f32 1.0, %v7721_v18 }
 0x349   : > { %v7725_v37 = vpop.eup %7724  ;;  %v4963_v56 = vadd.f32 1.0, %v7723_v35 }
 0x34a   : > { %v7727_v23 = vpop.eup %7726  ;;  %7742 = vrcp.f32 %v4964_v45  ;;  %v4965_v44 = vadd.f32 1.0, %v7725_v37  ;;  %v3606_v25 = vpop.f32.mrb[128].mxu0 }
 0x34b   : > { %v7729_v54 = vpop.eup %7728  ;;  %7744 = vrcp.f32 %v4963_v56  ;;  %v4969_v47 = vadd.f32 1.0, %v7727_v23  ;;  %v6436_v16 = vpop.f32.mrb[192].mxu1  ;;  %v6668_v46 = vadd.f32 %v3606_v25, %v10344_v42 }
 0x34c   : > { %v7731_v5 = vpop.eup %7730  ;;  %7746 = vrcp.f32 %v4965_v44  ;;  %v4971_v60 = vadd.f32 1.0, %v7729_v54  ;;  %v3608_v18 = vpop.f32.mrb[129].mxu0 }
 0x34d   : > { %v7733_v19 = vpop.eup %7732  ;;  %7748 = vrcp.f32 %v4969_v47  ;;  %v4970_v11 = vadd.f32 1.0, %v7731_v5  ;;  %v6437_v9 = vpop.f32.mrb[193].mxu1  ;;  %v6669_v58 = vadd.f32 %v3608_v18, %v10346_v39  ;;  %v6086_v56 = vmul.f32 -1.442695, %v6668_v46 }
 0x34e   : > { %v7735_v27 = vpop.eup %7734  ;;  %7750 = vrcp.f32 %v4971_v60  ;;  %v4972_v49 = vadd.f32 1.0, %v7733_v19  ;;  %v6438_v35 = vadd.f32 %v6437_v9, %v6436_v16  ;;  %v3610_v45 = vpop.f32.mrb[130].mxu0 }
 0x34f   : > { %v7737_v32 = vpop.eup %7736  ;;  %7752 = vrcp.f32 %v4970_v11  ;;  %v4976_v12 = vadd.f32 1.0, %v7735_v27  ;;  %v6439_v13 = vpop.f32.mrb[194].mxu1  ;;  %v6670_v36 = vadd.f32 %v3610_v45, %v10344_v42  ;;  %v6087_v54 = vmul.f32 -1.442695, %v6669_v58 }
 0x350   : > { %v7739_v57 = vpop.eup %7738  ;;  %7754 = vrcp.f32 %v4972_v49  ;;  %v4978_v7 = vadd.f32 1.0, %v7737_v32  ;;  %v3612_v62 = vpop.f32.mrb[131].mxu0  ;;  %v3961_v47 = vadd.f32 %v6438_v35, %v3800_v63  ;;  %v3808_v58 = vadd.f32 %v10095_v51, %v10342_v28 }
 0x351   : > { %v7741_v14 = vpop.eup %7740  ;;  %7756 = vrcp.f32 %v4976_v12  ;;  %v4977_v37 = vadd.f32 1.0, %v7739_v57  ;;  %v6440_v23 = vpop.f32.mrb[195].mxu1  ;;  %v6671_v5 = vadd.f32 %v3612_v62, %v10346_v39  ;;  %v6093_v27 = vmul.f32 -1.442695, %v6670_v36 }
 0x352   : > { %7758 = vrcp.f32 %v4978_v7  ;;  %v4979_v44 = vadd.f32 1.0, %v7741_v14  ;;  %v6441_v60 = vadd.f32 %v6440_v23, %v6439_v13  ;;  %v6088_v11 = vmul.f32 -1.442695, %v3961_v47  ;;  %v3616_v12 = vpop.f32.mrb[132].mxu0  ;;  %v6442_v63 = vpop.f32.mrb[196].mxu1 }
 0x353   : > { %7760 = vrcp.f32 %v4977_v37  ;;  %v6094_v25 = vmul.f32 -1.442695, %v6671_v5  ;;  %v6672_v18 = vadd.f32 %v3616_v12, %v10344_v42  ;;  %v3618_v9 = vpop.f32.mrb[133].mxu0  ;;  %v6443_v57 = vpop.f32.mrb[197].mxu1  ;;  %v3811_v5 = vadd.f32 %v10101_v61, %v10342_v28 }
 0x354   : > { %v7743_v19 = vpop.eup %7742  ;;  %7762 = vrcp.f32 %v4979_v44  ;;  %v3964_v16 = vadd.f32 %v6441_v60, %v3803_v21  ;;  %v6673_v35 = vadd.f32 %v3618_v9, %v10346_v39  ;;  %v6444_v45 = vadd.f32 %v6443_v57, %v6442_v63  ;;  %v3620_v13 = vpop.f32.mrb[134].mxu0 }
 0x355   : > { %v7745_v49 = vpop.eup %7744  ;;  %5637 = vst [vmem:[%s9628_s17 + $0x668] sm:$0xff] %v7743_v19  ;;  %7764 = vpow2.f32 %v6086_v56  ;;  %v6445_v14 = vpop.f32.mrb[198].mxu1  ;;  %v6100_v56 = vmul.f32 -1.442695, %v6672_v18  ;;  %v6674_v36 = vadd.f32 %v3620_v13, %v10344_v42  ;;  %v3816_v57 = vadd.f32 %v10114_v29, %v10342_v28 }
 0x356   : > { %v7747_v32 = vpop.eup %7746  ;;  %5636 = vst [vmem:[%s9628_s17 + $0x660] sm:$0xff] %v7745_v49  ;;  %7766 = vpow2.f32 %v6087_v54  ;;  %v6095_v46 = vmul.f32 -1.442695, %v3964_v16  ;;  %v3622_v62 = vpop.f32.mrb[135].mxu0  ;;  %v6101_v51 = vmul.f32 -1.442695, %v6673_v35  ;;  %v3969_v54 = vadd.f32 %v6444_v45, %v3808_v58 }
 0x357   : > { %v7749_v48 = vpop.eup %7748  ;;  %5638 = vst [vmem:[%s9628_s17 + $0x670] sm:$0xff] %v7747_v32  ;;  %7768 = vpow2.f32 %v6088_v11  ;;  %v6446_v23 = vpop.f32.mrb[199].mxu1  ;;  %v6675_v47 = vadd.f32 %v3622_v62, %v10346_v39  ;;  %v6107_v60 = vmul.f32 -1.442695, %v6674_v36 }
 0x358   : > { %v7751_v7 = vpop.eup %7750  ;;  %5642 = vst [vmem:[%s9628_s17 + $0x690] sm:$0xff] %v7749_v48  ;;  %7770 = vpow2.f32 %v6093_v27  ;;  %v6447_v19 = vadd.f32 %v6446_v23, %v6445_v14  ;;  %v6102_v27 = vmul.f32 -1.442695, %v3969_v54 }
 0x359   : > { %v7753_v37 = vpop.eup %7752  ;;  %5644 = vst [vmem:[%s9628_s17 + $0x6a0] sm:$0xff] %v7751_v7  ;;  %7772 = vpow2.f32 %v6094_v25  ;;  %v6108_v49 = vmul.f32 -1.442695, %v6675_v47 }
 0x35a   : > { %v7755_v44 = vpop.eup %7754  ;;  %5643 = vst [vmem:[%s9628_s17 + $0x698] sm:$0xff] %v7753_v37  ;;  %7774 = vpow2.f32 %v6095_v46  ;;  %v3972_v16 = vadd.f32 %v6447_v19, %v3811_v5  ;;  %v3626_v12 = vpop.f32.mrb[136].mxu0 }
 0x35b   : > { %v7757_v21 = vpop.eup %7756  ;;  %5645 = vst [vmem:[%s9628_s17 + $0x6a8] sm:$0xff] %v7755_v44  ;;  %7776 = vpow2.f32 %v6100_v56  ;;  %v6448_v63 = vpop.f32.mrb[200].mxu1 }
 0x35c   : > { %v7759_v11 = vpop.eup %7758  ;;  %5649 = vst [vmem:[%s9628_s17 + $0x6c8] sm:$0xff] %v7757_v21  ;;  %7778 = vpow2.f32 %v6101_v51  ;;  %v6109_v61 = vmul.f32 -1.442695, %v3972_v16  ;;  %v3628_v46 = vpop.f32.mrb[137].mxu0  ;;  %v3819_v51 = vadd.f32 %v10116_v31, %v10342_v28  ;;  %v6676_v21 = vadd.f32 %v3626_v12, %v10344_v42 }
 0x35d   : > { %v7761_v25 = vpop.eup %7760  ;;  %5651 = vst [vmem:[%s9628_s17 + $0x6d8] sm:$0xff] %v7759_v11  ;;  %7780 = vpow2.f32 %v6107_v60  ;;  %v6449_v18 = vpop.f32.mrb[201].mxu1  ;;  %v3824_v31 = vadd.f32 %v10128_v33, %v10342_v28 }
 0x35e   : > { %v7763_v32 = vpop.eup %7762  ;;  %5650 = vst [vmem:[%s9628_s17 + $0x6d0] sm:$0xff] %v7761_v25  ;;  %7782 = vpow2.f32 %v6102_v27  ;;  %v6450_v58 = vadd.f32 %v6449_v18, %v6448_v63  ;;  %v3630_v35 = vpop.f32.mrb[138].mxu0 }
 0x35f   : > { %v7765_v48 = vpop.eup %7764  ;;  %5652 = vst [vmem:[%s9628_s17 + $0x6e0] sm:$0xff] %v7763_v32  ;;  %7784 = vpow2.f32 %v6108_v49  ;;  %v6451_v45 = vpop.f32.mrb[202].mxu1  ;;  %v6678_v33 = vadd.f32 %v3630_v35, %v10344_v42 }
 0x360   : > { %v7767_v9 = vpop.eup %7766  ;;  %v4763_v7 = vadd.f32 1.0, %v7765_v48  ;;  %7786 = vpow2.f32 %v6109_v61  ;;  %v3632_v37 = vpop.f32.mrb[139].mxu0  ;;  %v3977_v23 = vadd.f32 %v6450_v58, %v3816_v57  ;;  %v6677_v48 = vadd.f32 %v3628_v46, %v10346_v39 }
 0x361   : > { %v7769_v13 = vpop.eup %7768  ;;  %v4764_v14 = vadd.f32 1.0, %v7767_v9  ;;  %v6452_v56 = vpop.f32.mrb[203].mxu1  ;;  %v3827_v9 = vadd.f32 %v10134_v50, %v10342_v28 }
 0x362   : > { %v7771_v36 = vpop.eup %7770  ;;  %7788 = vrcp.f32 %v4763_v7  ;;  %v4765_v62 = vadd.f32 1.0, %v7769_v13  ;;  %v6453_v5 = vadd.f32 %v6452_v56, %v6451_v45  ;;  %v3636_v25 = vpop.f32.mrb[140].mxu0  ;;  %v6114_v7 = vmul.f32 -1.442695, %v6676_v21 }
 0x363   : > { %v7773_v44 = vpop.eup %7772  ;;  %7790 = vrcp.f32 %v4764_v14  ;;  %v4770_v54 = vadd.f32 1.0, %v7771_v36  ;;  %v6454_v16 = vpop.f32.mrb[204].mxu1  ;;  %v6680_v35 = vadd.f32 %v3636_v25, %v10344_v42 }
 0x364   : > { %v7775_v29 = vpop.eup %7774  ;;  %7792 = vrcp.f32 %v4765_v62  ;;  %v4771_v47 = vadd.f32 1.0, %v7773_v44  ;;  %v3980_v49 = vadd.f32 %v6453_v5, %v3819_v51  ;;  %v3638_v61 = vpop.f32.mrb[141].mxu0  ;;  %v6679_v44 = vadd.f32 %v3632_v37, %v10346_v39 }
 0x365   : > { %v7777_v60 = vpop.eup %7776  ;;  %7794 = vrcp.f32 %v4770_v54  ;;  %v4772_v19 = vadd.f32 1.0, %v7775_v29  ;;  %v6455_v12 = vpop.f32.mrb[205].mxu1  ;;  %v6115_v51 = vmul.f32 -1.442695, %v6677_v48  ;;  %v6116_v5 = vmul.f32 -1.442695, %v3977_v23 }
 0x366   : > { %v7779_v11 = vpop.eup %7778  ;;  %7796 = vrcp.f32 %v4771_v47  ;;  %v4777_v27 = vadd.f32 1.0, %v7777_v60  ;;  %v3640_v58 = vpop.f32.mrb[142].mxu0  ;;  %v6456_v56 = vadd.f32 %v6455_v12, %v6454_v16  ;;  %v6122_v16 = vmul.f32 -1.442695, %v6679_v44 }
 0x367   : > { %v7781_v32 = vpop.eup %7780  ;;  %7798 = vrcp.f32 %v4772_v19  ;;  %v4778_v63 = vadd.f32 1.0, %v7779_v11  ;;  %v6457_v45 = vpop.f32.mrb[206].mxu1  ;;  %v6121_v19 = vmul.f32 -1.442695, %v6678_v33  ;;  %v6681_v11 = vadd.f32 %v3638_v61, %v10346_v39 }
 0x368   : > { %v7783_v18 = vpop.eup %7782  ;;  %7800 = vrcp.f32 %v4777_v27  ;;  %v4784_v57 = vadd.f32 1.0, %v7781_v32  ;;  %v3642_v36 = vpop.f32.mrb[143].mxu0  ;;  %v3985_v54 = vadd.f32 %v6456_v56, %v3824_v31  ;;  %v3832_v23 = vadd.f32 %v10158_v4, %v10342_v28 }
 0x369   : > { %v7785_v13 = vpop.eup %7784  ;;  %7802 = vrcp.f32 %v4778_v63  ;;  %v4779_v14 = vadd.f32 1.0, %v7783_v18  ;;  %v6458_v62 = vpop.f32.mrb[207].mxu1  ;;  %v6123_v25 = vmul.f32 -1.442695, %v3980_v49  ;;  %v6682_v48 = vadd.f32 %v3640_v58, %v10344_v42 }
 0x36a   : > { %7804 = vrcp.f32 %v4784_v57  ;;  %v4785_v46 = vadd.f32 1.0, %v7785_v13  ;;  %v7787_v50 = vpop.eup %7786  ;;  %v6459_v29 = vadd.f32 %v6458_v62, %v6457_v45  ;;  %v3646_v32 = vpop.f32.mrb[144].mxu0  ;;  %v6683_v57 = vadd.f32 %v3642_v36, %v10346_v39 }
 0x36b   : > { %7806 = vrcp.f32 %v4779_v14  ;;  %v4786_v21 = vadd.f32 1.0, %v7787_v50  ;;  %v6460_v31 = vpop.f32.mrb[208].mxu1  ;;  %v10396_v61 = vpop.f32.mrb[145].mxu0  ;;  %v6129_v49 = vmul.f32 -1.442695, %v6681_v11  ;;  %v3835_v56 = vadd.f32 %v10166_v17, %v10342_v28 }
 0x36c   : > { %v7789_v47 = vpop.eup %7788  ;;  %7808 = vrcp.f32 %v4785_v46  ;;  %v3988_v37 = vadd.f32 %v6459_v29, %v3827_v9  ;;  %v6461_v12 = vpop.f32.mrb[209].mxu1  ;;  %v6128_v9 = vmul.f32 -1.442695, %v6680_v35  ;;  %v6130_v36 = vmul.f32 -1.442695, %v3985_v54 }
 0x36d   : > { %v7791_v60 = vpop.eup %7790  ;;  %5435 = vst [vmem:[%s9628_s17 + $0x20] sm:$0xff] %v7789_v47  ;;  %7810 = vpow2.f32 %v6114_v7  ;;  %v6462_v7 = vadd.f32 %v6461_v12, %v6460_v31  ;;  %v10400_v4 = vpop.f32.mrb[146].mxu0  ;;  %v6135_v44 = vmul.f32 -1.442695, %v6682_v48  ;;  %v6684_v50 = vadd.f32 %v3646_v32, %v10344_v42 }
 0x36e   : > { %v7793_v27 = vpop.eup %7792  ;;  %5436 = vst [vmem:[%s9628_s17 + $0x28] sm:$0xff] %v7791_v60  ;;  %7812 = vrcp.f32 %v4786_v21  ;;  %v6463_v45 = vpop.f32.mrb[210].mxu1  ;;  %v6136_v17 = vmul.f32 -1.442695, %v6683_v57  ;;  %v6137_v21 = vmul.f32 -1.442695, %v3988_v37  ;;  %v3840_v37 = vadd.f32 %v10178_v43, %v10342_v28 }
 0x36f   : > { %v7795_v63 = vpop.eup %7794  ;;  %5438 = vst.msk [vmem:[%s9628_s17 + $0x30] sm:$0xff] %vm5437_vm4, %v7793_v27  ;;  %7814 = vpow2.f32 %v6115_v51  ;;  %v10403_v58 = vpop.f32.mrb[147].mxu0  ;;  %v10409_v62 = vadd.f32 %v6462_v7, %v3832_v23  ;;  %v6142_v11 = vmul.f32 -1.442695, %v6684_v50  ;;  %v6685_v50 = vadd.f32 %v10396_v61, %v10346_v39 }
 0x370   : > { %v7797_v18 = vpop.eup %7796  ;;  %5443 = vst [vmem:[%s9628_s17 + $0x58] sm:$0xff] %v7795_v63  ;;  %7816 = vpow2.f32 %v6116_v5  ;;  %v6464_v14 = vpop.f32.mrb[211].mxu1 }
 0x371   : > { %v7799_v13 = vpop.eup %7798  ;;  %5444 = vst [vmem:[%s9628_s17 + $0x60] sm:$0xff] %v7797_v18  ;;  %7818 = vpow2.f32 %v6121_v19  ;;  %v6465_v51 = vadd.f32 %v6464_v14, %v6463_v45 }
 0x372   : > { %v7801_v33 = vpop.eup %7800  ;;  %5445 = vst.msk [vmem:[%s9628_s17 + $0x68] sm:$0xff] %vm5437_vm4, %v7799_v13  ;;  %7820 = vpow2.f32 %v6122_v16  ;;  %v10419_v35 = vpop.f32.mrb[148].mxu0 }
 0x373   : > { %v7803_v46 = vpop.eup %7802  ;;  %5450 = vst [vmem:[%s9628_s17 + $0x90] sm:$0xff] %v7801_v33  ;;  %7822 = vpow2.f32 %v6123_v25  ;;  %v10415_v54 = vadd.f32 %v6465_v51, %v3835_v56  ;;  %v6466_v60 = vpop.f32.mrb[212].mxu1 }
 0x374   : > { %v7805_v29 = vpop.eup %7804  ;;  %5451 = vst [vmem:[%s9628_s17 + $0x98] sm:$0xff] %v7803_v46  ;;  %7824 = vpow2.f32 %v6128_v9  ;;  %v10422_v27 = vpop.f32.mrb[149].mxu0 }
 0x375   : > { %v7807_v47 = vpop.eup %7806  ;;  %5457 = vst [vmem:[%s9628_s17 + $0xc8] sm:$0xff] %v7805_v29  ;;  %7826 = vpow2.f32 %v6129_v49  ;;  %v6467_v16 = vpop.f32.mrb[213].mxu1  ;;  %v3843_v49 = vadd.f32 %v10181_v6, %v10342_v28 }
 0x376   : > { %v7809_v5 = vpop.eup %7808  ;;  %5452 = vst.msk [vmem:[%s9628_s17 + $0xa0] sm:$0xff] %vm5437_vm4, %v7807_v47  ;;  %7828 = vpow2.f32 %v6130_v36  ;;  %v6468_v63 = vadd.f32 %v6467_v16, %v6466_v60  ;;  %v10426_v23 = vpop.f32.mrb[150].mxu0 }
 0x377   : > { %v7811_v19 = vpop.eup %7810  ;;  %5458 = vst [vmem:[%s9628_s17 + $0xd0] sm:$0xff] %v7809_v5  ;;  %7830 = vpow2.f32 %v6135_v44  ;;  %v6469_v25 = vpop.f32.mrb[214].mxu1 }
 0x378   : > { %v7813_v32 = vpop.eup %7812  ;;  %v4791_v31 = vadd.f32 1.0, %v7811_v19  ;;  %7832 = vpow2.f32 %v6136_v17  ;;  %v10430_v12 = vpop.f32.mrb[151].mxu0  ;;  %v10432_v7 = vadd.f32 %v6468_v63, %v3840_v37  ;;  %v3848_v19 = vadd.f32 %v10183_v59, %v10342_v28 }
 0x379   : > { %v7815_v48 = vpop.eup %7814  ;;  %5459 = vst.msk [vmem:[%s9628_s17 + $0xd8] sm:$0xff] %vm5437_vm4, %v7813_v32  ;;  %7834 = vpow2.f32 %v6137_v21  ;;  %v6470_v18 = vpop.f32.mrb[215].mxu1  ;;  %v6143_v59 = vmul.f32 -1.442695, %v6685_v50 }
 0x37a   : > { %v7817_v9 = vpop.eup %7816  ;;  %7836 = vrcp.f32 %v4791_v31  ;;  %v4792_v57 = vadd.f32 1.0, %v7815_v48  ;;  %v6471_v33 = vadd.f32 %v6470_v18, %v6469_v25  ;;  %v10440_v29 = vpop.f32.mrb[152].mxu0  ;;  %v6686_v31 = vadd.f32 %v10400_v4, %v10344_v42 }
 0x37b   : > { %v7819_v45 = vpop.eup %7818  ;;  %v4793_v43 = vadd.f32 1.0, %v7817_v9  ;;  %7838 = vpow2.f32 %v6142_v11  ;;  %v6472_v17 = vpop.f32.mrb[216].mxu1  ;;  %v3851_v4 = vadd.f32 %v10189_v52, %v10342_v28  ;;  %v6689_v52 = vadd.f32 %v10422_v27, %v10346_v39 }
 0x37c   : > { %v7821_v13 = vpop.eup %7820  ;;  %7840 = vrcp.f32 %v4792_v57  ;;  %v4798_v14 = vadd.f32 1.0, %v7819_v45  ;;  %v10438_v51 = vadd.f32 %v6471_v33, %v3843_v49  ;;  %v10442_v21 = vpop.f32.mrb[153].mxu0  ;;  %v6151_v27 = vmul.f32 -1.442695, %v10415_v54 }
 0x37d   : > { %v7823_v56 = vpop.eup %7822  ;;  %7842 = vrcp.f32 %v4793_v43  ;;  %v4799_v36 = vadd.f32 1.0, %v7821_v13  ;;  %v6473_v5 = vpop.f32.mrb[217].mxu1  ;;  %v6687_v43 = vadd.f32 %v10403_v58, %v10346_v39 }
 0x37e   : > { %v7825_v46 = vpop.eup %7824  ;;  %7844 = vrcp.f32 %v4798_v14  ;;  %v4800_v44 = vadd.f32 1.0, %v7823_v56  ;;  %v10446_v16 = vpop.f32.mrb[154].mxu0  ;;  %v6474_v63 = vadd.f32 %v6473_v5, %v6472_v17 }
 0x37f   : > { %v7827_v47 = vpop.eup %7826  ;;  %7846 = vrcp.f32 %v4799_v36  ;;  %v4805_v6 = vadd.f32 1.0, %v7825_v46  ;;  %v6475_v61 = vpop.f32.mrb[218].mxu1  ;;  %v6144_v36 = vmul.f32 -1.442695, %v10409_v62  ;;  %v6149_v46 = vmul.f32 -1.442695, %v6686_v31 }
 0x380   : > { %v7829_v60 = vpop.eup %7828  ;;  %7848 = vrcp.f32 %v4800_v44  ;;  %v4806_v11 = vadd.f32 1.0, %v7827_v47  ;;  %v10450_v25 = vpop.f32.mrb[155].mxu0  ;;  %v10454_v13 = vadd.f32 %v6474_v63, %v3848_v19  ;;  %v6688_v44 = vadd.f32 %v10419_v35, %v10344_v42 }
 0x381   : > { %v7831_v32 = vpop.eup %7830  ;;  %7850 = vrcp.f32 %v4805_v6  ;;  %v4807_v37 = vadd.f32 1.0, %v7829_v60  ;;  %v6476_v48 = vpop.f32.mrb[219].mxu1  ;;  %v3856_v62 = vadd.f32 %v10205_v55, %v10342_v28  ;;  %v6150_v35 = vmul.f32 -1.442695, %v6687_v43 }
 0x382   : > { %v7833_v18 = vpop.eup %7832  ;;  %7852 = vrcp.f32 %v4806_v11  ;;  %v4812_v9 = vadd.f32 1.0, %v7831_v32  ;;  %v6477_v33 = vadd.f32 %v6476_v48, %v6475_v61  ;;  %v10466_v47 = vpop.f32.mrb[156].mxu0  ;;  %v6690_v61 = vadd.f32 %v10426_v23, %v10344_v42 }
 0x383   : > { %v7835_v57 = vpop.eup %7834  ;;  %7854 = vrcp.f32 %v4807_v37  ;;  %v4813_v45 = vadd.f32 1.0, %v7833_v18  ;;  %v6478_v6 = vpop.f32.mrb[220].mxu1  ;;  %v6156_v63 = vmul.f32 -1.442695, %v6688_v44  ;;  %v6691_v48 = vadd.f32 %v10430_v12, %v10346_v39 }
 0x384   : > { %v7837_v49 = vpop.eup %7836  ;;  %7856 = vrcp.f32 %v4812_v9  ;;  %v4814_v14 = vadd.f32 1.0, %v7835_v57  ;;  %v10464_v17 = vadd.f32 %v6477_v33, %v3851_v4  ;;  %v10471_v60 = vpop.f32.mrb[157].mxu0  ;;  %v3859_v23 = vadd.f32 %v10213_v2, %v10342_v28 }
 0x385   : > { %v7839_v56 = vpop.eup %7838  ;;  %5464 = vst [vmem:[%s9628_s17 + $0x100] sm:$0xff] %v7837_v49  ;;  %7858 = vrcp.f32 %v4813_v45  ;;  %v6479_v19 = vpop.f32.mrb[221].mxu1  ;;  %v6158_v12 = vmul.f32 -1.442695, %v10432_v7  ;;  %v6692_v43 = vadd.f32 %v10440_v29, %v10344_v42  ;;  %v6163_v2 = vmul.f32 -1.442695, %v6690_v61 }
 0x386   : > { %v7841_v58 = vpop.eup %7840  ;;  %7860 = vrcp.f32 %v4814_v14  ;;  %v4819_v50 = vadd.f32 1.0, %v7839_v56  ;;  %v6480_v32 = vadd.f32 %v6479_v19, %v6478_v6  ;;  %v10478_v37 = vpop.f32.mrb[158].mxu0  ;;  %v6164_v33 = vmul.f32 -1.442695, %v6691_v48 }
 0x387   : > { %v7843_v5 = vpop.eup %7842  ;;  %5465 = vst [vmem:[%s9628_s17 + $0x108] sm:$0xff] %v7841_v58  ;;  %7862 = vpow2.f32 %v6143_v59  ;;  %v6481_v55 = vpop.f32.mrb[222].mxu1  ;;  %v6157_v59 = vmul.f32 -1.442695, %v6689_v52  ;;  %v6693_v56 = vadd.f32 %v10442_v21, %v10346_v39  ;;  %v6165_v29 = vmul.f32 -1.442695, %v10438_v51 }
 0x388   : > { %v7845_v11 = vpop.eup %7844  ;;  %5466 = vst.msk [vmem:[%s9628_s17 + $0x110] sm:$0xff] %vm5437_vm4, %v7843_v5  ;;  %7864 = vrcp.f32 %v4819_v50  ;;  %v10483_v18 = vpop.f32.mrb[159].mxu0  ;;  %v10488_v57 = vadd.f32 %v6480_v32, %v3856_v62  ;;  %v6170_v50 = vmul.f32 -1.442695, %v6692_v43  ;;  %v3864_v5 = vadd.f32 %v10227_v30, %v10342_v28 }
 0x389   : > { %v7847_v31 = vpop.eup %7846  ;;  %5471 = vst [vmem:[%s9628_s17 + $0x138] sm:$0xff] %v7845_v11  ;;  %7866 = vpow2.f32 %v6144_v36  ;;  %v6482_v9 = vpop.f32.mrb[223].mxu1  ;;  %v6171_v11 = vmul.f32 -1.442695, %v6693_v56 }
 0x38a   : > { %v7849_v54 = vpop.eup %7848  ;;  %5472 = vst [vmem:[%s9628_s17 + $0x140] sm:$0xff] %v7847_v31  ;;  %7868 = vpow2.f32 %v6149_v46  ;;  %v6483_v49 = vadd.f32 %v6482_v9, %v6481_v55  ;;  %v10504_v46 = vpop.f32.mrb[160].mxu0 }
 0x38b   : > { %v7851_v45 = vpop.eup %7850  ;;  %5473 = vst.msk [vmem:[%s9628_s17 + $0x148] sm:$0xff] %vm5437_vm4, %v7849_v54  ;;  %7870 = vpow2.f32 %v6150_v35  ;;  %v6484_v44 = vpop.f32.mrb[224].mxu1 }
 0x38c   : > { %v7853_v4 = vpop.eup %7852  ;;  %5478 = vst [vmem:[%s9628_s17 + $0x170] sm:$0xff] %v7851_v45  ;;  %7872 = vpow2.f32 %v6151_v27  ;;  %v10499_v36 = vadd.f32 %v6483_v49, %v3859_v23  ;;  %v10507_v52 = vpop.f32.mrb[161].mxu0 }
 0x38d   : > { %v7855_v14 = vpop.eup %7854  ;;  %5479 = vst [vmem:[%s9628_s17 + $0x178] sm:$0xff] %v7853_v4  ;;  %7874 = vpow2.f32 %v6156_v63  ;;  %v6485_v21 = vpop.f32.mrb[225].mxu1  ;;  %v3867_v63 = vadd.f32 %v10231_v26, %v10342_v28 }
 0x38e   : > { %v7857_v7 = vpop.eup %7856  ;;  %5480 = vst.msk [vmem:[%s9628_s17 + $0x180] sm:$0xff] %vm5437_vm4, %v7855_v14  ;;  %7876 = vpow2.f32 %v6157_v59  ;;  %v6486_v62 = vadd.f32 %v6485_v21, %v6484_v44  ;;  %v10512_v51 = vpop.f32.mrb[162].mxu0 }
 0x38f   : > { %v7859_v58 = vpop.eup %7858  ;;  %5485 = vst [vmem:[%s9628_s17 + $0x1a8] sm:$0xff] %v7857_v7  ;;  %7878 = vpow2.f32 %v6158_v12  ;;  %v6487_v35 = vpop.f32.mrb[226].mxu1  ;;  %v3872_v7 = vadd.f32 %v10234_v0, %v10342_v28  ;;  %v3875_v0 = vadd.f32 %v10238_v53, %v10342_v28 }
 0x390   : > { %v7861_v6 = vpop.eup %7860  ;;  %5486 = vst [vmem:[%s9628_s17 + $0x1b0] sm:$0xff] %v7859_v58  ;;  %7880 = vpow2.f32 %v6163_v2  ;;  %v10516_v27 = vpop.f32.mrb[163].mxu0  ;;  %v10518_v31 = vadd.f32 %v6486_v62, %v3864_v5 }
 0x391   : > { %v7863_v19 = vpop.eup %7862  ;;  %5487 = vst.msk [vmem:[%s9628_s17 + $0x1b8] sm:$0xff] %vm5437_vm4, %v7861_v6  ;;  %7882 = vpow2.f32 %v6164_v33  ;;  %v6488_v61 = vpop.f32.mrb[227].mxu1 }
 0x392   : > { %v7865_v32 = vpop.eup %7864  ;;  %v4820_v55 = vadd.f32 1.0, %v7863_v19  ;;  %7884 = vpow2.f32 %v6165_v29  ;;  %v6489_v48 = vadd.f32 %v6488_v61, %v6487_v35  ;;  %v10525_v49 = vpop.f32.mrb[164].mxu0 }
 0x393   : > { %v7867_v30 = vpop.eup %7866  ;;  %5492 = vst [vmem:[%s9628_s17 + $0x1e0] sm:$0xff] %v7865_v32  ;;  %7886 = vpow2.f32 %v6170_v50  ;;  %v6490_v4 = vpop.f32.mrb[228].mxu1 }
 0x394   : > { %v7869_v9 = vpop.eup %7868  ;;  %7888 = vrcp.f32 %v4820_v55  ;;  %v4821_v54 = vadd.f32 1.0, %v7867_v30  ;;  %v10523_v45 = vadd.f32 %v6489_v48, %v3867_v63  ;;  %v10527_v14 = vpop.f32.mrb[165].mxu0  ;;  %v6694_v55 = vadd.f32 %v10446_v16, %v10344_v42 }
 0x395   : > { %v7871_v23 = vpop.eup %7870  ;;  %v4826_v59 = vadd.f32 1.0, %v7869_v9  ;;  %7890 = vpow2.f32 %v6171_v11  ;;  %v6491_v33 = vpop.f32.mrb[229].mxu1  ;;  %v6695_v48 = vadd.f32 %v10450_v25, %v10346_v39  ;;  %v3880_v25 = vadd.f32 %v10250_v24, %v10342_v28 }
 0x396   : > { %v7873_v12 = vpop.eup %7872  ;;  %7892 = vrcp.f32 %v4821_v54  ;;  %v4827_v43 = vadd.f32 1.0, %v7871_v23  ;;  %v6492_v44 = vadd.f32 %v6491_v33, %v6490_v4  ;;  %v10531_v58 = vpop.f32.mrb[166].mxu0  ;;  %v6177_v33 = vmul.f32 -1.442695, %v6694_v55 }
 0x397   : > { %v7875_v2 = vpop.eup %7874  ;;  %7894 = vrcp.f32 %v4826_v59  ;;  %v4828_v26 = vadd.f32 1.0, %v7873_v12  ;;  %v6493_v50 = vpop.f32.mrb[230].mxu1  ;;  %v6172_v59 = vmul.f32 -1.442695, %v10454_v13  ;;  %v6697_v13 = vadd.f32 %v10471_v60, %v10346_v39 }
 0x398   : > { %v7877_v56 = vpop.eup %7876  ;;  %7896 = vrcp.f32 %v4827_v43  ;;  %v4833_v29 = vadd.f32 1.0, %v7875_v2  ;;  %v10533_v5 = vpop.f32.mrb[167].mxu0  ;;  %v10535_v11 = vadd.f32 %v6492_v44, %v3872_v7  ;;  %v6696_v43 = vadd.f32 %v10466_v47, %v10344_v42 }
 0x399   : > { %v7879_v21 = vpop.eup %7878  ;;  %7898 = vrcp.f32 %v4828_v26  ;;  %v4834_v6 = vadd.f32 1.0, %v7877_v56  ;;  %v6494_v62 = vpop.f32.mrb[231].mxu1  ;;  %v6179_v60 = vmul.f32 -1.442695, %v10464_v17  ;;  %v6185_v17 = vmul.f32 -1.442695, %v6697_v13 }
 0x39a   : > { %v7881_v35 = vpop.eup %7880  ;;  %7900 = vrcp.f32 %v4833_v29  ;;  %v4835_v19 = vadd.f32 1.0, %v7879_v21  ;;  %v6495_v9 = vadd.f32 %v6494_v62, %v6493_v50  ;;  %v3883_v29 = vadd.f32 %v10258_v20, %v10342_v28 }
 0x39b   : > { %v7883_v61 = vpop.eup %7882  ;;  %7902 = vrcp.f32 %v4834_v6  ;;  %v4840_v32 = vadd.f32 1.0, %v7881_v35  ;;  %v6178_v50 = vmul.f32 -1.442695, %v6695_v48  ;;  %v6698_v62 = vadd.f32 %v10478_v37, %v10344_v42 }
 0x39c   : > { %v7885_v30 = vpop.eup %7884  ;;  %7904 = vrcp.f32 %v4835_v19  ;;  %v4841_v63 = vadd.f32 1.0, %v7883_v61  ;;  %v10546_v16 = vadd.f32 %v6495_v9, %v3875_v0  ;;  %v10548_v4 = vpop.f32.mrb[168].mxu0  ;;  %v6184_v0 = vmul.f32 -1.442695, %v6696_v43 }
 0x39d   : > { %v7887_v54 = vpop.eup %7886  ;;  %7906 = vrcp.f32 %v4840_v32  ;;  %v4842_v23 = vadd.f32 1.0, %v7885_v30  ;;  %v6496_v2 = vpop.f32.mrb[232].mxu1  ;;  %v6699_v32 = vadd.f32 %v10483_v18, %v10346_v39  ;;  %v6186_v48 = vmul.f32 -1.442695, %v10488_v57 }
 0x39e   : > { %v7889_v12 = vpop.eup %7888  ;;  %7908 = vrcp.f32 %v4841_v63  ;;  %v4847_v53 = vadd.f32 1.0, %v7887_v54  ;;  %v10555_v56 = vpop.f32.mrb[169].mxu0  ;;  %v6700_v9 = vadd.f32 %v10504_v46, %v10344_v42  ;;  %v6193_v46 = vmul.f32 -1.442695, %v10499_v36 }
 0x39f   : > { %v7891_v26 = vpop.eup %7890  ;;  %5493 = vst [vmem:[%s9628_s17 + $0x1e8] sm:$0xff] %v7889_v12  ;;  %7910 = vrcp.f32 %v4842_v23  ;;  %v6497_v7 = vpop.f32.mrb[233].mxu1  ;;  %v6191_v23 = vmul.f32 -1.442695, %v6698_v62  ;;  %v3891_v62 = vadd.f32 %v10280_v10, %v10342_v28 }
 0x3a0   : > { %v7893_v47 = vpop.eup %7892  ;;  %7912 = vrcp.f32 %v4847_v53  ;;  %v4848_v44 = vadd.f32 1.0, %v7891_v26  ;;  %v10559_v21 = vpop.f32.mrb[170].mxu0  ;;  %v6498_v35 = vadd.f32 %v6497_v7, %v6496_v2  ;;  %v6192_v53 = vmul.f32 -1.442695, %v6699_v32 }
 0x3a1   : > { %v6499_v24 = vpop.f32.mrb[234].mxu1  ;;  %v7895_v6 = vpop.eup %7894  ;;  %5494 = vst.msk [vmem:[%s9628_s17 + $0x1f0] sm:$0xff] %vm5437_vm4, %v7893_v47  ;;  %7914 = vpow2.f32 %v6172_v59  ;;  %v6701_v59 = vadd.f32 %v10507_v52, %v10346_v39  ;;  %v3888_v52 = vadd.f32 %v10276_v22, %v10342_v28  ;;  %v6198_v13 = vmul.f32 -1.442695, %v6700_v9 }
 0x3a2   : > { %v10566_v19 = vpop.f32.mrb[171].mxu0  ;;  %v6500_v20 = vpop.f32.mrb[235].mxu1  ;;  %5499 = vst [vmem:[%s9628_s17 + $0x218] sm:$0xff] %v7895_v6  ;;  %7916 = vrcp.f32 %v4848_v44  ;;  %v10572_v37 = vadd.f32 %v6498_v35, %v3880_v25  ;;  %v6200_v35 = vmul.f32 -1.442695, %v10518_v31 }
 0x3a3   : > { %v7897_v61 = vpop.eup %7896  ;;  %v6501_v55 = vadd.f32 %v6500_v20, %v6499_v24  ;;  %7918 = vpow2.f32 %v6177_v33  ;;  %v6199_v36 = vmul.f32 -1.442695, %v6701_v59  ;;  %v3896_v59 = vadd.f32 %v10285_v15, %v10342_v28 }
 0x3a4   : > { %v7899_v30 = vpop.eup %7898  ;;  %5500 = vst [vmem:[%s9628_s17 + $0x220] sm:$0xff] %v7897_v61  ;;  %7920 = vpow2.f32 %v6178_v50  ;;  %v10585_v43 = vpop.f32.mrb[172].mxu0 }
 0x3a5   : > { %v7901_v63 = vpop.eup %7900  ;;  %5501 = vst.msk [vmem:[%s9628_s17 + $0x228] sm:$0xff] %vm5437_vm4, %v7899_v30  ;;  %v10579_v54 = vadd.f32 %v6501_v55, %v3883_v29  ;;  %7922 = vpow2.f32 %v6179_v60  ;;  %v6502_v57 = vpop.f32.mrb[236].mxu1 }
 0x3a6   : > { %v7903_v18 = vpop.eup %7902  ;;  %5506 = vst [vmem:[%s9628_s17 + $0x250] sm:$0xff] %v7901_v63  ;;  %7924 = vpow2.f32 %v6184_v0  ;;  %v10590_v26 = vpop.f32.mrb[173].mxu0 }
 0x3a7   : > { %v7905_v12 = vpop.eup %7904  ;;  %5507 = vst [vmem:[%s9628_s17 + $0x258] sm:$0xff] %v7903_v18  ;;  %7926 = vpow2.f32 %v6185_v17  ;;  %v6503_v25 = vpop.f32.mrb[237].mxu1 }
 0x3a8   : > { %v7907_v2 = vpop.eup %7906  ;;  %5508 = vst.msk [vmem:[%s9628_s17 + $0x260] sm:$0xff] %vm5437_vm4, %v7905_v12  ;;  %7928 = vpow2.f32 %v6186_v48  ;;  %v6504_v7 = vadd.f32 %v6503_v25, %v6502_v57  ;;  %v10595_v47 = vpop.f32.mrb[174].mxu0 }
 0x3a9   : > { %v7909_v33 = vpop.eup %7908  ;;  %5513 = vst [vmem:[%s9628_s17 + $0x288] sm:$0xff] %v7907_v2  ;;  %v6505_v29 = vpop.f32.mrb[238].mxu1  ;;  %7930 = vpow2.f32 %v6191_v23 }
 0x3aa   : > { %v7911_v44 = vpop.eup %7910  ;;  %5514 = vst [vmem:[%s9628_s17 + $0x290] sm:$0xff] %v7909_v33  ;;  %v10598_v50 = vpop.f32.mrb[175].mxu0  ;;  %7932 = vpow2.f32 %v6192_v53  ;;  %v10602_v22 = vadd.f32 %v6504_v7, %v3888_v52 }
 0x3ab   : > { %v6506_v24 = vpop.f32.mrb[239].mxu1  ;;  %v7913_v6 = vpop.eup %7912  ;;  %5515 = vst.msk [vmem:[%s9628_s17 + $0x298] sm:$0xff] %vm5437_vm4, %v7911_v44  ;;  %7934 = vpow2.f32 %v6193_v46 }
 0x3ac   : > { %v7915_v60 = vpop.eup %7914  ;;  %5520 = vst [vmem:[%s9628_s17 + $0x2c0] sm:$0xff] %v7913_v6  ;;  %v6507_v20 = vadd.f32 %v6506_v24, %v6505_v29  ;;  %7936 = vpow2.f32 %v6198_v13  ;;  %v10611_v63 = vpop.f32.mrb[176].mxu0  ;;  %v3899_v6 = vadd.f32 %v10287_v1, %v10342_v28 }
 0x3ad   : > { %v7917_v61 = vpop.eup %7916  ;;  %v4849_v0 = vadd.f32 1.0, %v7915_v60  ;;  %7938 = vpow2.f32 %v6199_v36  ;;  %v6508_v48 = vpop.f32.mrb[240].mxu1  ;;  %v6702_v36 = vadd.f32 %v10512_v51, %v10344_v42 }
 0x3ae   : > { %v7919_v32 = vpop.eup %7918  ;;  %5521 = vst [vmem:[%s9628_s17 + $0x2c8] sm:$0xff] %v7917_v61  ;;  %v10609_v55 = vadd.f32 %v6507_v20, %v3891_v62  ;;  %v10613_v18 = vpop.f32.mrb[177].mxu0  ;;  %v6703_v61 = vadd.f32 %v10516_v27, %v10346_v39 }
 0x3af   : > { %v7921_v30 = vpop.eup %7920  ;;  %7940 = vrcp.f32 %v4849_v0  ;;  %v4854_v17 = vadd.f32 1.0, %v7919_v32  ;;  %v6509_v31 = vpop.f32.mrb[241].mxu1 }
 0x3b0   : > { %v7923_v10 = vpop.eup %7922  ;;  %v4855_v9 = vadd.f32 1.0, %v7921_v30  ;;  %7942 = vpow2.f32 %v6200_v35  ;;  %v6510_v53 = vadd.f32 %v6509_v31, %v6508_v48  ;;  %v10617_v57 = vpop.f32.mrb[178].mxu0  ;;  %v6704_v30 = vadd.f32 %v10525_v49, %v10344_v42 }
 0x3b1   : > { %v7925_v23 = vpop.eup %7924  ;;  %7944 = vrcp.f32 %v4854_v17  ;;  %v4856_v12 = vadd.f32 1.0, %v7923_v10  ;;  %v6511_v2 = vpop.f32.mrb[242].mxu1  ;;  %v3904_v10 = vadd.f32 %v10297_v41, %v10342_v28  ;;  %v6205_v31 = vmul.f32 -1.442695, %v6702_v36 }
 0x3b2   : > { %v7927_v46 = vpop.eup %7926  ;;  %7946 = vrcp.f32 %v4855_v9  ;;  %v4861_v25 = vadd.f32 1.0, %v7925_v23  ;;  %v10619_v33 = vpop.f32.mrb[179].mxu0  ;;  %v10621_v29 = vadd.f32 %v6510_v53, %v3896_v59  ;;  %v3907_v49 = vadd.f32 %v10303_v3, %v10342_v28 }
 0x3b3   : > { %v6512_v52 = vpop.f32.mrb[243].mxu1  ;;  %v7929_v13 = vpop.eup %7928  ;;  %7948 = vrcp.f32 %v4856_v12  ;;  %v4862_v7 = vadd.f32 1.0, %v7927_v46  ;;  %v6705_v53 = vadd.f32 %v10527_v14, %v10346_v39  ;;  %v6706_v36 = vadd.f32 %v10531_v58, %v10344_v42 }
 0x3b4   : > { %v7931_v44 = vpop.eup %7930  ;;  %7950 = vrcp.f32 %v4861_v25  ;;  %v4863_v15 = vadd.f32 1.0, %v7929_v13  ;;  %v6513_v62 = vadd.f32 %v6512_v52, %v6511_v2  ;;  %v10633_v17 = vpop.f32.mrb[180].mxu0  ;;  %v6206_v25 = vmul.f32 -1.442695, %v6703_v61 }
 0x3b5   : > { %v7933_v24 = vpop.eup %7932  ;;  %7952 = vrcp.f32 %v4862_v7  ;;  %v4868_v60 = vadd.f32 1.0, %v7931_v44  ;;  %v6514_v1 = vpop.f32.mrb[244].mxu1  ;;  %v6207_v52 = vmul.f32 -1.442695, %v10523_v45  ;;  %v6707_v45 = vadd.f32 %v10533_v5, %v10346_v39 }
 0x3b6   : > { %v7935_v35 = vpop.eup %7934  ;;  %7954 = vrcp.f32 %v4863_v15  ;;  %v4869_v20 = vadd.f32 1.0, %v7933_v24  ;;  %v10631_v51 = vadd.f32 %v6513_v62, %v3899_v6  ;;  %v10637_v27 = vpop.f32.mrb[181].mxu0  ;;  %v6212_v15 = vmul.f32 -1.442695, %v6704_v30 }
 0x3b7   : > { %v7937_v0 = vpop.eup %7936  ;;  %7956 = vrcp.f32 %v4868_v60  ;;  %v4870_v32 = vadd.f32 1.0, %v7935_v35  ;;  %v6515_v23 = vpop.f32.mrb[245].mxu1  ;;  %v6213_v35 = vmul.f32 -1.442695, %v6705_v53  ;;  %v6214_v58 = vmul.f32 -1.442695, %v10535_v11 }
 0x3b8   : > { %v7939_v48 = vpop.eup %7938  ;;  %7958 = vrcp.f32 %v4869_v20  ;;  %v4875_v9 = vadd.f32 1.0, %v7937_v0  ;;  %v10643_v2 = vpop.f32.mrb[182].mxu0  ;;  %v6516_v13 = vadd.f32 %v6515_v23, %v6514_v1  ;;  %v6708_v61 = vadd.f32 %v10548_v4, %v10344_v42 }
 0x3b9   : > { %v7941_v59 = vpop.eup %7940  ;;  %7960 = vrcp.f32 %v4870_v32  ;;  %v4876_v12 = vadd.f32 1.0, %v7939_v48  ;;  %v6517_v46 = vpop.f32.mrb[246].mxu1  ;;  %v6219_v32 = vmul.f32 -1.442695, %v6706_v36  ;;  %v6709_v30 = vadd.f32 %v10555_v56, %v10346_v39 }
 0x3ba   : > { %v7943_v41 = vpop.eup %7942  ;;  %5522 = vst.msk [vmem:[%s9628_s17 + $0x2d0] sm:$0xff] %vm5437_vm4, %v7941_v59  ;;  %7962 = vrcp.f32 %v4875_v9  ;;  %v10648_v7 = vpop.f32.mrb[183].mxu0  ;;  %v10655_v6 = vadd.f32 %v6516_v13, %v3904_v10  ;;  %v6220_v11 = vmul.f32 -1.442695, %v6707_v45  ;;  %v3912_v23 = vadd.f32 %v10321_v40, %v10342_v28 }
 0x3bb   : > { %v6518_v3 = vpop.f32.mrb[247].mxu1  ;;  %v7945_v44 = vpop.eup %7944  ;;  %7964 = vrcp.f32 %v4876_v12  ;;  %v4877_v14 = vadd.f32 1.0, %v7943_v41  ;;  %v6221_v56 = vmul.f32 -1.442695, %v10546_v16  ;;  %v6710_v41 = vadd.f32 %v10559_v21, %v10344_v42 }
 0x3bc   : > { %v7947_v24 = vpop.eup %7946  ;;  %5527 = vst [vmem:[%s9628_s17 + $0x2f8] sm:$0xff] %v7945_v44  ;;  %7966 = vpow2.f32 %v6205_v31  ;;  %v6519_v60 = vadd.f32 %v6518_v3, %v6517_v46  ;;  %v6226_v46 = vmul.f32 -1.442695, %v6708_v61  ;;  %v6227_v16 = vmul.f32 -1.442695, %v6709_v30 }
 0x3bd   : > { %v7949_v62 = vpop.eup %7948  ;;  %5528 = vst [vmem:[%s9628_s17 + $0x300] sm:$0xff] %v7947_v24  ;;  %7968 = vrcp.f32 %v4877_v14  ;;  %v10668_v1 = vpop.f32.mrb[184].mxu0  ;;  %v3915_v44 = vadd.f32 %v10325_v38, %v10342_v28  ;;  %v6228_v14 = vmul.f32 -1.442695, %v10572_v37  ;;  %v6233_v24 = vmul.f32 -1.442695, %v6710_v41 }
 0x3be   : > { %v7951_v20 = vpop.eup %7950  ;;  %5529 = vst.msk [vmem:[%s9628_s17 + $0x308] sm:$0xff] %vm5437_vm4, %v7949_v62  ;;  %7970 = vpow2.f32 %v6206_v25  ;;  %v10663_v0 = vadd.f32 %v6519_v60, %v3907_v49  ;;  %v6520_v48 = vpop.f32.mrb[248].mxu1  ;;  %v3923_v41 = vadd.f32 %v10337_v8, %v10342_v28 }
 0x3bf   : > { %v7953_v5 = vpop.eup %7952  ;;  %5534 = vst [vmem:[%s9628_s17 + $0x330] sm:$0xff] %v7951_v20  ;;  %7972 = vpow2.f32 %v6207_v52  ;;  %v10671_v9 = vpop.f32.mrb[185].mxu0 }
 0x3c0   : > { %v7955_v10 = vpop.eup %7954  ;;  %5535 = vst [vmem:[%s9628_s17 + $0x338] sm:$0xff] %v7953_v5  ;;  %7974 = vpow2.f32 %v6212_v15  ;;  %v6521_v4 = vpop.f32.mrb[249].mxu1  ;;  %v3920_v5 = vadd.f32 %v10334_v34, %v10342_v28  ;;  %v6712_v28 = vadd.f32 %v10585_v43, %v10344_v42  ;;  %v6714_v43 = vadd.f32 %v10595_v47, %v10344_v42 }
 0x3c1   : > { %v7957_v31 = vpop.eup %7956  ;;  %5536 = vst.msk [vmem:[%s9628_s17 + $0x340] sm:$0xff] %vm5437_vm4, %v7955_v10  ;;  %7976 = vpow2.f32 %v6213_v35  ;;  %v6522_v59 = vadd.f32 %v6521_v4, %v6520_v48  ;;  %v10678_v49 = vpop.f32.mrb[186].mxu0  ;;  %v6716_v47 = vadd.f32 %v10611_v63, %v10344_v42  ;;  %v6718_v63 = vadd.f32 %v10617_v57, %v10344_v42 }
 0x3c2   : > { %v6523_v12 = vpop.f32.mrb[250].mxu1  ;;  %v7959_v53 = vpop.eup %7958  ;;  %5541 = vst [vmem:[%s9628_s17 + $0x368] sm:$0xff] %v7957_v31  ;;  %7978 = vpow2.f32 %v6214_v58 }
 0x3c3   : > { %v10683_v25 = vpop.f32.mrb[187].mxu0  ;;  %v6524_v40 = vpop.f32.mrb[251].mxu1  ;;  %5542 = vst [vmem:[%s9628_s17 + $0x370] sm:$0xff] %v7959_v53  ;;  %7980 = vpow2.f32 %v6219_v32  ;;  %v10686_v13 = vadd.f32 %v6522_v59, %v3912_v23 }
 0x3c4   : > { %v7961_v52 = vpop.eup %7960  ;;  %7982 = vpow2.f32 %v6220_v11  ;;  %v6525_v21 = vadd.f32 %v6524_v40, %v6523_v12 }
 0x3c5   : > { %v7963_v3 = vpop.eup %7962  ;;  %5543 = vst.msk [vmem:[%s9628_s17 + $0x378] sm:$0xff] %vm5437_vm4, %v7961_v52  ;;  %7984 = vpow2.f32 %v6221_v56  ;;  %v10697_v38 = vpop.f32.mrb[188].mxu0 }
 0x3c6   : > { %v7965_v15 = vpop.eup %7964  ;;  %5548 = vst [vmem:[%s9628_s17 + $0x3a0] sm:$0xff] %v7963_v3  ;;  %7986 = vpow2.f32 %v6226_v46  ;;  %v10695_v45 = vadd.f32 %v6525_v21, %v3915_v44  ;;  %v6526_v35 = vpop.f32.mrb[252].mxu1  ;;  %v6711_v44 = vadd.f32 %v10566_v19, %v10346_v39  ;;  %v6713_v19 = vadd.f32 %v10590_v26, %v10346_v39 }
 0x3c7   : > { %v7967_v36 = vpop.eup %7966  ;;  %5549 = vst [vmem:[%s9628_s17 + $0x3a8] sm:$0xff] %v7965_v15  ;;  %7988 = vpow2.f32 %v6227_v16  ;;  %v10701_v37 = vpop.f32.mrb[189].mxu0  ;;  %v6715_v26 = vadd.f32 %v10598_v50, %v10346_v39  ;;  %v6247_v50 = vmul.f32 -1.442695, %v6714_v43 }
 0x3c8   : > { %v7969_v60 = vpop.eup %7968  ;;  %v4882_v62 = vadd.f32 1.0, %v7967_v36  ;;  %7990 = vpow2.f32 %v6228_v14  ;;  %v6527_v58 = vpop.f32.mrb[253].mxu1 }
 0x3c9   : > { %v7971_v20 = vpop.eup %7970  ;;  %5550 = vst.msk [vmem:[%s9628_s17 + $0x3b0] sm:$0xff] %vm5437_vm4, %v7969_v60  ;;  %v6528_v30 = vadd.f32 %v6527_v58, %v6526_v35  ;;  %v10705_v48 = vpop.f32.mrb[190].mxu0 }
 0x3ca   : > { %v7973_v61 = vpop.eup %7972  ;;  %7992 = vrcp.f32 %v4882_v62  ;;  %v4883_v32 = vadd.f32 1.0, %v7971_v20  ;;  %v6529_v10 = vpop.f32.mrb[254].mxu1  ;;  %v6234_v20 = vmul.f32 -1.442695, %v6711_v44 }
 0x3cb   : > { %v7975_v11 = vpop.eup %7974  ;;  %v4884_v4 = vadd.f32 1.0, %v7973_v61  ;;  %7994 = vpow2.f32 %v6233_v24  ;;  %v10707_v31 = vpop.f32.mrb[191].mxu0  ;;  %v10709_v12 = vadd.f32 %v6528_v30, %v3920_v5 }
 0x3cc   : > { %v6530_v23 = vpop.f32.mrb[255].mxu1  ;;  %v7977_v56 = vpop.eup %7976  ;;  %7996 = vrcp.f32 %v4883_v32  ;;  %v4889_v59 = vadd.f32 1.0, %v7975_v11  ;;  %v6235_v32 = vmul.f32 -1.442695, %v10579_v54  ;;  %v6240_v11 = vmul.f32 -1.442695, %v6712_v28 }
 0x3cd   : > { %v7979_v53 = vpop.eup %7978  ;;  %7998 = vrcp.f32 %v4884_v4  ;;  %v4890_v34 = vadd.f32 1.0, %v7977_v56  ;;  %v6531_v52 = vadd.f32 %v6530_v23, %v6529_v10  ;;  %v6241_v23 = vmul.f32 -1.442695, %v6713_v19 }
 0x3ce   : > { %v7981_v46 = vpop.eup %7980  ;;  %8000 = vrcp.f32 %v4889_v59  ;;  %v4891_v40 = vadd.f32 1.0, %v7979_v53  ;;  %v6242_v54 = vmul.f32 -1.442695, %v10602_v22  ;;  %v6717_v53 = vadd.f32 %v10613_v18, %v10346_v39 }
 0x3cf   : > { %v7983_v16 = vpop.eup %7982  ;;  %8002 = vrcp.f32 %v4890_v34  ;;  %v4896_v3 = vadd.f32 1.0, %v7981_v46  ;;  %v10715_v15 = vadd.f32 %v6531_v52, %v3923_v41  ;;  %v6248_v46 = vmul.f32 -1.442695, %v6715_v26 }
 0x3d0   : > { %v7985_v14 = vpop.eup %7984  ;;  %8004 = vrcp.f32 %v4891_v40  ;;  %v4897_v21 = vadd.f32 1.0, %v7983_v16  ;;  %v6249_v22 = vmul.f32 -1.442695, %v10609_v55  ;;  %v6254_v18 = vmul.f32 -1.442695, %v6716_v47 }
 0x3d1   : > { %v7987_v36 = vpop.eup %7986  ;;  %8006 = vrcp.f32 %v4896_v3  ;;  %v4898_v24 = vadd.f32 1.0, %v7985_v14  ;;  %v6255_v16 = vmul.f32 -1.442695, %v6717_v53  ;;  %v6719_v3 = vadd.f32 %v10619_v33, %v10346_v39 }
 0x3d2   : > { %v7989_v60 = vpop.eup %7988  ;;  %8008 = vrcp.f32 %v4897_v21  ;;  %v4903_v8 = vadd.f32 1.0, %v7987_v36  ;;  %v6256_v55 = vmul.f32 -1.442695, %v10621_v29  ;;  %v6261_v14 = vmul.f32 -1.442695, %v6718_v63 }
 0x3d3   : > { %v7991_v62 = vpop.eup %7990  ;;  %8010 = vrcp.f32 %v4898_v24  ;;  %v4904_v35 = vadd.f32 1.0, %v7989_v60  ;;  %v6262_v24 = vmul.f32 -1.442695, %v6719_v3  ;;  %v6721_v47 = vadd.f32 %v10637_v27, %v10346_v39 }
 0x3d4   : > { %v7993_v58 = vpop.eup %7992  ;;  %8012 = vrcp.f32 %v4903_v8  ;;  %v4905_v61 = vadd.f32 1.0, %v7991_v62  ;;  %v6263_v53 = vmul.f32 -1.442695, %v10631_v51  ;;  %v6723_v27 = vadd.f32 %v10648_v7, %v10346_v39 }
 0x3d5   : > { %v7995_v5 = vpop.eup %7994  ;;  %5555 = vst [vmem:[%s9628_s17 + $0x3d8] sm:$0xff] %v7993_v58  ;;  %8014 = vrcp.f32 %v4904_v35  ;;  %v6725_v3 = vadd.f32 %v10671_v9, %v10346_v39 }
 0x3d6   : > { %v7997_v30 = vpop.eup %7996  ;;  %8016 = vrcp.f32 %v4905_v61  ;;  %v4910_v10 = vadd.f32 1.0, %v7995_v5 }
 0x3d7   : > { %v7999_v4 = vpop.eup %7998  ;;  %5556 = vst [vmem:[%s9628_s17 + $0x3e0] sm:$0xff] %v7997_v30  ;;  %8018 = vpow2.f32 %v6234_v20 }
 0x3d8   : > { %v8001_v56 = vpop.eup %8000  ;;  %5557 = vst.msk [vmem:[%s9628_s17 + $0x3e8] sm:$0xff] %vm5437_vm4, %v7999_v4  ;;  %8020 = vrcp.f32 %v4910_v10 }
 0x3d9   : > { %v8003_v59 = vpop.eup %8002  ;;  %5562 = vst [vmem:[%s9628_s17 + $0x410] sm:$0xff] %v8001_v56  ;;  %8022 = vpow2.f32 %v6235_v32 }
 0x3da   : > { %v8005_v34 = vpop.eup %8004  ;;  %5563 = vst [vmem:[%s9628_s17 + $0x418] sm:$0xff] %v8003_v59  ;;  %8024 = vpow2.f32 %v6240_v11 }
 0x3db   : > { %v8007_v41 = vpop.eup %8006  ;;  %5564 = vst.msk [vmem:[%s9628_s17 + $0x420] sm:$0xff] %vm5437_vm4, %v8005_v34  ;;  %8026 = vpow2.f32 %v6241_v23  ;;  %v6720_v23 = vadd.f32 %v10633_v17, %v10344_v42 }
 0x3dc   : > { %v8009_v40 = vpop.eup %8008  ;;  %5569 = vst [vmem:[%s9628_s17 + $0x448] sm:$0xff] %v8007_v41  ;;  %8028 = vpow2.f32 %v6242_v54  ;;  %v6722_v41 = vadd.f32 %v10643_v2, %v10344_v42  ;;  %v6270_v2 = vmul.f32 -1.442695, %v10655_v6  ;;  %v6277_v6 = vmul.f32 -1.442695, %v10663_v0 }
 0x3dd   : > { %v8011_v52 = vpop.eup %8010  ;;  %5570 = vst [vmem:[%s9628_s17 + $0x450] sm:$0xff] %v8009_v40  ;;  %8030 = vpow2.f32 %v6247_v50  ;;  %v6284_v0 = vmul.f32 -1.442695, %v10686_v13 }
 0x3de   : > { %v8013_v44 = vpop.eup %8012  ;;  %5571 = vst.msk [vmem:[%s9628_s17 + $0x458] sm:$0xff] %vm5437_vm4, %v8011_v52  ;;  %8032 = vpow2.f32 %v6248_v46  ;;  %v6724_v52 = vadd.f32 %v10668_v1, %v10344_v42  ;;  %v6275_v7 = vmul.f32 -1.442695, %v6722_v41  ;;  %v6726_v1 = vadd.f32 %v10678_v49, %v10344_v42 }
 0x3df   : > { %v8015_v57 = vpop.eup %8014  ;;  %5576 = vst [vmem:[%s9628_s17 + $0x480] sm:$0xff] %v8013_v44  ;;  %8034 = vpow2.f32 %v6249_v22  ;;  %v6268_v22 = vmul.f32 -1.442695, %v6720_v23  ;;  %v6728_v23 = vadd.f32 %v10697_v38, %v10344_v42  ;;  %v6730_v38 = vadd.f32 %v10705_v48, %v10344_v42 }
 0x3e0   : > { %v8017_v21 = vpop.eup %8016  ;;  %5577 = vst [vmem:[%s9628_s17 + $0x488] sm:$0xff] %v8015_v57  ;;  %8036 = vpow2.f32 %v6254_v18  ;;  %v6269_v18 = vmul.f32 -1.442695, %v6721_v47  ;;  %v6282_v9 = vmul.f32 -1.442695, %v6724_v52 }
 0x3e1   : > { %v8019_v36 = vpop.eup %8018  ;;  %5578 = vst.msk [vmem:[%s9628_s17 + $0x490] sm:$0xff] %vm5437_vm4, %v8017_v21  ;;  %8038 = vpow2.f32 %v6255_v16  ;;  %v6727_v21 = vadd.f32 %v10683_v25, %v10346_v39  ;;  %v6303_v48 = vmul.f32 -1.442695, %v6730_v38 }
 0x3e2   : > { %v8021_v33 = vpop.eup %8020  ;;  %v4911_v60 = vadd.f32 1.0, %v8019_v36  ;;  %8040 = vpow2.f32 %v6256_v55  ;;  %v6276_v55 = vmul.f32 -1.442695, %v6723_v27 }
 0x3e3   : > { %v8023_v8 = vpop.eup %8022  ;;  %5583 = vst [vmem:[%s9628_s17 + $0x4b8] sm:$0xff] %v8021_v33  ;;  %8042 = vpow2.f32 %v6261_v14  ;;  %v6290_v25 = vmul.f32 -1.442695, %v6727_v21 }
 0x3e4   : > { %v8025_v29 = vpop.eup %8024  ;;  %8044 = vrcp.f32 %v4911_v60  ;;  %v4912_v28 = vadd.f32 1.0, %v8023_v8  ;;  %v6289_v60 = vmul.f32 -1.442695, %v6726_v1 }
 0x3e5   : > { %v8027_v62 = vpop.eup %8026  ;;  %v4917_v35 = vadd.f32 1.0, %v8025_v29  ;;  %8046 = vpow2.f32 %v6262_v24  ;;  %v6283_v24 = vmul.f32 -1.442695, %v6725_v3 }
 0x3e6   : > { %v8029_v20 = vpop.eup %8028  ;;  %8048 = vrcp.f32 %v4912_v28  ;;  %v4918_v19 = vadd.f32 1.0, %v8027_v62  ;;  %v6291_v62 = vmul.f32 -1.442695, %v10695_v45 }
 0x3e7   : > { %v8031_v58 = vpop.eup %8030  ;;  %8050 = vrcp.f32 %v4917_v35  ;;  %v4919_v61 = vadd.f32 1.0, %v8029_v20 }
 0x3e8   : > { %v8033_v5 = vpop.eup %8032  ;;  %8052 = vrcp.f32 %v4918_v19  ;;  %v4924_v32 = vadd.f32 1.0, %v8031_v58 }
 0x3e9   : > { %v8035_v43 = vpop.eup %8034  ;;  %8054 = vrcp.f32 %v4919_v61  ;;  %v4925_v30 = vadd.f32 1.0, %v8033_v5 }
 0x3ea   : > { %v8037_v10 = vpop.eup %8036  ;;  %8056 = vrcp.f32 %v4924_v32  ;;  %v4926_v11 = vadd.f32 1.0, %v8035_v43 }
 0x3eb   : > { %v8039_v26 = vpop.eup %8038  ;;  %8058 = vrcp.f32 %v4925_v30  ;;  %v4931_v4 = vadd.f32 1.0, %v8037_v10 }
 0x3ec   : > { %v8041_v56 = vpop.eup %8040  ;;  %8060 = vrcp.f32 %v4926_v11  ;;  %v4932_v54 = vadd.f32 1.0, %v8039_v26 }
 0x3ed   : > { %v8043_v59 = vpop.eup %8042  ;;  %8062 = vrcp.f32 %v4931_v4  ;;  %v4933_v50 = vadd.f32 1.0, %v8041_v56 }
 0x3ee   : > { %v8045_v34 = vpop.eup %8044  ;;  %8064 = vrcp.f32 %v4932_v54  ;;  %v4938_v46 = vadd.f32 1.0, %v8043_v59 }
 0x3ef   : > { %v8047_v17 = vpop.eup %8046  ;;  %5584 = vst [vmem:[%s9628_s17 + $0x4c0] sm:$0xff] %v8045_v34  ;;  %8066 = vrcp.f32 %v4933_v50  ;;  %v6729_v50 = vadd.f32 %v10701_v37, %v10346_v39 }
 0x3f0   : > { %v8049_v63 = vpop.eup %8048  ;;  %8068 = vrcp.f32 %v4938_v46  ;;  %v4939_v40 = vadd.f32 1.0, %v8047_v17  ;;  %v6296_v17 = vmul.f32 -1.442695, %v6728_v23 }
 0x3f1   : > { %v8051_v51 = vpop.eup %8050  ;;  %5585 = vst.msk [vmem:[%s9628_s17 + $0x4c8] sm:$0xff] %vm5437_vm4, %v8049_v63  ;;  %8070 = vpow2.f32 %v6263_v53  ;;  %v6731_v63 = vadd.f32 %v10707_v31, %v10346_v39  ;;  %v6297_v37 = vmul.f32 -1.442695, %v6729_v50 }
 0x3f2   : > { %v8053_v16 = vpop.eup %8052  ;;  %5590 = vst [vmem:[%s9628_s17 + $0x4f0] sm:$0xff] %v8051_v51  ;;  %8072 = vrcp.f32 %v4939_v40 }
 0x3f3   : > { %v8055_v44 = vpop.eup %8054  ;;  %5591 = vst [vmem:[%s9628_s17 + $0x4f8] sm:$0xff] %v8053_v16  ;;  %8074 = vpow2.f32 %v6268_v22  ;;  %v6304_v39 = vmul.f32 -1.442695, %v6731_v63  ;;  %v6305_v16 = vmul.f32 -1.442695, %v10715_v15 }
 0x3f4   : > { %v8057_v57 = vpop.eup %8056  ;;  %5592 = vst.msk [vmem:[%s9628_s17 + $0x500] sm:$0xff] %vm5437_vm4, %v8055_v44  ;;  %8076 = vpow2.f32 %v6269_v18 }
 0x3f5   : > { %v8059_v14 = vpop.eup %8058  ;;  %5597 = vst [vmem:[%s9628_s17 + $0x528] sm:$0xff] %v8057_v57  ;;  %8078 = vpow2.f32 %v6270_v2  ;;  %v6298_v2 = vmul.f32 -1.442695, %v10709_v12 }
 0x3f6   : > { %v8061_v36 = vpop.eup %8060  ;;  %5598 = vst [vmem:[%s9628_s17 + $0x530] sm:$0xff] %v8059_v14  ;;  %8080 = vpow2.f32 %v6275_v7 }
 0x3f7   : > { %v8063_v33 = vpop.eup %8062  ;;  %5599 = vst.msk [vmem:[%s9628_s17 + $0x538] sm:$0xff] %vm5437_vm4, %v8061_v36  ;;  %8082 = vpow2.f32 %v6276_v55 }
 0x3f8   : > { %v8065_v49 = vpop.eup %8064  ;;  %5604 = vst [vmem:[%s9628_s17 + $0x560] sm:$0xff] %v8063_v33  ;;  %8084 = vpow2.f32 %v6277_v6 }
 0x3f9   : > { %v8067_v8 = vpop.eup %8066  ;;  %5605 = vst [vmem:[%s9628_s17 + $0x568] sm:$0xff] %v8065_v49  ;;  %8086 = vpow2.f32 %v6282_v9 }
 0x3fa   : > { %v8069_v29 = vpop.eup %8068  ;;  %5606 = vst.msk [vmem:[%s9628_s17 + $0x570] sm:$0xff] %vm5437_vm4, %v8067_v8  ;;  %8088 = vpow2.f32 %v6283_v24 }
 0x3fb   : > { %v8071_v28 = vpop.eup %8070  ;;  %5611 = vst [vmem:[%s9628_s17 + $0x598] sm:$0xff] %v8069_v29  ;;  %8090 = vpow2.f32 %v6284_v0 }
 0x3fc   : > { %v8073_v35 = vpop.eup %8072  ;;  %v4940_v13 = vadd.f32 1.0, %v8071_v28  ;;  %8092 = vpow2.f32 %v6289_v60 }
 0x3fd   : > { %v8075_v20 = vpop.eup %8074  ;;  %5612 = vst [vmem:[%s9628_s17 + $0x5a0] sm:$0xff] %v8073_v35  ;;  %8094 = vpow2.f32 %v6290_v25 }
 0x3fe   : > { %v8077_v19 = vpop.eup %8076  ;;  %8096 = vrcp.f32 %v4940_v13  ;;  %v4945_v58 = vadd.f32 1.0, %v8075_v20 }
 0x3ff   : > { %v8079_v61 = vpop.eup %8078  ;;  %v4946_v5 = vadd.f32 1.0, %v8077_v19  ;;  %8098 = vpow2.f32 %v6291_v62 }
 0x400   : > { %v8081_v32 = vpop.eup %8080  ;;  %8100 = vrcp.f32 %v4945_v58  ;;  %v4947_v43 = vadd.f32 1.0, %v8079_v61 }
 0x401   : > { %v8083_v30 = vpop.eup %8082  ;;  %8102 = vrcp.f32 %v4946_v5  ;;  %v4952_v10 = vadd.f32 1.0, %v8081_v32 }
 0x402   : > { %v8085_v11 = vpop.eup %8084  ;;  %8104 = vrcp.f32 %v4947_v43  ;;  %v4953_v45 = vadd.f32 1.0, %v8083_v30 }
 0x403   : > { %v8087_v26 = vpop.eup %8086  ;;  %8106 = vrcp.f32 %v4952_v10  ;;  %v4954_v4 = vadd.f32 1.0, %v8085_v11 }
 0x404   : > { %v8089_v56 = vpop.eup %8088  ;;  %8108 = vrcp.f32 %v4953_v45  ;;  %v4959_v54 = vadd.f32 1.0, %v8087_v26 }
 0x405   : > { %v8091_v47 = vpop.eup %8090  ;;  %8110 = vrcp.f32 %v4954_v4  ;;  %v4960_v59 = vadd.f32 1.0, %v8089_v56 }
 0x406   : > { %v8093_v53 = vpop.eup %8092  ;;  %8112 = vrcp.f32 %v4959_v54  ;;  %v4961_v34 = vadd.f32 1.0, %v8091_v47 }
 0x407   : > { %v8095_v46 = vpop.eup %8094  ;;  %8114 = vrcp.f32 %v4960_v59  ;;  %v4966_v41 = vadd.f32 1.0, %v8093_v53 }
 0x408   : > { %v8097_v22 = vpop.eup %8096  ;;  %8116 = vrcp.f32 %v4961_v34  ;;  %v4967_v27 = vadd.f32 1.0, %v8095_v46 }
 0x409   : > { %v8099_v40 = vpop.eup %8098  ;;  %5613 = vst.msk [vmem:[%s9628_s17 + $0x5a8] sm:$0xff] %vm5437_vm4, %v8097_v22  ;;  %8118 = vrcp.f32 %v4966_v41 }
 0x40a   : > { %v8101_v18 = vpop.eup %8100  ;;  %8120 = vrcp.f32 %v4967_v27  ;;  %v4968_v51 = vadd.f32 1.0, %v8099_v40 }
 0x40b   : > { %v8103_v42 = vpop.eup %8102  ;;  %5618 = vst [vmem:[%s9628_s17 + $0x5d0] sm:$0xff] %v8101_v18  ;;  %8122 = vpow2.f32 %v6296_v17 }
 0x40c   : > { %v8105_v52 = vpop.eup %8104  ;;  %5619 = vst [vmem:[%s9628_s17 + $0x5d8] sm:$0xff] %v8103_v42  ;;  %8124 = vrcp.f32 %v4968_v51 }
 0x40d   : > { %v8107_v31 = vpop.eup %8106  ;;  %5620 = vst.msk [vmem:[%s9628_s17 + $0x5e0] sm:$0xff] %vm5437_vm4, %v8105_v52  ;;  %8126 = vpow2.f32 %v6297_v37 }
 0x40e   : > { %v8109_v12 = vpop.eup %8108  ;;  %5625 = vst [vmem:[%s9628_s17 + $0x608] sm:$0xff] %v8107_v31  ;;  %8128 = vpow2.f32 %v6298_v2 }
 0x40f   : > { %v8111_v7 = vpop.eup %8110  ;;  %5626 = vst [vmem:[%s9628_s17 + $0x610] sm:$0xff] %v8109_v12  ;;  %8130 = vpow2.f32 %v6303_v48 }
 0x410   : > { %v8113_v3 = vpop.eup %8112  ;;  %5627 = vst.msk [vmem:[%s9628_s17 + $0x618] sm:$0xff] %vm5437_vm4, %v8111_v7  ;;  %8132 = vpow2.f32 %v6304_v39 }
 0x411   : > { %v8115_v44 = vpop.eup %8114  ;;  %5632 = vst [vmem:[%s9628_s17 + $0x640] sm:$0xff] %v8113_v3  ;;  %8134 = vpow2.f32 %v6305_v16 }
 0x412   : > { %v8117_v55 = vpop.eup %8116  ;;  %5633 = vst [vmem:[%s9628_s17 + $0x648] sm:$0xff] %v8115_v44 }
 0x413   : > { %v8119_v15 = vpop.eup %8118  ;;  %5634 = vst.msk [vmem:[%s9628_s17 + $0x650] sm:$0xff] %vm5437_vm4, %v8117_v55 }
 0x414   : > { %v8121_v57 = vpop.eup %8120  ;;  %5639 = vst [vmem:[%s9628_s17 + $0x678] sm:$0xff] %v8119_v15 }
 0x415   : > { %v8123_v6 = vpop.eup %8122  ;;  %5640 = vst [vmem:[%s9628_s17 + $0x680] sm:$0xff] %v8121_v57 }
 0x416   : > { %v8125_v1 = vpop.eup %8124  ;;  %v4973_v14 = vadd.f32 1.0, %v8123_v6 }
 0x417   : > { %v8127_v9 = vpop.eup %8126  ;;  %5641 = vst.msk [vmem:[%s9628_s17 + $0x688] sm:$0xff] %vm5437_vm4, %v8125_v1 }
 0x418   : > { %v8129_v21 = vpop.eup %8128  ;;  %8136 = vrcp.f32 %v4973_v14  ;;  %v4974_v36 = vadd.f32 1.0, %v8127_v9 }
 0x419   : > { %v8131_v24 = vpop.eup %8130  ;;  %v4975_v33 = vadd.f32 1.0, %v8129_v21 }
 0x41a   : > { %v8133_v0 = vpop.eup %8132  ;;  %8138 = vrcp.f32 %v4974_v36  ;;  %v4980_v49 = vadd.f32 1.0, %v8131_v24 }
 0x41b   : > { %v8135_v60 = vpop.eup %8134  ;;  %8140 = vrcp.f32 %v4975_v33  ;;  %v4981_v8 = vadd.f32 1.0, %v8133_v0 }
 0x41c   : > { %8142 = vrcp.f32 %v4980_v49  ;;  %v4982_v25 = vadd.f32 1.0, %v8135_v60 }
 0x41d   : > { %8144 = vrcp.f32 %v4981_v8 }
 0x41e   : > { %8146 = vrcp.f32 %v4982_v25 }
 0x422   : > { %v8137_v29 = vpop.eup %8136 }
 0x423   : > { %5646 = vst [vmem:[%s9628_s17 + $0x6b0] sm:$0xff] %v8137_v29 }
 0x424   : > { %v8139_v28 = vpop.eup %8138 }
 0x425   : > { %v8141_v62 = vpop.eup %8140  ;;  %5647 = vst [vmem:[%s9628_s17 + $0x6b8] sm:$0xff] %v8139_v28 }
 0x426   : > { %v8143_v35 = vpop.eup %8142  ;;  %5648 = vst.msk [vmem:[%s9628_s17 + $0x6c0] sm:$0xff] %vm5437_vm4, %v8141_v62 }
 0x427   : > { %v8145_v13 = vpop.eup %8144  ;;  %5653 = vst [vmem:[%s9628_s17 + $0x6e8] sm:$0xff] %v8143_v35 }
 0x428   : > { %v8147_v20 = vpop.eup %8146  ;;  %5654 = vst [vmem:[%s9628_s17 + $0x6f0] sm:$0xff] %v8145_v13 }
 0x429   : > { %5655 = vst.msk [vmem:[%s9628_s17 + $0x6f8] sm:$0xff] %vm5437_vm4, %v8147_v20 }
 0x42a PF: > { %s15_s18 = sadd.s32 1, %s8155_s18  }
 0x42b   : > { %p12_p4 = scmp.ge.s32.totalorder %s15_s18, 4  }
 0x42d   :  { %14 = sbr.rel (!%p12_p4) target bundleno = 1 (0x1), region = 70 }

</bundles_post_ra>
